<compile_context>
chip_gen: v7x
topology: tpu7x:2x2x1
jax: 0.10.0
libtpu: 0.0.40
codegen_flags: <defaults>
</compile_context>

<pallas_src>
import functools

import jax
import jax.numpy as jnp
from jax.experimental import pallas as pl
from jax.experimental.pallas import tpu as pltpu


# ---------------------------------------------------------------------------
# Static helpers for the in-kernel 3x3 depthwise convolution.
# ---------------------------------------------------------------------------
def _dw_shift_amounts(H, W):
    """pltpu.roll amounts so rolled[p] = x[p + dy*W + dx] (before masking)."""
    shifts = []
    for dy in (-1, 0, 1):
        for dx in (-1, 0, 1):
            shifts.append((-(dy * W + dx)) % (H * W))
    return tuple(shifts)


def _dw_boundary_masks(H, W):
    """(9, 1, H*W) f32 0/1 masks: valid image positions for each 3x3 tap."""
    r = jnp.arange(H * W, dtype=jnp.int32) // W
    c = jnp.arange(H * W, dtype=jnp.int32) % W
    rows = []
    for dy in (-1, 0, 1):
        for dx in (-1, 0, 1):
            ok = (r + dy >= 0) & (r + dy < H) & (c + dx >= 0) & (c + dx < W)
            rows.append(ok.astype(jnp.float32))
    return jnp.stack(rows, axis=0).reshape(9, 1, H * W)


# ---------------------------------------------------------------------------
# Fused kernel: 1x1 -> dwconv3x3 -> channel attention -> project_out.
# One grid step per batch element.
# ---------------------------------------------------------------------------
def _fused_xattn_kernel(t_ref, xq_ref, xkv_ref, wq_ref, bq_ref, wkv_ref,
                        bkv_ref, qdw_ref, qdwb_ref, kvdw_ref, kvdwb_ref,
                        dwm_ref, wp_ref, bp_ref, o_ref, *, num_heads, shifts):
    f32 = jnp.float32
    xq = xq_ref[0].astype(f32)                      # (C, HW)
    xkv = xkv_ref[0].astype(f32)                    # (C, HW)
    C, _ = xq.shape

    # ---- 1x1 convolutions (channel matmuls on the MXU) -------------------
    q1 = jnp.dot(wq_ref[...].astype(f32), xq,
                 preferred_element_type=f32) + bq_ref[...].astype(f32)
    kv1 = jnp.dot(wkv_ref[...].astype(f32), xkv,
                  preferred_element_type=f32) + bkv_ref[...].astype(f32)

    # ---- 3x3 depthwise conv on the (channels, h*w) lane layout -----------
    def dw3x3(x, w9_ref, b_ref):
        acc = jnp.zeros_like(x)
        for j, shift in enumerate(shifts):
            xs = x if shift == 0 else pltpu.roll(x, shift, 1)
            tap = w9_ref[j].astype(f32)             # (Cx, 1) per-channel weight
            m = dwm_ref[j].astype(f32)              # (1, HW) boundary mask
            acc = acc + tap * (m * xs)
        return acc + b_ref[...].astype(f32)

    q = dw3x3(q1, qdw_ref, qdwb_ref)                # (C, HW)
    kv = dw3x3(kv1, kvdw_ref, kvdwb_ref)            # (2C, HW)
    k = kv[:C]
    v = kv[C:]

    # ---- channel attention, all heads folded into one block --------------
    def l2_normalize(x):
        ss = jnp.sum(x * x, axis=-1, keepdims=True)
        # torch F.normalize(dim=-1): x / max(||x||, 1e-12)
        return x * jax.lax.rsqrt(jnp.maximum(ss, 1e-24))

    qn = l2_normalize(q)
    kn = l2_normalize(k)
    s = jax.lax.dot_general(qn, kn, (((1,), (1,)), ((), ())),
                            preferred_element_type=f32)          # (C, C)

    c_head = C // num_heads
    row_idx = jax.lax.broadcasted_iota(jnp.int32, (C, C), 0)
    col_idx = jax.lax.broadcasted_iota(jnp.int32, (C, C), 1)
    row1 = jax.lax.broadcasted_iota(jnp.int32, (C, 1), 0)
    blk_mask = None
    t_rows = jnp.zeros((C, 1), f32)
    for h in range(num_heads):                       # static unroll, no int div
        lo, hi = h * c_head, (h + 1) * c_head
        in_row = (row_idx >= lo) & (row_idx < hi)
        in_col = (col_idx >= lo) & (col_idx < hi)
        blk = in_row & in_col
        blk_mask = blk if blk_mask is None else (blk_mask | blk)
        t_rows = t_rows + t_ref[h] * ((row1 >= lo) & (row1 < hi)).astype(f32)

    # Block-diagonal masked softmax == independent per-head softmax.
    logits = jnp.where(blk_mask, s * t_rows, -1e30)
    logits = logits - jnp.max(logits, axis=-1, keepdims=True)
    e = jnp.exp(logits)
    p = e * pl.reciprocal(jnp.sum(e, axis=-1, keepdims=True), approx=True)

    out = jnp.dot(p, v, preferred_element_type=f32)               # (C, HW)

    # ---- fused project_out (1x1 conv) epilogue ----------------------------
    y = jnp.dot(wp_ref[...].astype(f32), out,
                preferred_element_type=f32) + bp_ref[...].astype(f32)
    o_ref[0] = y.astype(o_ref.dtype)


# ---------------------------------------------------------------------------
# Full module forward.
# ---------------------------------------------------------------------------
@functools.partial(jax.jit, static_argnames=("num_heads",))
def cross_attention(x_q, x_kv, params, *, num_heads):
    B, C, H, W = x_q.shape
    HW = H * W
    dt = x_q.dtype

    def bias(b, n):
        return jnp.zeros((n,), dt) if b is None else b

    wq = params["q_w"].reshape(C, C)
    bq = bias(params["q_b"], C).reshape(C, 1)
    wkv = params["kv_w"].reshape(2 * C, C)
    bkv = bias(params["kv_b"], 2 * C).reshape(2 * C, 1)
    # depthwise weights (Cx,1,3,3) -> (9, Cx, 1): tap-major, per-channel column
    qdw = jnp.transpose(params["q_dw_w"].reshape(C, 9), (1, 0)).reshape(9, C, 1)
    qdwb = bias(params["q_dw_b"], C).reshape(C, 1)
    kvdw = jnp.transpose(params["kv_dw_w"].reshape(2 * C, 9),
                         (1, 0)).reshape(9, 2 * C, 1)
    kvdwb = bias(params["kv_dw_b"], 2 * C).reshape(2 * C, 1)
    wp = params["proj_w"].reshape(C, C)
    bp = bias(params["proj_b"], C).reshape(C, 1)
    temp = params["temperature"].reshape(num_heads).astype(jnp.float32)
    dwm = _dw_boundary_masks(H, W)
    shifts = _dw_shift_amounts(H, W)

    kernel = functools.partial(_fused_xattn_kernel,
                               num_heads=num_heads, shifts=shifts)

    batch_blk = pl.BlockSpec((1, C, HW), lambda b: (b, 0, 0))

    def bcast2(shape):
        return pl.BlockSpec(shape, lambda b: (0, 0))

    def bcast3(shape):
        return pl.BlockSpec(shape, lambda b: (0, 0, 0))

    out3 = pl.pallas_call(
        kernel,
        out_shape=jax.ShapeDtypeStruct((B, C, HW), dt),
        grid=(B,),
        in_specs=[
            pl.BlockSpec(memory_space=pltpu.MemorySpace.SMEM),   # temperature
            batch_blk,                                           # x_q
            batch_blk,                                           # x_kv
            bcast2((C, C)), bcast2((C, 1)),                      # q 1x1
            bcast2((2 * C, C)), bcast2((2 * C, 1)),              # kv 1x1
            bcast3((9, C, 1)), bcast2((C, 1)),                   # q dwconv
            bcast3((9, 2 * C, 1)), bcast2((2 * C, 1)),           # kv dwconv
            bcast3((9, 1, HW)),                                  # dw tap masks
            bcast2((C, C)), bcast2((C, 1)),                      # project_out
        ],
        out_specs=batch_blk,
        compiler_params=pltpu.CompilerParams(
            dimension_semantics=("parallel",)),
    )(temp, x_q.reshape(B, C, HW), x_kv.reshape(B, C, HW),
      wq, bq, wkv, bkv, qdw, qdwb, kvdw, kvdwb, dwm, wp, bp)
    return out3.reshape(B, C, H, W)


# ---------------------------------------------------------------------------
# Pure-JAX reference for validation.
# ---------------------------------------------------------------------------
def _reference(x_q, x_kv, params, num_heads):
    P = jax.lax.Precision.HIGHEST
    B, C, H, W = x_q.shape

    def conv1x1(x, w, b):
        y = jax.lax.conv_general_dilated(
            x, w, (1, 1), "VALID",
            dimension_numbers=("NCHW", "OIHW", "NCHW"), precision=P)
        return y + b[None, :, None, None]

    def dw3x3(x, w, b):
        y = jax.lax.conv_general_dilated(
            x, w, (1, 1), ((1, 1), (1, 1)),
            dimension_numbers=("NCHW", "OIHW", "NCHW"),
            feature_group_count=x.shape[1], precision=P)
        return y + b[None, :, None, None]

    q = dw3x3(conv1x1(x_q, params["q_w"], params["q_b"]),
              params["q_dw_w"], params["q_dw_b"])
    kv = dw3x3(conv1x1(x_kv, params["kv_w"], params["kv_b"]),
               params["kv_dw_w"], params["kv_dw_b"])
    k, v = kv[:, :C], kv[:, C:]

    ch = C // num_heads
    qr = q.reshape(B, num_heads, ch, H * W)
    kr = k.reshape(B, num_heads, ch, H * W)
    vr = v.reshape(B, num_heads, ch, H * W)
    qn = qr / jnp.maximum(jnp.linalg.norm(qr, axis=-1, keepdims=True), 1e-12)
    kn = kr / jnp.maximum(jnp.linalg.norm(kr, axis=-1, keepdims=True), 1e-12)
    attn = jnp.einsum("bhcx,bhdx->bhcd", qn, kn, precision=P)
    attn = attn * params["temperature"][None]
    attn = jax.nn.softmax(attn, axis=-1)
    out = jnp.einsum("bhcd,bhdx->bhcx", attn, vr, precision=P)
    out = out.reshape(B, C, H, W)
    return conv1x1(out, params["proj_w"], params["proj_b"])


if __name__ == "__main__":
    key = jax.random.PRNGKey(0)
    B, dim, H, W = 2, 32, 16, 16
    num_heads = 4
    ks = jax.random.split(key, 12)

    x_q = jax.random.normal(ks[0], (B, dim, H, W), dtype=jnp.float32)
    x_kv = jax.random.normal(ks[1], (B, dim, H, W), dtype=jnp.float32)

    def rand(k, shape, scale=0.1):
        return jax.random.normal(k, shape, dtype=jnp.float32) * scale

    params = {
        # Module init is ones; perturb deterministically to exercise the
        # per-head temperature path.
        "temperature": 1.0 + 0.1 * jnp.arange(num_heads, dtype=jnp.float32
                                              ).reshape(num_heads, 1, 1),
        "q_w": rand(ks[2], (dim, dim, 1, 1)),
        "q_b": rand(ks[3], (dim,)),
        "q_dw_w": rand(ks[4], (dim, 1, 3, 3)),
        "q_dw_b": rand(ks[5], (dim,)),
        "kv_w": rand(ks[6], (dim * 2, dim, 1, 1)),
        "kv_b": rand(ks[7], (dim * 2,)),
        "kv_dw_w": rand(ks[8], (dim * 2, 1, 3, 3)),
        "kv_dw_b": rand(ks[9], (dim * 2,)),
        "proj_w": rand(ks[10], (dim, dim, 1, 1)),
        "proj_b": rand(ks[11], (dim,)),
    }

    out = cross_attention(x_q, x_kv, params, num_heads=num_heads)
    out = jax.block_until_ready(out)

    ref = _reference(x_q, x_kv, params, num_heads)
    assert out.shape == (B, dim, H, W)
    assert jnp.allclose(out, ref, atol=2e-3, rtol=2e-2), float(
        jnp.max(jnp.abs(out - ref)))

    print("KERNEL_OK")
</pallas_src>

<mosaic_0001>
module attributes {stable_mosaic.version = 11 : i64} {
  func.func @_fused_xattn_kernel(%arg0: i32, %arg1: memref<4xf32, #tpu.memory_space<smem>>, %arg2: memref<1x32x256xf32, #tpu.memory_space<vmem>>, %arg3: memref<1x32x256xf32, #tpu.memory_space<vmem>>, %arg4: memref<32x32xf32, #tpu.memory_space<vmem>>, %arg5: memref<32x1xf32, #tpu.memory_space<vmem>>, %arg6: memref<64x32xf32, #tpu.memory_space<vmem>>, %arg7: memref<64x1xf32, #tpu.memory_space<vmem>>, %arg8: memref<9x32x1xf32, #tpu.memory_space<vmem>>, %arg9: memref<32x1xf32, #tpu.memory_space<vmem>>, %arg10: memref<9x64x1xf32, #tpu.memory_space<vmem>>, %arg11: memref<64x1xf32, #tpu.memory_space<vmem>>, %arg12: memref<9x1x256xf32, #tpu.memory_space<vmem>>, %arg13: memref<32x32xf32, #tpu.memory_space<vmem>>, %arg14: memref<32x1xf32, #tpu.memory_space<vmem>>, %arg15: memref<1x32x256xf32, #tpu.memory_space<vmem>>) attributes {dimension_semantics = [#tpu.dimension_semantics<parallel>], iteration_bounds = array<i64: 2>, scalar_prefetch = 0 : i64, scratch_operands = 0 : i64, tpu.core_type = #tpu.core_type<tc>, window_params = [{transform_indices = @transform_0, window_bounds = array<i64: 4>}, {transform_indices = @transform_1, window_bounds = array<i64: 1, 32, 256>}, {transform_indices = @transform_2, window_bounds = array<i64: 1, 32, 256>}, {pipeline_mode = #tpu.pipeline_mode<synchronous>, transform_indices = @transform_3, window_bounds = array<i64: 32, 32>}, {pipeline_mode = #tpu.pipeline_mode<synchronous>, transform_indices = @transform_4, window_bounds = array<i64: 32, 1>}, {pipeline_mode = #tpu.pipeline_mode<synchronous>, transform_indices = @transform_5, window_bounds = array<i64: 64, 32>}, {pipeline_mode = #tpu.pipeline_mode<synchronous>, transform_indices = @transform_6, window_bounds = array<i64: 64, 1>}, {pipeline_mode = #tpu.pipeline_mode<synchronous>, transform_indices = @transform_7, window_bounds = array<i64: 9, 32, 1>}, {pipeline_mode = #tpu.pipeline_mode<synchronous>, transform_indices = @transform_8, window_bounds = array<i64: 32, 1>}, {pipeline_mode = #tpu.pipeline_mode<synchronous>, transform_indices = @transform_9, window_bounds = array<i64: 9, 64, 1>}, {pipeline_mode = #tpu.pipeline_mode<synchronous>, transform_indices = @transform_10, window_bounds = array<i64: 64, 1>}, {pipeline_mode = #tpu.pipeline_mode<synchronous>, transform_indices = @transform_11, window_bounds = array<i64: 9, 1, 256>}, {pipeline_mode = #tpu.pipeline_mode<synchronous>, transform_indices = @transform_12, window_bounds = array<i64: 32, 32>}, {pipeline_mode = #tpu.pipeline_mode<synchronous>, transform_indices = @transform_13, window_bounds = array<i64: 32, 1>}, {transform_indices = @transform_14, window_bounds = array<i64: 1, 32, 256>}]} {
    %c0 = arith.constant 0 : index
    %c0_0 = arith.constant 0 : index
    %c0_1 = arith.constant 0 : index
    %0 = vector.load %arg2[%c0, %c0_0, %c0_1] : memref<1x32x256xf32, #tpu.memory_space<vmem>>, vector<1x32x256xf32>
    %1 = vector.shape_cast %0 : vector<1x32x256xf32> to vector<32x256xf32>
    %c0_2 = arith.constant 0 : index
    %c0_3 = arith.constant 0 : index
    %c0_4 = arith.constant 0 : index
    %2 = vector.load %arg3[%c0_2, %c0_3, %c0_4] : memref<1x32x256xf32, #tpu.memory_space<vmem>>, vector<1x32x256xf32>
    %3 = vector.shape_cast %2 : vector<1x32x256xf32> to vector<32x256xf32>
    %c0_5 = arith.constant 0 : index
    %c0_6 = arith.constant 0 : index
    %4 = vector.load %arg4[%c0_5, %c0_6] : memref<32x32xf32, #tpu.memory_space<vmem>>, vector<32x32xf32>
    %cst = arith.constant dense<0.000000e+00> : vector<32x256xf32>
    %5 = tpu.matmul %4, %1, %cst {dimension_numbers = #tpu.dot_dimension_numbers<[1], [0], [0], [1], [0, 0, 1, 1], [], []>} : vector<32x32xf32>, vector<32x256xf32>, vector<32x256xf32> -> vector<32x256xf32>
    %c0_7 = arith.constant 0 : index
    %c0_8 = arith.constant 0 : index
    %6 = vector.load %arg5[%c0_7, %c0_8] : memref<32x1xf32, #tpu.memory_space<vmem>>, vector<32x1xf32>
    %7 = vector.broadcast %6 : vector<32x1xf32> to vector<32x256xf32>
    %8 = arith.addf %5, %7 : vector<32x256xf32>
    %c0_9 = arith.constant 0 : index
    %c0_10 = arith.constant 0 : index
    %9 = vector.load %arg6[%c0_9, %c0_10] : memref<64x32xf32, #tpu.memory_space<vmem>>, vector<64x32xf32>
    %cst_11 = arith.constant dense<0.000000e+00> : vector<64x256xf32>
    %10 = tpu.matmul %9, %3, %cst_11 {dimension_numbers = #tpu.dot_dimension_numbers<[1], [0], [0], [1], [0, 0, 1, 1], [], []>} : vector<64x32xf32>, vector<32x256xf32>, vector<64x256xf32> -> vector<64x256xf32>
    %c0_12 = arith.constant 0 : index
    %c0_13 = arith.constant 0 : index
    %11 = vector.load %arg7[%c0_12, %c0_13] : memref<64x1xf32, #tpu.memory_space<vmem>>, vector<64x1xf32>
    %12 = vector.broadcast %11 : vector<64x1xf32> to vector<64x256xf32>
    %13 = arith.addf %10, %12 : vector<64x256xf32>
    %cst_14 = arith.constant 0.000000e+00 : f32
    %14 = vector.broadcast %cst_14 : f32 to vector<32x256xf32>
    %c17_i32 = arith.constant 17 : i32
    %15 = tpu.dynamic_rotate %8 by %c17_i32 dim 1 : vector<32x256xf32>, i32 -> vector<32x256xf32>
    %c0_15 = arith.constant 0 : index
    %c0_16 = arith.constant 0 : index
    %c0_17 = arith.constant 0 : index
    %16 = vector.load %arg8[%c0_15, %c0_16, %c0_17] : memref<9x32x1xf32, #tpu.memory_space<vmem>>, vector<1x32x1xf32>
    %17 = vector.shape_cast %16 : vector<1x32x1xf32> to vector<32x1xf32>
    %c0_18 = arith.constant 0 : index
    %c0_19 = arith.constant 0 : index
    %c0_20 = arith.constant 0 : index
    %18 = vector.load %arg12[%c0_18, %c0_19, %c0_20] : memref<9x1x256xf32, #tpu.memory_space<vmem>>, vector<1x1x256xf32>
    %19 = vector.shape_cast %18 : vector<1x1x256xf32> to vector<1x256xf32>
    %20 = vector.broadcast %19 : vector<1x256xf32> to vector<32x256xf32>
    %21 = arith.mulf %20, %15 : vector<32x256xf32>
    %22 = vector.broadcast %17 : vector<32x1xf32> to vector<32x256xf32>
    %23 = arith.mulf %22, %21 : vector<32x256xf32>
    %24 = arith.addf %14, %23 : vector<32x256xf32>
    %c16_i32 = arith.constant 16 : i32
    %25 = tpu.dynamic_rotate %8 by %c16_i32 dim 1 : vector<32x256xf32>, i32 -> vector<32x256xf32>
    %c1 = arith.constant 1 : index
    %c0_21 = arith.constant 0 : index
    %c0_22 = arith.constant 0 : index
    %26 = vector.load %arg8[%c1, %c0_21, %c0_22] : memref<9x32x1xf32, #tpu.memory_space<vmem>>, vector<1x32x1xf32>
    %27 = vector.shape_cast %26 : vector<1x32x1xf32> to vector<32x1xf32>
    %c1_23 = arith.constant 1 : index
    %c0_24 = arith.constant 0 : index
    %c0_25 = arith.constant 0 : index
    %28 = vector.load %arg12[%c1_23, %c0_24, %c0_25] : memref<9x1x256xf32, #tpu.memory_space<vmem>>, vector<1x1x256xf32>
    %29 = vector.shape_cast %28 : vector<1x1x256xf32> to vector<1x256xf32>
    %30 = vector.broadcast %29 : vector<1x256xf32> to vector<32x256xf32>
    %31 = arith.mulf %30, %25 : vector<32x256xf32>
    %32 = vector.broadcast %27 : vector<32x1xf32> to vector<32x256xf32>
    %33 = arith.mulf %32, %31 : vector<32x256xf32>
    %34 = arith.addf %24, %33 : vector<32x256xf32>
    %c15_i32 = arith.constant 15 : i32
    %35 = tpu.dynamic_rotate %8 by %c15_i32 dim 1 : vector<32x256xf32>, i32 -> vector<32x256xf32>
    %c2 = arith.constant 2 : index
    %c0_26 = arith.constant 0 : index
    %c0_27 = arith.constant 0 : index
    %36 = vector.load %arg8[%c2, %c0_26, %c0_27] : memref<9x32x1xf32, #tpu.memory_space<vmem>>, vector<1x32x1xf32>
    %37 = vector.shape_cast %36 : vector<1x32x1xf32> to vector<32x1xf32>
    %c2_28 = arith.constant 2 : index
    %c0_29 = arith.constant 0 : index
    %c0_30 = arith.constant 0 : index
    %38 = vector.load %arg12[%c2_28, %c0_29, %c0_30] : memref<9x1x256xf32, #tpu.memory_space<vmem>>, vector<1x1x256xf32>
    %39 = vector.shape_cast %38 : vector<1x1x256xf32> to vector<1x256xf32>
    %40 = vector.broadcast %39 : vector<1x256xf32> to vector<32x256xf32>
    %41 = arith.mulf %40, %35 : vector<32x256xf32>
    %42 = vector.broadcast %37 : vector<32x1xf32> to vector<32x256xf32>
    %43 = arith.mulf %42, %41 : vector<32x256xf32>
    %44 = arith.addf %34, %43 : vector<32x256xf32>
    %c1_i32 = arith.constant 1 : i32
    %45 = tpu.dynamic_rotate %8 by %c1_i32 dim 1 : vector<32x256xf32>, i32 -> vector<32x256xf32>
    %c3 = arith.constant 3 : index
    %c0_31 = arith.constant 0 : index
    %c0_32 = arith.constant 0 : index
    %46 = vector.load %arg8[%c3, %c0_31, %c0_32] : memref<9x32x1xf32, #tpu.memory_space<vmem>>, vector<1x32x1xf32>
    %47 = vector.shape_cast %46 : vector<1x32x1xf32> to vector<32x1xf32>
    %c3_33 = arith.constant 3 : index
    %c0_34 = arith.constant 0 : index
    %c0_35 = arith.constant 0 : index
    %48 = vector.load %arg12[%c3_33, %c0_34, %c0_35] : memref<9x1x256xf32, #tpu.memory_space<vmem>>, vector<1x1x256xf32>
    %49 = vector.shape_cast %48 : vector<1x1x256xf32> to vector<1x256xf32>
    %50 = vector.broadcast %49 : vector<1x256xf32> to vector<32x256xf32>
    %51 = arith.mulf %50, %45 : vector<32x256xf32>
    %52 = vector.broadcast %47 : vector<32x1xf32> to vector<32x256xf32>
    %53 = arith.mulf %52, %51 : vector<32x256xf32>
    %54 = arith.addf %44, %53 : vector<32x256xf32>
    %c4 = arith.constant 4 : index
    %c0_36 = arith.constant 0 : index
    %c0_37 = arith.constant 0 : index
    %55 = vector.load %arg8[%c4, %c0_36, %c0_37] : memref<9x32x1xf32, #tpu.memory_space<vmem>>, vector<1x32x1xf32>
    %56 = vector.shape_cast %55 : vector<1x32x1xf32> to vector<32x1xf32>
    %c4_38 = arith.constant 4 : index
    %c0_39 = arith.constant 0 : index
    %c0_40 = arith.constant 0 : index
    %57 = vector.load %arg12[%c4_38, %c0_39, %c0_40] : memref<9x1x256xf32, #tpu.memory_space<vmem>>, vector<1x1x256xf32>
    %58 = vector.shape_cast %57 : vector<1x1x256xf32> to vector<1x256xf32>
    %59 = vector.broadcast %58 : vector<1x256xf32> to vector<32x256xf32>
    %60 = arith.mulf %59, %8 : vector<32x256xf32>
    %61 = vector.broadcast %56 : vector<32x1xf32> to vector<32x256xf32>
    %62 = arith.mulf %61, %60 : vector<32x256xf32>
    %63 = arith.addf %54, %62 : vector<32x256xf32>
    %c255_i32 = arith.constant 255 : i32
    %64 = tpu.dynamic_rotate %8 by %c255_i32 dim 1 : vector<32x256xf32>, i32 -> vector<32x256xf32>
    %c5 = arith.constant 5 : index
    %c0_41 = arith.constant 0 : index
    %c0_42 = arith.constant 0 : index
    %65 = vector.load %arg8[%c5, %c0_41, %c0_42] : memref<9x32x1xf32, #tpu.memory_space<vmem>>, vector<1x32x1xf32>
    %66 = vector.shape_cast %65 : vector<1x32x1xf32> to vector<32x1xf32>
    %c5_43 = arith.constant 5 : index
    %c0_44 = arith.constant 0 : index
    %c0_45 = arith.constant 0 : index
    %67 = vector.load %arg12[%c5_43, %c0_44, %c0_45] : memref<9x1x256xf32, #tpu.memory_space<vmem>>, vector<1x1x256xf32>
    %68 = vector.shape_cast %67 : vector<1x1x256xf32> to vector<1x256xf32>
    %69 = vector.broadcast %68 : vector<1x256xf32> to vector<32x256xf32>
    %70 = arith.mulf %69, %64 : vector<32x256xf32>
    %71 = vector.broadcast %66 : vector<32x1xf32> to vector<32x256xf32>
    %72 = arith.mulf %71, %70 : vector<32x256xf32>
    %73 = arith.addf %63, %72 : vector<32x256xf32>
    %c241_i32 = arith.constant 241 : i32
    %74 = tpu.dynamic_rotate %8 by %c241_i32 dim 1 : vector<32x256xf32>, i32 -> vector<32x256xf32>
    %c6 = arith.constant 6 : index
    %c0_46 = arith.constant 0 : index
    %c0_47 = arith.constant 0 : index
    %75 = vector.load %arg8[%c6, %c0_46, %c0_47] : memref<9x32x1xf32, #tpu.memory_space<vmem>>, vector<1x32x1xf32>
    %76 = vector.shape_cast %75 : vector<1x32x1xf32> to vector<32x1xf32>
    %c6_48 = arith.constant 6 : index
    %c0_49 = arith.constant 0 : index
    %c0_50 = arith.constant 0 : index
    %77 = vector.load %arg12[%c6_48, %c0_49, %c0_50] : memref<9x1x256xf32, #tpu.memory_space<vmem>>, vector<1x1x256xf32>
    %78 = vector.shape_cast %77 : vector<1x1x256xf32> to vector<1x256xf32>
    %79 = vector.broadcast %78 : vector<1x256xf32> to vector<32x256xf32>
    %80 = arith.mulf %79, %74 : vector<32x256xf32>
    %81 = vector.broadcast %76 : vector<32x1xf32> to vector<32x256xf32>
    %82 = arith.mulf %81, %80 : vector<32x256xf32>
    %83 = arith.addf %73, %82 : vector<32x256xf32>
    %c240_i32 = arith.constant 240 : i32
    %84 = tpu.dynamic_rotate %8 by %c240_i32 dim 1 : vector<32x256xf32>, i32 -> vector<32x256xf32>
    %c7 = arith.constant 7 : index
    %c0_51 = arith.constant 0 : index
    %c0_52 = arith.constant 0 : index
    %85 = vector.load %arg8[%c7, %c0_51, %c0_52] : memref<9x32x1xf32, #tpu.memory_space<vmem>>, vector<1x32x1xf32>
    %86 = vector.shape_cast %85 : vector<1x32x1xf32> to vector<32x1xf32>
    %c7_53 = arith.constant 7 : index
    %c0_54 = arith.constant 0 : index
    %c0_55 = arith.constant 0 : index
    %87 = vector.load %arg12[%c7_53, %c0_54, %c0_55] : memref<9x1x256xf32, #tpu.memory_space<vmem>>, vector<1x1x256xf32>
    %88 = vector.shape_cast %87 : vector<1x1x256xf32> to vector<1x256xf32>
    %89 = vector.broadcast %88 : vector<1x256xf32> to vector<32x256xf32>
    %90 = arith.mulf %89, %84 : vector<32x256xf32>
    %91 = vector.broadcast %86 : vector<32x1xf32> to vector<32x256xf32>
    %92 = arith.mulf %91, %90 : vector<32x256xf32>
    %93 = arith.addf %83, %92 : vector<32x256xf32>
    %c239_i32 = arith.constant 239 : i32
    %94 = tpu.dynamic_rotate %8 by %c239_i32 dim 1 : vector<32x256xf32>, i32 -> vector<32x256xf32>
    %c8 = arith.constant 8 : index
    %c0_56 = arith.constant 0 : index
    %c0_57 = arith.constant 0 : index
    %95 = vector.load %arg8[%c8, %c0_56, %c0_57] : memref<9x32x1xf32, #tpu.memory_space<vmem>>, vector<1x32x1xf32>
    %96 = vector.shape_cast %95 : vector<1x32x1xf32> to vector<32x1xf32>
    %c8_58 = arith.constant 8 : index
    %c0_59 = arith.constant 0 : index
    %c0_60 = arith.constant 0 : index
    %97 = vector.load %arg12[%c8_58, %c0_59, %c0_60] : memref<9x1x256xf32, #tpu.memory_space<vmem>>, vector<1x1x256xf32>
    %98 = vector.shape_cast %97 : vector<1x1x256xf32> to vector<1x256xf32>
    %99 = vector.broadcast %98 : vector<1x256xf32> to vector<32x256xf32>
    %100 = arith.mulf %99, %94 : vector<32x256xf32>
    %101 = vector.broadcast %96 : vector<32x1xf32> to vector<32x256xf32>
    %102 = arith.mulf %101, %100 : vector<32x256xf32>
    %103 = arith.addf %93, %102 : vector<32x256xf32>
    %c0_61 = arith.constant 0 : index
    %c0_62 = arith.constant 0 : index
    %104 = vector.load %arg9[%c0_61, %c0_62] : memref<32x1xf32, #tpu.memory_space<vmem>>, vector<32x1xf32>
    %105 = vector.broadcast %104 : vector<32x1xf32> to vector<32x256xf32>
    %106 = arith.addf %103, %105 : vector<32x256xf32>
    %cst_63 = arith.constant 0.000000e+00 : f32
    %107 = vector.broadcast %cst_63 : f32 to vector<64x256xf32>
    %c17_i32_64 = arith.constant 17 : i32
    %108 = tpu.dynamic_rotate %13 by %c17_i32_64 dim 1 : vector<64x256xf32>, i32 -> vector<64x256xf32>
    %c0_65 = arith.constant 0 : index
    %c0_66 = arith.constant 0 : index
    %c0_67 = arith.constant 0 : index
    %109 = vector.load %arg10[%c0_65, %c0_66, %c0_67] : memref<9x64x1xf32, #tpu.memory_space<vmem>>, vector<1x64x1xf32>
    %110 = vector.shape_cast %109 : vector<1x64x1xf32> to vector<64x1xf32>
    %c0_68 = arith.constant 0 : index
    %c0_69 = arith.constant 0 : index
    %c0_70 = arith.constant 0 : index
    %111 = vector.load %arg12[%c0_68, %c0_69, %c0_70] : memref<9x1x256xf32, #tpu.memory_space<vmem>>, vector<1x1x256xf32>
    %112 = vector.shape_cast %111 : vector<1x1x256xf32> to vector<1x256xf32>
    %113 = vector.broadcast %112 : vector<1x256xf32> to vector<64x256xf32>
    %114 = arith.mulf %113, %108 : vector<64x256xf32>
    %115 = vector.broadcast %110 : vector<64x1xf32> to vector<64x256xf32>
    %116 = arith.mulf %115, %114 : vector<64x256xf32>
    %117 = arith.addf %107, %116 : vector<64x256xf32>
    %c16_i32_71 = arith.constant 16 : i32
    %118 = tpu.dynamic_rotate %13 by %c16_i32_71 dim 1 : vector<64x256xf32>, i32 -> vector<64x256xf32>
    %c1_72 = arith.constant 1 : index
    %c0_73 = arith.constant 0 : index
    %c0_74 = arith.constant 0 : index
    %119 = vector.load %arg10[%c1_72, %c0_73, %c0_74] : memref<9x64x1xf32, #tpu.memory_space<vmem>>, vector<1x64x1xf32>
    %120 = vector.shape_cast %119 : vector<1x64x1xf32> to vector<64x1xf32>
    %c1_75 = arith.constant 1 : index
    %c0_76 = arith.constant 0 : index
    %c0_77 = arith.constant 0 : index
    %121 = vector.load %arg12[%c1_75, %c0_76, %c0_77] : memref<9x1x256xf32, #tpu.memory_space<vmem>>, vector<1x1x256xf32>
    %122 = vector.shape_cast %121 : vector<1x1x256xf32> to vector<1x256xf32>
    %123 = vector.broadcast %122 : vector<1x256xf32> to vector<64x256xf32>
    %124 = arith.mulf %123, %118 : vector<64x256xf32>
    %125 = vector.broadcast %120 : vector<64x1xf32> to vector<64x256xf32>
    %126 = arith.mulf %125, %124 : vector<64x256xf32>
    %127 = arith.addf %117, %126 : vector<64x256xf32>
    %c15_i32_78 = arith.constant 15 : i32
    %128 = tpu.dynamic_rotate %13 by %c15_i32_78 dim 1 : vector<64x256xf32>, i32 -> vector<64x256xf32>
    %c2_79 = arith.constant 2 : index
    %c0_80 = arith.constant 0 : index
    %c0_81 = arith.constant 0 : index
    %129 = vector.load %arg10[%c2_79, %c0_80, %c0_81] : memref<9x64x1xf32, #tpu.memory_space<vmem>>, vector<1x64x1xf32>
    %130 = vector.shape_cast %129 : vector<1x64x1xf32> to vector<64x1xf32>
    %c2_82 = arith.constant 2 : index
    %c0_83 = arith.constant 0 : index
    %c0_84 = arith.constant 0 : index
    %131 = vector.load %arg12[%c2_82, %c0_83, %c0_84] : memref<9x1x256xf32, #tpu.memory_space<vmem>>, vector<1x1x256xf32>
    %132 = vector.shape_cast %131 : vector<1x1x256xf32> to vector<1x256xf32>
    %133 = vector.broadcast %132 : vector<1x256xf32> to vector<64x256xf32>
    %134 = arith.mulf %133, %128 : vector<64x256xf32>
    %135 = vector.broadcast %130 : vector<64x1xf32> to vector<64x256xf32>
    %136 = arith.mulf %135, %134 : vector<64x256xf32>
    %137 = arith.addf %127, %136 : vector<64x256xf32>
    %c1_i32_85 = arith.constant 1 : i32
    %138 = tpu.dynamic_rotate %13 by %c1_i32_85 dim 1 : vector<64x256xf32>, i32 -> vector<64x256xf32>
    %c3_86 = arith.constant 3 : index
    %c0_87 = arith.constant 0 : index
    %c0_88 = arith.constant 0 : index
    %139 = vector.load %arg10[%c3_86, %c0_87, %c0_88] : memref<9x64x1xf32, #tpu.memory_space<vmem>>, vector<1x64x1xf32>
    %140 = vector.shape_cast %139 : vector<1x64x1xf32> to vector<64x1xf32>
    %c3_89 = arith.constant 3 : index
    %c0_90 = arith.constant 0 : index
    %c0_91 = arith.constant 0 : index
    %141 = vector.load %arg12[%c3_89, %c0_90, %c0_91] : memref<9x1x256xf32, #tpu.memory_space<vmem>>, vector<1x1x256xf32>
    %142 = vector.shape_cast %141 : vector<1x1x256xf32> to vector<1x256xf32>
    %143 = vector.broadcast %142 : vector<1x256xf32> to vector<64x256xf32>
    %144 = arith.mulf %143, %138 : vector<64x256xf32>
    %145 = vector.broadcast %140 : vector<64x1xf32> to vector<64x256xf32>
    %146 = arith.mulf %145, %144 : vector<64x256xf32>
    %147 = arith.addf %137, %146 : vector<64x256xf32>
    %c4_92 = arith.constant 4 : index
    %c0_93 = arith.constant 0 : index
    %c0_94 = arith.constant 0 : index
    %148 = vector.load %arg10[%c4_92, %c0_93, %c0_94] : memref<9x64x1xf32, #tpu.memory_space<vmem>>, vector<1x64x1xf32>
    %149 = vector.shape_cast %148 : vector<1x64x1xf32> to vector<64x1xf32>
    %c4_95 = arith.constant 4 : index
    %c0_96 = arith.constant 0 : index
    %c0_97 = arith.constant 0 : index
    %150 = vector.load %arg12[%c4_95, %c0_96, %c0_97] : memref<9x1x256xf32, #tpu.memory_space<vmem>>, vector<1x1x256xf32>
    %151 = vector.shape_cast %150 : vector<1x1x256xf32> to vector<1x256xf32>
    %152 = vector.broadcast %151 : vector<1x256xf32> to vector<64x256xf32>
    %153 = arith.mulf %152, %13 : vector<64x256xf32>
    %154 = vector.broadcast %149 : vector<64x1xf32> to vector<64x256xf32>
    %155 = arith.mulf %154, %153 : vector<64x256xf32>
    %156 = arith.addf %147, %155 : vector<64x256xf32>
    %c255_i32_98 = arith.constant 255 : i32
    %157 = tpu.dynamic_rotate %13 by %c255_i32_98 dim 1 : vector<64x256xf32>, i32 -> vector<64x256xf32>
    %c5_99 = arith.constant 5 : index
    %c0_100 = arith.constant 0 : index
    %c0_101 = arith.constant 0 : index
    %158 = vector.load %arg10[%c5_99, %c0_100, %c0_101] : memref<9x64x1xf32, #tpu.memory_space<vmem>>, vector<1x64x1xf32>
    %159 = vector.shape_cast %158 : vector<1x64x1xf32> to vector<64x1xf32>
    %c5_102 = arith.constant 5 : index
    %c0_103 = arith.constant 0 : index
    %c0_104 = arith.constant 0 : index
    %160 = vector.load %arg12[%c5_102, %c0_103, %c0_104] : memref<9x1x256xf32, #tpu.memory_space<vmem>>, vector<1x1x256xf32>
    %161 = vector.shape_cast %160 : vector<1x1x256xf32> to vector<1x256xf32>
    %162 = vector.broadcast %161 : vector<1x256xf32> to vector<64x256xf32>
    %163 = arith.mulf %162, %157 : vector<64x256xf32>
    %164 = vector.broadcast %159 : vector<64x1xf32> to vector<64x256xf32>
    %165 = arith.mulf %164, %163 : vector<64x256xf32>
    %166 = arith.addf %156, %165 : vector<64x256xf32>
    %c241_i32_105 = arith.constant 241 : i32
    %167 = tpu.dynamic_rotate %13 by %c241_i32_105 dim 1 : vector<64x256xf32>, i32 -> vector<64x256xf32>
    %c6_106 = arith.constant 6 : index
    %c0_107 = arith.constant 0 : index
    %c0_108 = arith.constant 0 : index
    %168 = vector.load %arg10[%c6_106, %c0_107, %c0_108] : memref<9x64x1xf32, #tpu.memory_space<vmem>>, vector<1x64x1xf32>
    %169 = vector.shape_cast %168 : vector<1x64x1xf32> to vector<64x1xf32>
    %c6_109 = arith.constant 6 : index
    %c0_110 = arith.constant 0 : index
    %c0_111 = arith.constant 0 : index
    %170 = vector.load %arg12[%c6_109, %c0_110, %c0_111] : memref<9x1x256xf32, #tpu.memory_space<vmem>>, vector<1x1x256xf32>
    %171 = vector.shape_cast %170 : vector<1x1x256xf32> to vector<1x256xf32>
    %172 = vector.broadcast %171 : vector<1x256xf32> to vector<64x256xf32>
    %173 = arith.mulf %172, %167 : vector<64x256xf32>
    %174 = vector.broadcast %169 : vector<64x1xf32> to vector<64x256xf32>
    %175 = arith.mulf %174, %173 : vector<64x256xf32>
    %176 = arith.addf %166, %175 : vector<64x256xf32>
    %c240_i32_112 = arith.constant 240 : i32
    %177 = tpu.dynamic_rotate %13 by %c240_i32_112 dim 1 : vector<64x256xf32>, i32 -> vector<64x256xf32>
    %c7_113 = arith.constant 7 : index
    %c0_114 = arith.constant 0 : index
    %c0_115 = arith.constant 0 : index
    %178 = vector.load %arg10[%c7_113, %c0_114, %c0_115] : memref<9x64x1xf32, #tpu.memory_space<vmem>>, vector<1x64x1xf32>
    %179 = vector.shape_cast %178 : vector<1x64x1xf32> to vector<64x1xf32>
    %c7_116 = arith.constant 7 : index
    %c0_117 = arith.constant 0 : index
    %c0_118 = arith.constant 0 : index
    %180 = vector.load %arg12[%c7_116, %c0_117, %c0_118] : memref<9x1x256xf32, #tpu.memory_space<vmem>>, vector<1x1x256xf32>
    %181 = vector.shape_cast %180 : vector<1x1x256xf32> to vector<1x256xf32>
    %182 = vector.broadcast %181 : vector<1x256xf32> to vector<64x256xf32>
    %183 = arith.mulf %182, %177 : vector<64x256xf32>
    %184 = vector.broadcast %179 : vector<64x1xf32> to vector<64x256xf32>
    %185 = arith.mulf %184, %183 : vector<64x256xf32>
    %186 = arith.addf %176, %185 : vector<64x256xf32>
    %c239_i32_119 = arith.constant 239 : i32
    %187 = tpu.dynamic_rotate %13 by %c239_i32_119 dim 1 : vector<64x256xf32>, i32 -> vector<64x256xf32>
    %c8_120 = arith.constant 8 : index
    %c0_121 = arith.constant 0 : index
    %c0_122 = arith.constant 0 : index
    %188 = vector.load %arg10[%c8_120, %c0_121, %c0_122] : memref<9x64x1xf32, #tpu.memory_space<vmem>>, vector<1x64x1xf32>
    %189 = vector.shape_cast %188 : vector<1x64x1xf32> to vector<64x1xf32>
    %c8_123 = arith.constant 8 : index
    %c0_124 = arith.constant 0 : index
    %c0_125 = arith.constant 0 : index
    %190 = vector.load %arg12[%c8_123, %c0_124, %c0_125] : memref<9x1x256xf32, #tpu.memory_space<vmem>>, vector<1x1x256xf32>
    %191 = vector.shape_cast %190 : vector<1x1x256xf32> to vector<1x256xf32>
    %192 = vector.broadcast %191 : vector<1x256xf32> to vector<64x256xf32>
    %193 = arith.mulf %192, %187 : vector<64x256xf32>
    %194 = vector.broadcast %189 : vector<64x1xf32> to vector<64x256xf32>
    %195 = arith.mulf %194, %193 : vector<64x256xf32>
    %196 = arith.addf %186, %195 : vector<64x256xf32>
    %c0_126 = arith.constant 0 : index
    %c0_127 = arith.constant 0 : index
    %197 = vector.load %arg11[%c0_126, %c0_127] : memref<64x1xf32, #tpu.memory_space<vmem>>, vector<64x1xf32>
    %198 = vector.broadcast %197 : vector<64x1xf32> to vector<64x256xf32>
    %199 = arith.addf %196, %198 : vector<64x256xf32>
    %200 = vector.extract_strided_slice %199 {offsets = [0, 0], sizes = [32, 256], strides = [1, 1]} : vector<64x256xf32> to vector<32x256xf32>
    %201 = vector.extract_strided_slice %199 {offsets = [32, 0], sizes = [32, 256], strides = [1, 1]} : vector<64x256xf32> to vector<32x256xf32>
    %202 = arith.mulf %106, %106 : vector<32x256xf32>
    %cst_128 = arith.constant dense<0.000000e+00> : vector<32xf32>
    %203 = vector.multi_reduction <add>, %202, %cst_128 [1] : vector<32x256xf32> to vector<32xf32>
    %204 = vector.shape_cast %203 : vector<32xf32> to vector<32x1xf32>
    %cst_129 = arith.constant 1.000000e-24 : f32
    %205 = vector.broadcast %cst_129 : f32 to vector<32x1xf32>
    %206 = arith.maximumf %204, %205 : vector<32x1xf32>
    %207 = math.rsqrt %206 : vector<32x1xf32>
    %208 = vector.broadcast %207 : vector<32x1xf32> to vector<32x256xf32>
    %209 = arith.mulf %106, %208 : vector<32x256xf32>
    %210 = arith.mulf %200, %200 : vector<32x256xf32>
    %cst_130 = arith.constant dense<0.000000e+00> : vector<32xf32>
    %211 = vector.multi_reduction <add>, %210, %cst_130 [1] : vector<32x256xf32> to vector<32xf32>
    %212 = vector.shape_cast %211 : vector<32xf32> to vector<32x1xf32>
    %cst_131 = arith.constant 1.000000e-24 : f32
    %213 = vector.broadcast %cst_131 : f32 to vector<32x1xf32>
    %214 = arith.maximumf %212, %213 : vector<32x1xf32>
    %215 = math.rsqrt %214 : vector<32x1xf32>
    %216 = vector.broadcast %215 : vector<32x1xf32> to vector<32x256xf32>
    %217 = arith.mulf %200, %216 : vector<32x256xf32>
    %cst_132 = arith.constant dense<0.000000e+00> : vector<32x32xf32>
    %218 = tpu.matmul %209, %217, %cst_132 {dimension_numbers = #tpu.dot_dimension_numbers<[1], [1], [0], [0], [0, 0, 1, 0], [], []>} : vector<32x256xf32>, vector<32x256xf32>, vector<32x32xf32> -> vector<32x32xf32>
    %219 = tpu.iota {dimensions = array<i32: 0>} : vector<32x32xi32>
    %220 = tpu.iota {dimensions = array<i32: 1>} : vector<32x32xi32>
    %221 = tpu.iota {dimensions = array<i32: 0>} : vector<32x1xi32>
    %cst_133 = arith.constant 0.000000e+00 : f32
    %222 = vector.broadcast %cst_133 : f32 to vector<32x1xf32>
    %c0_i32 = arith.constant 0 : i32
    %223 = vector.broadcast %c0_i32 : i32 to vector<32x32xi32>
    %224 = arith.cmpi sge, %219, %223 : vector<32x32xi32>
    %c8_i32 = arith.constant 8 : i32
    %225 = vector.broadcast %c8_i32 : i32 to vector<32x32xi32>
    %226 = arith.cmpi slt, %219, %225 : vector<32x32xi32>
    %227 = arith.andi %224, %226 : vector<32x32xi1>
    %c0_i32_134 = arith.constant 0 : i32
    %228 = vector.broadcast %c0_i32_134 : i32 to vector<32x32xi32>
    %229 = arith.cmpi sge, %220, %228 : vector<32x32xi32>
    %c8_i32_135 = arith.constant 8 : i32
    %230 = vector.broadcast %c8_i32_135 : i32 to vector<32x32xi32>
    %231 = arith.cmpi slt, %220, %230 : vector<32x32xi32>
    %232 = arith.andi %229, %231 : vector<32x32xi1>
    %233 = arith.andi %227, %232 : vector<32x32xi1>
    %c0_136 = arith.constant 0 : index
    %234 = memref.load %arg1[%c0_136] : memref<4xf32, #tpu.memory_space<smem>>
    %c0_i32_137 = arith.constant 0 : i32
    %235 = vector.broadcast %c0_i32_137 : i32 to vector<32x1xi32>
    %236 = arith.cmpi sge, %221, %235 : vector<32x1xi32>
    %c8_i32_138 = arith.constant 8 : i32
    %237 = vector.broadcast %c8_i32_138 : i32 to vector<32x1xi32>
    %238 = arith.cmpi slt, %221, %237 : vector<32x1xi32>
    %239 = arith.andi %236, %238 : vector<32x1xi1>
    %240 = arith.extui %239 : vector<32x1xi1> to vector<32x1xi32>
    %241 = arith.sitofp %240 : vector<32x1xi32> to vector<32x1xf32>
    %242 = vector.broadcast %234 : f32 to vector<32x1xf32>
    %243 = arith.mulf %242, %241 : vector<32x1xf32>
    %244 = arith.addf %222, %243 : vector<32x1xf32>
    %c8_i32_139 = arith.constant 8 : i32
    %245 = vector.broadcast %c8_i32_139 : i32 to vector<32x32xi32>
    %246 = arith.cmpi sge, %219, %245 : vector<32x32xi32>
    %c16_i32_140 = arith.constant 16 : i32
    %247 = vector.broadcast %c16_i32_140 : i32 to vector<32x32xi32>
    %248 = arith.cmpi slt, %219, %247 : vector<32x32xi32>
    %249 = arith.andi %246, %248 : vector<32x32xi1>
    %c8_i32_141 = arith.constant 8 : i32
    %250 = vector.broadcast %c8_i32_141 : i32 to vector<32x32xi32>
    %251 = arith.cmpi sge, %220, %250 : vector<32x32xi32>
    %c16_i32_142 = arith.constant 16 : i32
    %252 = vector.broadcast %c16_i32_142 : i32 to vector<32x32xi32>
    %253 = arith.cmpi slt, %220, %252 : vector<32x32xi32>
    %254 = arith.andi %251, %253 : vector<32x32xi1>
    %255 = arith.andi %249, %254 : vector<32x32xi1>
    %256 = arith.ori %233, %255 : vector<32x32xi1>
    %c1_143 = arith.constant 1 : index
    %257 = memref.load %arg1[%c1_143] : memref<4xf32, #tpu.memory_space<smem>>
    %c8_i32_144 = arith.constant 8 : i32
    %258 = vector.broadcast %c8_i32_144 : i32 to vector<32x1xi32>
    %259 = arith.cmpi sge, %221, %258 : vector<32x1xi32>
    %c16_i32_145 = arith.constant 16 : i32
    %260 = vector.broadcast %c16_i32_145 : i32 to vector<32x1xi32>
    %261 = arith.cmpi slt, %221, %260 : vector<32x1xi32>
    %262 = arith.andi %259, %261 : vector<32x1xi1>
    %263 = arith.extui %262 : vector<32x1xi1> to vector<32x1xi32>
    %264 = arith.sitofp %263 : vector<32x1xi32> to vector<32x1xf32>
    %265 = vector.broadcast %257 : f32 to vector<32x1xf32>
    %266 = arith.mulf %265, %264 : vector<32x1xf32>
    %267 = arith.addf %244, %266 : vector<32x1xf32>
    %c16_i32_146 = arith.constant 16 : i32
    %268 = vector.broadcast %c16_i32_146 : i32 to vector<32x32xi32>
    %269 = arith.cmpi sge, %219, %268 : vector<32x32xi32>
    %c24_i32 = arith.constant 24 : i32
    %270 = vector.broadcast %c24_i32 : i32 to vector<32x32xi32>
    %271 = arith.cmpi slt, %219, %270 : vector<32x32xi32>
    %272 = arith.andi %269, %271 : vector<32x32xi1>
    %c16_i32_147 = arith.constant 16 : i32
    %273 = vector.broadcast %c16_i32_147 : i32 to vector<32x32xi32>
    %274 = arith.cmpi sge, %220, %273 : vector<32x32xi32>
    %c24_i32_148 = arith.constant 24 : i32
    %275 = vector.broadcast %c24_i32_148 : i32 to vector<32x32xi32>
    %276 = arith.cmpi slt, %220, %275 : vector<32x32xi32>
    %277 = arith.andi %274, %276 : vector<32x32xi1>
    %278 = arith.andi %272, %277 : vector<32x32xi1>
    %279 = arith.ori %256, %278 : vector<32x32xi1>
    %c2_149 = arith.constant 2 : index
    %280 = memref.load %arg1[%c2_149] : memref<4xf32, #tpu.memory_space<smem>>
    %c16_i32_150 = arith.constant 16 : i32
    %281 = vector.broadcast %c16_i32_150 : i32 to vector<32x1xi32>
    %282 = arith.cmpi sge, %221, %281 : vector<32x1xi32>
    %c24_i32_151 = arith.constant 24 : i32
    %283 = vector.broadcast %c24_i32_151 : i32 to vector<32x1xi32>
    %284 = arith.cmpi slt, %221, %283 : vector<32x1xi32>
    %285 = arith.andi %282, %284 : vector<32x1xi1>
    %286 = arith.extui %285 : vector<32x1xi1> to vector<32x1xi32>
    %287 = arith.sitofp %286 : vector<32x1xi32> to vector<32x1xf32>
    %288 = vector.broadcast %280 : f32 to vector<32x1xf32>
    %289 = arith.mulf %288, %287 : vector<32x1xf32>
    %290 = arith.addf %267, %289 : vector<32x1xf32>
    %c24_i32_152 = arith.constant 24 : i32
    %291 = vector.broadcast %c24_i32_152 : i32 to vector<32x32xi32>
    %292 = arith.cmpi sge, %219, %291 : vector<32x32xi32>
    %c32_i32 = arith.constant 32 : i32
    %293 = vector.broadcast %c32_i32 : i32 to vector<32x32xi32>
    %294 = arith.cmpi slt, %219, %293 : vector<32x32xi32>
    %295 = arith.andi %292, %294 : vector<32x32xi1>
    %c24_i32_153 = arith.constant 24 : i32
    %296 = vector.broadcast %c24_i32_153 : i32 to vector<32x32xi32>
    %297 = arith.cmpi sge, %220, %296 : vector<32x32xi32>
    %c32_i32_154 = arith.constant 32 : i32
    %298 = vector.broadcast %c32_i32_154 : i32 to vector<32x32xi32>
    %299 = arith.cmpi slt, %220, %298 : vector<32x32xi32>
    %300 = arith.andi %297, %299 : vector<32x32xi1>
    %301 = arith.andi %295, %300 : vector<32x32xi1>
    %302 = arith.ori %279, %301 : vector<32x32xi1>
    %c3_155 = arith.constant 3 : index
    %303 = memref.load %arg1[%c3_155] : memref<4xf32, #tpu.memory_space<smem>>
    %c24_i32_156 = arith.constant 24 : i32
    %304 = vector.broadcast %c24_i32_156 : i32 to vector<32x1xi32>
    %305 = arith.cmpi sge, %221, %304 : vector<32x1xi32>
    %c32_i32_157 = arith.constant 32 : i32
    %306 = vector.broadcast %c32_i32_157 : i32 to vector<32x1xi32>
    %307 = arith.cmpi slt, %221, %306 : vector<32x1xi32>
    %308 = arith.andi %305, %307 : vector<32x1xi1>
    %309 = arith.extui %308 : vector<32x1xi1> to vector<32x1xi32>
    %310 = arith.sitofp %309 : vector<32x1xi32> to vector<32x1xf32>
    %311 = vector.broadcast %303 : f32 to vector<32x1xf32>
    %312 = arith.mulf %311, %310 : vector<32x1xf32>
    %313 = arith.addf %290, %312 : vector<32x1xf32>
    %314 = vector.broadcast %313 : vector<32x1xf32> to vector<32x32xf32>
    %315 = arith.mulf %218, %314 : vector<32x32xf32>
    %cst_158 = arith.constant -1.000000e+30 : f32
    %316 = vector.broadcast %cst_158 : f32 to vector<32x32xf32>
    %317 = arith.select %302, %315, %316 : vector<32x32xi1>, vector<32x32xf32>
    %cst_159 = arith.constant dense<0xFF800000> : vector<32xf32>
    %318 = vector.multi_reduction <maximumf>, %317, %cst_159 [1] : vector<32x32xf32> to vector<32xf32>
    %319 = vector.shape_cast %318 : vector<32xf32> to vector<32x1xf32>
    %320 = vector.broadcast %319 : vector<32x1xf32> to vector<32x32xf32>
    %321 = arith.subf %317, %320 : vector<32x32xf32>
    %322 = math.exp %321 : vector<32x32xf32>
    %cst_160 = arith.constant dense<0.000000e+00> : vector<32xf32>
    %323 = vector.multi_reduction <add>, %322, %cst_160 [1] : vector<32x32xf32> to vector<32xf32>
    %324 = vector.shape_cast %323 : vector<32xf32> to vector<32x1xf32>
    %325 = tpu.reciprocal %324 {approx = true} : vector<32x1xf32> -> vector<32x1xf32>
    %326 = vector.broadcast %325 : vector<32x1xf32> to vector<32x32xf32>
    %327 = arith.mulf %322, %326 : vector<32x32xf32>
    %cst_161 = arith.constant dense<0.000000e+00> : vector<32x256xf32>
    %328 = tpu.matmul %327, %201, %cst_161 {dimension_numbers = #tpu.dot_dimension_numbers<[1], [0], [0], [1], [0, 0, 1, 1], [], []>} : vector<32x32xf32>, vector<32x256xf32>, vector<32x256xf32> -> vector<32x256xf32>
    %c0_162 = arith.constant 0 : index
    %c0_163 = arith.constant 0 : index
    %329 = vector.load %arg13[%c0_162, %c0_163] : memref<32x32xf32, #tpu.memory_space<vmem>>, vector<32x32xf32>
    %cst_164 = arith.constant dense<0.000000e+00> : vector<32x256xf32>
    %330 = tpu.matmul %329, %328, %cst_164 {dimension_numbers = #tpu.dot_dimension_numbers<[1], [0], [0], [1], [0, 0, 1, 1], [], []>} : vector<32x32xf32>, vector<32x256xf32>, vector<32x256xf32> -> vector<32x256xf32>
    %c0_165 = arith.constant 0 : index
    %c0_166 = arith.constant 0 : index
    %331 = vector.load %arg14[%c0_165, %c0_166] : memref<32x1xf32, #tpu.memory_space<vmem>>, vector<32x1xf32>
    %332 = vector.broadcast %331 : vector<32x1xf32> to vector<32x256xf32>
    %333 = arith.addf %330, %332 : vector<32x256xf32>
    %c0_167 = arith.constant 0 : index
    %c0_168 = arith.constant 0 : index
    %c0_169 = arith.constant 0 : index
    %334 = vector.load %arg15[%c0_167, %c0_168, %c0_169] : memref<1x32x256xf32, #tpu.memory_space<vmem>>, vector<1x32x256xf32>
    %335 = vector.shape_cast %334 : vector<1x32x256xf32> to vector<32x256xf32>
    %336 = vector.shape_cast %333 : vector<32x256xf32> to vector<1x32x256xf32>
    tpu.vector_store %arg15[%c0_167, %c0_168, %c0_169], %336 {strides = array<i32>} : memref<1x32x256xf32, #tpu.memory_space<vmem>>, vector<1x32x256xf32>,
    return
  }
  func.func @transform_0(%arg0: i32) -> i32 {
    %c0_i32 = arith.constant 0 : i32
    %c0_i32_0 = arith.constant 0 : i32
    return %c0_i32 : i32
  }
  func.func @transform_1(%arg0: i32) -> (i32, i32, i32) {
    %c0_i32 = arith.constant 0 : i32
    %c0_i32_0 = arith.constant 0 : i32
    %c0_i32_1 = arith.constant 0 : i32
    return %arg0, %c0_i32, %c0_i32_0 : i32, i32, i32
  }
  func.func @transform_2(%arg0: i32) -> (i32, i32, i32) {
    %c0_i32 = arith.constant 0 : i32
    %c0_i32_0 = arith.constant 0 : i32
    %c0_i32_1 = arith.constant 0 : i32
    return %arg0, %c0_i32, %c0_i32_0 : i32, i32, i32
  }
  func.func @transform_3(%arg0: i32) -> (i32, i32) {
    %c0_i32 = arith.constant 0 : i32
    %c0_i32_0 = arith.constant 0 : i32
    %c0_i32_1 = arith.constant 0 : i32
    return %c0_i32, %c0_i32_0 : i32, i32
  }
  func.func @transform_4(%arg0: i32) -> (i32, i32) {
    %c0_i32 = arith.constant 0 : i32
    %c0_i32_0 = arith.constant 0 : i32
    %c0_i32_1 = arith.constant 0 : i32
    return %c0_i32, %c0_i32_0 : i32, i32
  }
  func.func @transform_5(%arg0: i32) -> (i32, i32) {
    %c0_i32 = arith.constant 0 : i32
    %c0_i32_0 = arith.constant 0 : i32
    %c0_i32_1 = arith.constant 0 : i32
    return %c0_i32, %c0_i32_0 : i32, i32
  }
  func.func @transform_6(%arg0: i32) -> (i32, i32) {
    %c0_i32 = arith.constant 0 : i32
    %c0_i32_0 = arith.constant 0 : i32
    %c0_i32_1 = arith.constant 0 : i32
    return %c0_i32, %c0_i32_0 : i32, i32
  }
  func.func @transform_7(%arg0: i32) -> (i32, i32, i32) {
    %c0_i32 = arith.constant 0 : i32
    %c0_i32_0 = arith.constant 0 : i32
    %c0_i32_1 = arith.constant 0 : i32
    %c0_i32_2 = arith.constant 0 : i32
    return %c0_i32, %c0_i32_0, %c0_i32_1 : i32, i32, i32
  }
  func.func @transform_8(%arg0: i32) -> (i32, i32) {
    %c0_i32 = arith.constant 0 : i32
    %c0_i32_0 = arith.constant 0 : i32
    %c0_i32_1 = arith.constant 0 : i32
    return %c0_i32, %c0_i32_0 : i32, i32
  }
  func.func @transform_9(%arg0: i32) -> (i32, i32, i32) {
    %c0_i32 = arith.constant 0 : i32
    %c0_i32_0 = arith.constant 0 : i32
    %c0_i32_1 = arith.constant 0 : i32
    %c0_i32_2 = arith.constant 0 : i32
    return %c0_i32, %c0_i32_0, %c0_i32_1 : i32, i32, i32
  }
  func.func @transform_10(%arg0: i32) -> (i32, i32) {
    %c0_i32 = arith.constant 0 : i32
    %c0_i32_0 = arith.constant 0 : i32
    %c0_i32_1 = arith.constant 0 : i32
    return %c0_i32, %c0_i32_0 : i32, i32
  }
  func.func @transform_11(%arg0: i32) -> (i32, i32, i32) {
    %c0_i32 = arith.constant 0 : i32
    %c0_i32_0 = arith.constant 0 : i32
    %c0_i32_1 = arith.constant 0 : i32
    %c0_i32_2 = arith.constant 0 : i32
    return %c0_i32, %c0_i32_0, %c0_i32_1 : i32, i32, i32
  }
  func.func @transform_12(%arg0: i32) -> (i32, i32) {
    %c0_i32 = arith.constant 0 : i32
    %c0_i32_0 = arith.constant 0 : i32
    %c0_i32_1 = arith.constant 0 : i32
    return %c0_i32, %c0_i32_0 : i32, i32
  }
  func.func @transform_13(%arg0: i32) -> (i32, i32) {
    %c0_i32 = arith.constant 0 : i32
    %c0_i32_0 = arith.constant 0 : i32
    %c0_i32_1 = arith.constant 0 : i32
    return %c0_i32, %c0_i32_0 : i32, i32
  }
  func.func @transform_14(%arg0: i32) -> (i32, i32, i32) {
    %c0_i32 = arith.constant 0 : i32
    %c0_i32_0 = arith.constant 0 : i32
    %c0_i32_1 = arith.constant 0 : i32
    return %arg0, %c0_i32, %c0_i32_0 : i32, i32, i32
  }
}

</mosaic_0001>

<bundles_post_ra>
// kernel: cross_attention.1
= control target key start
LH: loop header
LB: loop body
LE: loop exit
PB: predicated region body
PF: predicated region fallthrough
CT: control target
= control target key end

     0   :  { %19 = vsyncpa [#allocation3], 0  ;;  %s4002_s29 = smov 0   ;;  %s6942_s0 = inlined_call_operand.vmem [shape: f32[4], index: 0, kind: input, shape index: {}]   ;;  %s6943_s1 = inlined_call_operand.vmem [shape: f32[2,32,256], index: 1, kind: input, shape index: {}]   ;;  %s6944_s2 = inlined_call_operand.vmem [shape: f32[2,32,256], index: 2, kind: input, shape index: {}]   ;;  %s6945_s3 = inlined_call_operand.vmem [shape: f32[32,32], index: 3, kind: input, shape index: {}]   ;;  %s6946_s4 = inlined_call_operand.vmem [shape: f32[32,1], index: 4, kind: input, shape index: {}]   ;;  %s6947_s5 = inlined_call_operand.vmem [shape: f32[64,32], index: 5, kind: input, shape index: {}]   ;;  %s6948_s6 = inlined_call_operand.vmem [shape: f32[64,1], index: 6, kind: input, shape index: {}]   ;;  %s6949_s7 = inlined_call_operand.vmem [shape: f32[9,32,1], index: 7, kind: input, shape index: {}]   ;;  %s6950_s8 = inlined_call_operand.vmem [shape: f32[32,1], index: 8, kind: input, shape index: {}]   ;;  %s6951_s9 = inlined_call_operand.vmem [shape: f32[9,64,1], index: 9, kind: input, shape index: {}]   ;;  %s6952_s10 = inlined_call_operand.vmem [shape: f32[64,1], index: 10, kind: input, shape index: {}]   ;;  %s6953_s11 = inlined_call_operand.vmem [shape: f32[9,1,256], index: 11, kind: input, shape index: {}]   ;;  %s6954_s12 = inlined_call_operand.vmem [shape: f32[32,32], index: 12, kind: input, shape index: {}]   ;;  %s6955_s13 = inlined_call_operand.vmem [shape: f32[32,1], index: 13, kind: input, shape index: {}]   ;;  %s6956_s14 = inlined_call_operand.vmem [shape: f32[2,32,256], index: 14, kind: output, shape index: {}]  }
   0x1 LB: > { %s4008_s30 = sadd.s32 4294967295, %s3914_s29   ;;  %p3643_p0 = scmp.ge.s32.totalorder %s3914_s29, 1  ;;  %s3914_s29 = sphi %s4002_s29, %s25_s29  }
   0x2   : > { %p360_p1 = scmp.lt.s32.totalorder %s3914_s29, 3  ;;  %s373_s17 = sshll.u32 %s6942_s0, 4  ;;  %s374_s17 = int_to_ptr.vmem [resolvable:$true] %s373_s17 }
   0x3   : > { %p3834_p3 = scmp.eq.s32.totalorder %s4008_s30, 0  ;;  %s3889_s19 = scalar_lea.vmem %s374_s17, 16 }
   0x4   : > { %p4015_p2 = pnand %p3643_p0, %p360_p1  ;;  %p3890_p6 = scmp.ne.s32.totalorder %s374_s17, %s3889_s19 }
   0x5   : > { %p3897_p10 = scmp.lt.s32.totalorder %s374_s17, %s374_s17  ;;  %p3898_p11 = scmp.lt.s32.totalorder %s3889_s19, %s3889_s19 }
   0x6   : > { %p3830_p4 = pneg %p4015_p2 }
   0x7   : > { %p3899_p12 = por %p3898_p11, %p3897_p10 }
   0x8   : > { %p3831_p5 = pnand %p3834_p3, %p3830_p4 }
   0xa   : > { %p3891_p7 = pneg %p3831_p5 }
   0xc   : > { %p3892_p8 = pnand %p3891_p7, %p3890_p6 }
   0xe   : > { %p3893_p9 = pneg %p3892_p8 }
  0x10   : > { %p3900_p13 = pnand %p3899_p12, %p3893_p9 }
  0x12   : > { %3903 = shalt.err (!%p3900_p13)
}
  0x13   : > { %s3916_s20 = smov [#allocation2]   ;;  %435 = sbr.rel (%p4015_p2) target bundleno = 1898 (0x76a), region = 76 }
  0x14   : > { %3833 = dma.vmem_to_smem (!%p3831_p5), %s374_s17, 16, %s3916_s20, [#allocation3]  }
  0x1a   : > { %3909 = dma.done.wait (%p3834_p3), [#allocation3], 16  }
  0x1b   : > { %3911 = vsyncadd (%p3834_p3), [#allocation3], 4294967280 }
  0x1c   : > { %441 = sfence }
  0x1d   : > { %v658_v0 = vld [vmem:[%s6948_s6 + $0x10] sm:$0xff]  ;;  %v656_v1 = vld [vmem:[%s6948_s6] sm:$0xff]  ;;  %p487_p0 = scmp.lt.s32.totalorder %s4008_s30, 1  ;;  %v3917_v2 = vmov 0   ;;  %v659_v3 = vld [vmem:[%s6948_s6 + $0x18] sm:$0xff]  ;;  %v6957_v5 = vmov 0.0  }
  0x1e   : > { %3856 = vset.pattern.permute.xlu1 %v3917_v2  ;;  %3855 = vset.pattern.permute.xlu0 %v3917_v2  ;;  %v657_v4 = vld [vmem:[%s6948_s6 + $0x8] sm:$0xff]  ;;  %v522_v10 = vld [vmem:[%s6946_s4] sm:$0xff]  ;;  %v525_v29 = vld [vmem:[%s6946_s4 + $0x18] sm:$0xff]  ;;  %vm546_vm0 = vcmask 261120   ;;  %s3919_s27 = smov 17   ;;  %s3920_s28 = smov 16  }
  0x1f   : > { %676 = vperm.xlu1 %3856, %v658_v0   ;;  %666 = vperm.xlu0 %3855, %v656_v1   ;;  %s7439_s30 = smov (!%p487_p0, %s4008_s30), 1  ;;  %v523_v6 = vld [vmem:[%s6946_s4 + $0x8] sm:$0xff]  ;;  %v524_v32 = vld [vmem:[%s6946_s4 + $0x10] sm:$0xff]  ;;  %v518_v34 = vld [vmem:[%s6945_s3] sm:$0xff]  ;;  %s3921_s16 = smov 15  }
  0x20   : > { %623 = vmatprep.mubr.f32.mxu0 %v6957_v5  ;;  %792 = vmatprep.mubr.f32.mxu1 %v6957_v5  ;;  %s4046_s15 = sshll.u32 %s7439_s30, 6  ;;  %v1680_v35 = vld [vmem:[%s6951_s9 + $0x8] sm:$0xff]  ;;  %v648_v36 = vld [vmem:[%s6947_s5] sm:$0xff]  ;;  %v520_v42 = vld [vmem:[%s6945_s3 + $0x10] sm:$0xff]  ;;  %s7108_s17 = smov 1  }
  0x21   : > { %s491_s18 = scalar_lea.vmem %s6943_s1, %s4046_s15  ;;  %s4056_s21 = scalar_lea.vmem %s6944_s2, %s4046_s15  ;;  %v1679_v37 = vld [vmem:[%s6951_s9] sm:$0xff]  ;;  %v519_v38 = vld [vmem:[%s6945_s3 + $0x8] sm:$0xff]  ;;  %v650_v44 = vld [vmem:[%s6947_s5 + $0x10] sm:$0xff] }
  0x22   : > { %v503_v7 = vld [vmem:[%s491_s18 + $0x8] sm:$0xff]  ;;  %v505_v8 = vld [vmem:[%s491_s18 + $0x18] sm:$0xff]  ;;  %v502_v13 = vld [vmem:[%s491_s18] sm:$0xff]  ;;  %s7106_s19 = smov 113   ;;  %s7102_s20 = smov 112  }
  0x23   : > { %681 = vperm.xlu1 %3856, %v659_v3   ;;  %671 = vperm.xlu0 %3855, %v657_v4   ;;  %v511_v9 = vld [vmem:[%s4056_s21 + $0x8] sm:$0xff]  ;;  %v3786_v11 = vpack.c.bf16 %v505_v8, %v503_v7  ;;  %v513_v12 = vld [vmem:[%s4056_s21 + $0x18] sm:$0xff]  ;;  %v504_v14 = vld [vmem:[%s491_s18 + $0x10] sm:$0xff]  ;;  %s6268_s24 = sld [smem:[#allocation2]]  ;;  %s6270_s25 = sld [smem:[#allocation2 + $0x3]] }
  0x24   : > { %v3794_v15 = vpack.c.bf16 %v513_v12, %v511_v9  ;;  %v3788_v16 = vpack.c.bf16 %v504_v14, %v502_v13  ;;  %v510_v17 = vld [vmem:[%s4056_s21] sm:$0xff]  ;;  %v512_v18 = vld [vmem:[%s4056_s21 + $0x10] sm:$0xff]  ;;  %v507_v19 = vld [vmem:[%s491_s18 + $0x28] sm:$0xff]  ;;  %s7422_s30 = smov 1   ;;  %s7424_s26 = smov 111  }
  0x25   : > { %3787 = vmatprep.subr.bf16.mxu0 %v3786_v11  ;;  %v3796_v20 = vpack.c.bf16 %v512_v18, %v510_v17  ;;  %v509_v21 = vld [vmem:[%s491_s18 + $0x38] sm:$0xff]  ;;  %v515_v22 = vld [vmem:[%s4056_s21 + $0x28] sm:$0xff]  ;;  %v506_v26 = vld [vmem:[%s491_s18 + $0x20] sm:$0xff] }
  0x26   : > { %v517_v23 = vld [vmem:[%s4056_s21 + $0x38] sm:$0xff]  ;;  %3795 = vmatprep.subr.bf16.mxu1 %v3794_v15  ;;  %v3790_v24 = vpack.c.bf16 %v509_v21, %v507_v19  ;;  %v508_v27 = vld [vmem:[%s491_s18 + $0x30] sm:$0xff]  ;;  %v514_v28 = vld [vmem:[%s4056_s21 + $0x20] sm:$0xff]  ;;  %3789 = vmatpush1.bf16.msra.mxu0 %v3788_v16  ;;  %s7104_s18 = smov 127  }
  0x27   : > { %533 = vperm.xlu1 %3856, %v523_v6   ;;  %v3798_v25 = vpack.c.bf16 %v517_v23, %v515_v22  ;;  %528 = vperm.xlu0 %3855, %v522_v10   ;;  %v3792_v30 = vpack.c.bf16 %v508_v27, %v506_v26  ;;  %v516_v31 = vld [vmem:[%s4056_s21 + $0x30] sm:$0xff]  ;;  %v3707_v39 = vld [vmem:[%s6951_s9 + $0x48] sm:$0xff]  ;;  %v3706_v41 = vld [vmem:[%s6951_s9 + $0x40] sm:$0xff]  ;;  %s7100_s21 = smov 111  }
  0x28   : > { %3797 = vmatpush1.bf16.msra.mxu1 %v3796_v20  ;;  %3791 = vmatprep.subr.bf16.mxu0 %v3790_v24  ;;  %v3800_v33 = vpack.c.bf16 %v516_v31, %v514_v28  ;;  %v649_v40 = vld [vmem:[%s6947_s5 + $0x8] sm:$0xff]  ;;  %v3714_v45 = vld [vmem:[%s6951_s9 + $0x80] sm:$0xff]  ;;  %v521_v47 = vld [vmem:[%s6945_s3 + $0x18] sm:$0xff] }
  0x29   : > { %3799 = vmatprep.subr.bf16.mxu1 %v3798_v25  ;;  %v3715_v43 = vld [vmem:[%s6951_s9 + $0x88] sm:$0xff]  ;;  %v3722_v48 = vld [vmem:[%s6951_s9 + $0xc0] sm:$0xff]  ;;  %v651_v49 = vld [vmem:[%s6947_s5 + $0x18] sm:$0xff] }
  0x2a   : > { %3793 = vmatpush1.bf16.msra.mxu0 %v3792_v30  ;;  %v3723_v46 = vld [vmem:[%s6951_s9 + $0xc8] sm:$0xff]  ;;  %v3730_v51 = vld [vmem:[%s6951_s9 + $0x100] sm:$0xff]  ;;  %v1682_v52 = vld [vmem:[%s6951_s9 + $0x18] sm:$0xff] }
  0x2b   : > { %543 = vperm.xlu1 %3856, %v525_v29   ;;  %538 = vperm.xlu0 %3855, %v524_v32   ;;  %v3731_v50 = vld [vmem:[%s6951_s9 + $0x108] sm:$0xff]  ;;  %v1681_v53 = vld [vmem:[%s6951_s9 + $0x10] sm:$0xff]  ;;  %v3709_v54 = vld [vmem:[%s6951_s9 + $0x58] sm:$0xff] }
  0x2c   : > { %3801 = vmatpush1.bf16.msra.mxu1 %v3800_v33  ;;  %v3708_v55 = vld [vmem:[%s6951_s9 + $0x50] sm:$0xff]  ;;  %v3739_v56 = vld [vmem:[%s6951_s9 + $0x148] sm:$0xff]  ;;  %v3738_v57 = vld [vmem:[%s6951_s9 + $0x140] sm:$0xff] }
  0x2d   : > { %3654 = vmatmul.mubr.msk.f32.vlgmr.msra.gmra.mrb[0].mxu0 %vm546_vm0, %v518_v34  ;;  %v3717_v58 = vld [vmem:[%s6951_s9 + $0x98] sm:$0xff]  ;;  %v3716_v59 = vld [vmem:[%s6951_s9 + $0x90] sm:$0xff]  ;;  %v3747_v60 = vld [vmem:[%s6951_s9 + $0x188] sm:$0xff] }
  0x2e   : > { %629 = vmatprep.mubr.f32.mxu0 %v6957_v5  ;;  %v3746_v61 = vld [vmem:[%s6951_s9 + $0x180] sm:$0xff]  ;;  %v3725_v62 = vld [vmem:[%s6951_s9 + $0xd8] sm:$0xff]  ;;  %v3724_v63 = vld [vmem:[%s6951_s9 + $0xd0] sm:$0xff] }
  0x2f   : > { %1710 = vperm.xlu1 %3856, %v1680_v35   ;;  %3658 = vmatmul.mubr.msk.f32.vlgmr.msra.gmra.mrb[0].mxu1 %vm546_vm0, %v648_v36  ;;  %v3755_v0 = vld [vmem:[%s6951_s9 + $0x1c8] sm:$0xff]  ;;  %v3754_v1 = vld [vmem:[%s6951_s9 + $0x1c0] sm:$0xff]  ;;  %v3733_v2 = vld [vmem:[%s6951_s9 + $0x118] sm:$0xff] }
  0x30   : > { %1705 = vperm.xlu0 %3855, %v1679_v37   ;;  %798 = vmatprep.mubr.f32.mxu1 %v6957_v5  ;;  %v3732_v3 = vld [vmem:[%s6951_s9 + $0x110] sm:$0xff]  ;;  %v3763_v4 = vld [vmem:[%s6951_s9 + $0x208] sm:$0xff]  ;;  %v3762_v6 = vld [vmem:[%s6951_s9 + $0x200] sm:$0xff] }
  0x31   : > { %3655 = vmatmul.mubr.msk.f32.gmra.mrb[2].mxu0 %vm546_vm0, %v519_v38  ;;  %v3741_v7 = vld [vmem:[%s6951_s9 + $0x158] sm:$0xff]  ;;  %v3740_v8 = vld [vmem:[%s6951_s9 + $0x150] sm:$0xff]  ;;  %v3666_v9 = vld [vmem:[%s6949_s7 + $0x20] sm:$0xff] }
  0x32   : > { %635 = vmatprep.mubr.f32.mxu0 %v6957_v5  ;;  %v868_v10 = vld [vmem:[%s6949_s7] sm:$0xff]  ;;  %v3749_v11 = vld [vmem:[%s6951_s9 + $0x198] sm:$0xff]  ;;  %v3748_v12 = vld [vmem:[%s6951_s9 + $0x190] sm:$0xff] }
  0x33   : > { %1855 = vperm.xlu1 %3856, %v3707_v39   ;;  %3659 = vmatmul.mubr.msk.f32.gmra.mrb[2].mxu1 %vm546_vm0, %v649_v40  ;;  %v2888_v13 = vld [vmem:[%s6952_s10 + $0x8] sm:$0xff]  ;;  %v2887_v14 = vld [vmem:[%s6952_s10] sm:$0xff]  ;;  %v3756_v15 = vld [vmem:[%s6951_s9 + $0x1d0] sm:$0xff] }
  0x34   : > { %1850 = vperm.xlu0 %3855, %v3706_v41   ;;  %804 = vmatprep.mubr.f32.mxu1 %v6957_v5  ;;  %v3671_v16 = vld [vmem:[%s6949_s7 + $0x40] sm:$0xff]  ;;  %v869_v17 = vld [vmem:[%s6949_s7 + $0x8] sm:$0xff]  ;;  %v3757_v18 = vld [vmem:[%s6951_s9 + $0x1d8] sm:$0xff] }
  0x35   : > { %3656 = vmatmul.mubr.msk.f32.gmra.mrb[4].mxu0 %vm546_vm0, %v520_v42  ;;  %v3676_v19 = vld [vmem:[%s6949_s7 + $0x60] sm:$0xff]  ;;  %v3667_v20 = vld [vmem:[%s6949_s7 + $0x28] sm:$0xff]  ;;  %v3765_v21 = vld [vmem:[%s6951_s9 + $0x218] sm:$0xff] }
  0x36   : > { %641 = vmatprep.mubr.f32.mxu0 %v6957_v5  ;;  %v3764_v22 = vld [vmem:[%s6951_s9 + $0x210] sm:$0xff]  ;;  %v3681_v23 = vld [vmem:[%s6949_s7 + $0x80] sm:$0xff]  ;;  %v3672_v24 = vld [vmem:[%s6949_s7 + $0x48] sm:$0xff] }
  0x37   : > { %2000 = vperm.xlu1 %3856, %v3715_v43   ;;  %3660 = vmatmul.mubr.msk.f32.gmra.mrb[4].mxu1 %vm546_vm0, %v650_v44  ;;  %v870_v25 = vld [vmem:[%s6949_s7 + $0x10] sm:$0xff] }
  0x38   : > { %1995 = vperm.xlu0 %3855, %v3714_v45   ;;  %810 = vmatprep.mubr.f32.mxu1 %v6957_v5 }
  0x39   : > { %3657 = vmatmul.mubr.msk.f32.gmra.mrb[6].mxu0 %vm546_vm0, %v521_v47 }
  0x3b   : > { %2145 = vperm.xlu1 %3856, %v3723_v46   ;;  %3661 = vmatmul.mubr.msk.f32.gmra.mrb[6].mxu1 %vm546_vm0, %v651_v49 }
  0x3c   : > { %2140 = vperm.xlu0 %3855, %v3722_v48   ;;  %816 = vmatprep.mubr.f32.mxu1 %v6957_v5 }
  0x3f   : > { %2242 = vperm.xlu1 %3856, %v3731_v50  }
  0x40   : > { %2237 = vperm.xlu0 %3855, %v3730_v51  }
  0x43   : > { %1720 = vperm.xlu1 %3856, %v1682_v52  }
  0x44   : > { %1715 = vperm.xlu0 %3855, %v1681_v53  }
  0x47   : > { %1865 = vperm.xlu1 %3856, %v3709_v54  }
  0x48   : > { %1860 = vperm.xlu0 %3855, %v3708_v55  }
  0x4b   : > { %2387 = vperm.xlu1 %3856, %v3739_v56  }
  0x4c   : > { %2382 = vperm.xlu0 %3855, %v3738_v57  }
  0x4f   : > { %2010 = vperm.xlu1 %3856, %v3717_v58  }
  0x50   : > { %2005 = vperm.xlu0 %3855, %v3716_v59  }
  0x53   : > { %2532 = vperm.xlu1 %3856, %v3747_v60  }
  0x54   : > { %2527 = vperm.xlu0 %3855, %v3746_v61  }
  0x57   : > { %2155 = vperm.xlu1 %3856, %v3725_v62  }
  0x58   : > { %2150 = vperm.xlu0 %3855, %v3724_v63  }
  0x5b   : > { %2677 = vperm.xlu1 %3856, %v3755_v0  }
  0x5c   : > { %2672 = vperm.xlu0 %3855, %v3754_v1  }
  0x5f   : > { %2252 = vperm.xlu1 %3856, %v3733_v2  }
  0x60   : > { %2247 = vperm.xlu0 %3855, %v3732_v3  }
  0x63   : > { %2822 = vperm.xlu1 %3856, %v3763_v4  }
  0x64   : > { %2817 = vperm.xlu0 %3855, %v3762_v6  }
  0x67   : > { %2397 = vperm.xlu1 %3856, %v3741_v7  }
  0x68   : > { %2392 = vperm.xlu0 %3855, %v3740_v8  }
  0x6b   : > { %981 = vperm.xlu1 %3856, %v3666_v9  }
  0x6c   : > { %894 = vperm.xlu0 %3855, %v868_v10  }
  0x6f   : > { %2542 = vperm.xlu1 %3856, %v3749_v11  }
  0x70   : > { %2537 = vperm.xlu0 %3855, %v3748_v12  }
  0x73   : > { %2902 = vperm.xlu1 %3856, %v2888_v13  }
  0x74   : > { %2897 = vperm.xlu0 %3855, %v2887_v14  }
  0x77   : > { %2682 = vperm.xlu1 %3856, %v3756_v15  }
  0x78   : > { %1068 = vperm.xlu0 %3855, %v3671_v16  }
  0x7b   : > { %899 = vperm.xlu1 %3856, %v869_v17  }
  0x7c   : > { %2687 = vperm.xlu0 %3855, %v3757_v18  }
  0x7f   : > { %1155 = vperm.xlu1 %3856, %v3676_v19  }
  0x80   : > { %986 = vperm.xlu0 %3855, %v3667_v20  }
  0x83   : > { %2832 = vperm.xlu1 %3856, %v3765_v21  }
  0x84   : > { %2827 = vperm.xlu0 %3855, %v3764_v22  }
  0x87   : > { %1217 = vperm.xlu1 %3856, %v3681_v23  }
  0x88   : > { %1073 = vperm.xlu0 %3855, %v3672_v24  }
  0x8c   : > { %904 = vperm.xlu0 %3855, %v870_v25  }
  0x9e   : > { %v4258_v26 = vpop.permute.xlu0 %666  ;;  %v4260_v27 = vpop.permute.xlu1 %676 }
  0xa2   : > { %v4262_v28 = vpop.permute.xlu0 %671  ;;  %v4264_v29 = vpop.permute.xlu1 %681 }
  0xa6   : > { %v529_v30 = vpop.permute.xlu0 %528  ;;  %v4266_v31 = vpop.permute.xlu1 %533 }
  0xaa   : > { %v4268_v32 = vpop.permute.xlu0 %538  ;;  %v4270_v33 = vpop.permute.xlu1 %543 }
  0xae   : > { %v4274_v35 = vpop.permute.xlu1 %1710 }
  0xaf   : > { %v4272_v34 = vpop.permute.xlu0 %1705 }
  0xb2   : > { %v4278_v37 = vpop.permute.xlu1 %1855 }
  0xb3   : > { %v4276_v36 = vpop.permute.xlu0 %1850 }
  0xb6   : > { %v4282_v39 = vpop.permute.xlu1 %2000 }
  0xb7   : > { %v4280_v38 = vpop.permute.xlu0 %1995 }
  0xba   : > { %v4286_v41 = vpop.permute.xlu1 %2145 }
  0xbb   : > { %v4284_v40 = vpop.permute.xlu0 %2140 }
  0xbe   : > { %v4297_v49 = vpop.permute.xlu1 %2242 }
  0xbf   : > { %v4288_v42 = vpop.permute.xlu0 %2237 }
  0xc2   : > { %v4319_v60 = vpop.permute.xlu1 %1720 }
  0xc3   : > { %v4301_v51 = vpop.permute.xlu0 %1715  ;;  %7132 = vst [vmem:[#allocation8_spill] sm:$0xff] %v4319_v60 }
  0xc4   : > { %7130 = vst [vmem:[#allocation6_spill] sm:$0xff] %v4301_v51 }
  0xc6   : > { %v4342_v3 = vpop.permute.xlu1 %1865 }
  0xc7   : > { %v4323_v61 = vpop.permute.xlu0 %1860  ;;  %7134 = vst [vmem:[#allocation10_spill] sm:$0xff] %v4342_v3 }
  0xc8   : > { %7133 = vst [vmem:[#allocation9_spill] sm:$0xff] %v4323_v61 }
  0xca   : > { %v4350_v6 = vpop.permute.xlu1 %2387 }
  0xcb   : > { %v4344_v4 = vpop.permute.xlu0 %2382  ;;  %7135 = vst [vmem:[#allocation11_spill] sm:$0xff] %v4350_v6 }
  0xce   : > { %v4362_v8 = vpop.permute.xlu1 %2010 }
  0xcf   : > { %v4354_v7 = vpop.permute.xlu0 %2005  ;;  %7137 = vst [vmem:[#allocation13_spill] sm:$0xff] %v4362_v8  ;;  %v3673_v8 = vld [vmem:[%s6949_s7 + $0x50] sm:$0xff] }
  0xd0   : > { %7136 = vst [vmem:[#allocation12_spill] sm:$0xff] %v4354_v7 }
  0xd2   : > { %v4370_v10 = vpop.permute.xlu1 %2532 }
  0xd3   : > { %v4364_v9 = vpop.permute.xlu0 %2527  ;;  %7139 = vst [vmem:[#allocation15_spill] sm:$0xff] %v4370_v10 }
  0xd4   : > { %7138 = vst [vmem:[#allocation14_spill] sm:$0xff] %v4364_v9 }
  0xd6   : > { %v4382_v12 = vpop.permute.xlu1 %2155 }
  0xd7   : > { %v4374_v11 = vpop.permute.xlu0 %2150  ;;  %7141 = vst [vmem:[#allocation17_spill] sm:$0xff] %v4382_v12 }
  0xd8   : > { %7140 = vst [vmem:[#allocation16_spill] sm:$0xff] %v4374_v11 }
  0xda   : > { %v4396_v16 = vpop.permute.xlu1 %2677 }
  0xdb   : > { %v4384_v13 = vpop.permute.xlu0 %2672  ;;  %7144 = vst [vmem:[#allocation20_spill] sm:$0xff] %v4396_v16  ;;  %v3677_v16 = vld [vmem:[%s6949_s7 + $0x68] sm:$0xff] }
  0xdc   : > { %7142 = vst [vmem:[#allocation18_spill] sm:$0xff] %v4384_v13  ;;  %v3687_v13 = vld [vmem:[%s6949_s7 + $0xa8] sm:$0xff] }
  0xde   : > { %v4411_v19 = vpop.permute.xlu1 %2252 }
  0xdf   : > { %v4400_v17 = vpop.permute.xlu0 %2247  ;;  %7145 = vst [vmem:[#allocation21_spill] sm:$0xff] %v4411_v19 }
  0xe2   : > { %v4419_v21 = vpop.permute.xlu1 %2822 }
  0xe3   : > { %v4413_v20 = vpop.permute.xlu0 %2817  ;;  %7147 = vst [vmem:[#allocation23_spill] sm:$0xff] %v4419_v21 }
  0xe4   : > { %7146 = vst [vmem:[#allocation22_spill] sm:$0xff] %v4413_v20 }
  0xe6   : > { %v4431_v23 = vpop.permute.xlu1 %2397 }
  0xe7   : > { %v4423_v22 = vpop.permute.xlu0 %2392  ;;  %7149 = vst [vmem:[#allocation25_spill] sm:$0xff] %v4431_v23 }
  0xe8   : > { %7148 = vst [vmem:[#allocation24_spill] sm:$0xff] %v4423_v22 }
  0xea   : > { %v4439_v25 = vpop.permute.xlu1 %981 }
  0xeb   : > { %v4433_v24 = vpop.permute.xlu0 %894  ;;  %7151 = vst [vmem:[#allocation27_spill] sm:$0xff] %v4439_v25 }
  0xec   : > { %7150 = vst [vmem:[#allocation26_spill] sm:$0xff] %v4433_v24 }
 0x100   : > { %v625_v43 = vpop.f32.mrb[0].mxu0 }
 0x101   : > { %v4290_v44 = vadd.f32 %v625_v43, %v529_v30  ;;  %v627_v47 = vpop.f32.mrb[1].mxu0 }
 0x102   : > { %v794_v45 = vpop.f32.mrb[0].mxu1  ;;  %v4303_v52 = vadd.f32 %v627_v47, %v529_v30 }
 0x103   : > { %7129 = vst [vmem:[#allocation5_spill] sm:$0xff] %v4290_v44  ;;  %v4293_v46 = vadd.f32 %v794_v45, %v4258_v26  ;;  %v796_v48 = vpop.f32.mrb[1].mxu1  ;;  %841 = vrot.lane.b32.xlu1 %v4290_v44, %s3919_s27 }
 0x104   : > { %v631_v50 = vpop.f32.mrb[2].mxu0  ;;  %7131 = vst [vmem:[#allocation7_spill] sm:$0xff] %v4303_v52  ;;  %v4387_v14 = vadd.f32 %v796_v48, %v4258_v26  ;;  %v4443_v26 = vpop.permute.xlu0 %2537 }
 0x105   : > { %1631 = vrot.lane.b32.xlu0 %v4293_v46, %s3919_s27  ;;  %v4305_v55 = vpop.f32.mrb[3].mxu0  ;;  %v4394_v15 = vadd.f32 %v631_v50, %v4266_v31  ;;  %7152 = vst [vmem:[#allocation28_spill] sm:$0xff] %v4443_v26 }
 0x106   : > { %v800_v53 = vpop.f32.mrb[2].mxu1  ;;  %v4461_v43 = vadd.f32 %v4305_v55, %v4266_v31 }
 0x107   : > { %v802_v54 = vpop.f32.mrb[3].mxu1  ;;  %936 = vrot.lane.b32.xlu1 %v4303_v52, %s3920_s28  ;;  %v4330_v63 = vadd.f32 %v800_v53, %v4262_v28  ;;  %7143 = vst [vmem:[#allocation19_spill] sm:$0xff] %v4394_v15 }
 0x108   : > { %v4311_v56 = vpop.f32.mrb[4].mxu0  ;;  %v4405_v18 = vadd.f32 %v802_v54, %v4262_v28  ;;  %v4451_v28 = vpop.permute.xlu1 %2542  ;;  %7155 = vst [vmem:[#allocation31_spill] sm:$0xff] %v4461_v43 }
 0x109   : > { %1775 = vrot.lane.b32.xlu0 %v4293_v46, %s3920_s28  ;;  %v4315_v58 = vpop.f32.mrb[5].mxu0  ;;  %7153 = vst [vmem:[#allocation29_spill] sm:$0xff] %v4451_v28  ;;  %v4453_v30 = vpop.permute.xlu0 %2897  ;;  %v3686_v28 = vld [vmem:[%s6949_s7 + $0xa0] sm:$0xff]  ;;  %v4661_v11 = vadd.f32 %v4311_v56, %v4268_v32 }
 0x10a   : > { %v4313_v57 = vpop.f32.mrb[4].mxu1  ;;  %7154 = vst [vmem:[#allocation30_spill] sm:$0xff] %v4453_v30 }
 0x10b   : > { %v4317_v59 = vpop.f32.mrb[5].mxu1  ;;  %1023 = vrot.lane.b32.xlu1 %v4303_v52, %s3921_s16  ;;  %v4465_v45 = vadd.f32 %v4313_v57, %v4260_v27  ;;  %7178 = vst [vmem:[#allocation54_spill] sm:$0xff] %v4661_v11 }
 0x10c   : > { %v4327_v62 = vpop.f32.mrb[6].mxu0  ;;  %v4467_v47 = vpop.permute.xlu1 %2902  ;;  %v4483_v50 = vadd.f32 %v4317_v59, %v4260_v27 }
 0x10d   : > { %1920 = vrot.lane.b32.xlu0 %v4293_v46, %s3921_s16  ;;  %v4334_v1 = vpop.f32.mrb[7].mxu0  ;;  %7156 = vst [vmem:[#allocation32_spill] sm:$0xff] %v4467_v47  ;;  %v4471_v48 = vpop.permute.xlu0 %1068 }
 0x10e   : > { %v4332_v0 = vpop.f32.mrb[6].mxu1  ;;  %7157 = vst [vmem:[#allocation33_spill] sm:$0xff] %v4471_v48 }
 0x10f   : > { %v4336_v2 = vpop.f32.mrb[7].mxu1  ;;  %1633 = vrot.lane.b32.xlu1 %v4330_v63, %s3919_s27  ;;  %v4493_v54 = vadd.f32 %v4332_v0, %v4264_v29 }
 0x110   : > { %v4479_v31 = vpop.permute.xlu1 %2682 }
 0x111   : > { %2065 = vrot.lane.b32.xlu0 %v4293_v46, %s7108_s17  ;;  %7158 = vst [vmem:[#allocation34_spill] sm:$0xff] %v4479_v31  ;;  %v4485_v53 = vpop.permute.xlu0 %2687 }
 0x112   : > { %7159 = vst [vmem:[#allocation35_spill] sm:$0xff] %v4485_v53 }
 0x113   : > { %1777 = vrot.lane.b32.xlu1 %v4330_v63, %s3920_s28 }
 0x114   : > { %v4495_v55 = vpop.permute.xlu1 %899 }
 0x115   : > { %2307 = vrot.lane.b32.xlu0 %v4293_v46, %s7104_s18  ;;  %7160 = vst [vmem:[#allocation36_spill] sm:$0xff] %v4495_v55  ;;  %v4499_v57 = vpop.permute.xlu0 %986 }
 0x116   : > { %7161 = vst [vmem:[#allocation37_spill] sm:$0xff] %v4499_v57 }
 0x117   : > { %1922 = vrot.lane.b32.xlu1 %v4330_v63, %s3921_s16 }
 0x118   : > { %v4507_v27 = vpop.permute.xlu1 %1155 }
 0x119   : > { %2452 = vrot.lane.b32.xlu0 %v4293_v46, %s7106_s19  ;;  %7162 = vst [vmem:[#allocation38_spill] sm:$0xff] %v4507_v27  ;;  %v4509_v59 = vpop.permute.xlu0 %2827 }
 0x11a   : > { %7163 = vst [vmem:[#allocation39_spill] sm:$0xff] %v4509_v59 }
 0x11b   : > { %2067 = vrot.lane.b32.xlu1 %v4330_v63, %s7108_s17 }
 0x11c   : > { %v4515_v0 = vpop.permute.xlu1 %2832 }
 0x11d   : > { %2597 = vrot.lane.b32.xlu0 %v4293_v46, %s7102_s20  ;;  %7164 = vst [vmem:[#allocation40_spill] sm:$0xff] %v4515_v0  ;;  %v4519_v5 = vpop.permute.xlu0 %1073  ;;  %v3668_v0 = vld [vmem:[%s6949_s7 + $0x30] sm:$0xff] }
 0x11e   : > { %7165 = vst [vmem:[#allocation41_spill] sm:$0xff] %v4519_v5  ;;  %v4537_v5 = vadd.f32 %v4336_v2, %v4264_v29 }
 0x11f   : > { %2309 = vrot.lane.b32.xlu1 %v4330_v63, %s7104_s18 }
 0x120   : > { %v4527_v55 = vpop.permute.xlu1 %1217 }
 0x121   : > { %2742 = vrot.lane.b32.xlu0 %v4293_v46, %s7100_s21  ;;  %7166 = vst [vmem:[#allocation42_spill] sm:$0xff] %v4527_v55  ;;  %v4529_v57 = vpop.permute.xlu0 %904 }
 0x122   : > { %7167 = vst [vmem:[#allocation43_spill] sm:$0xff] %v4529_v57 }
 0x123   : > { %2454 = vrot.lane.b32.xlu1 %v4330_v63, %s7106_s19 }
 0x125   : > { %928 = vrot.lane.b32.xlu0 %v4290_v44, %s3920_s28 }
 0x127   : > { %2599 = vrot.lane.b32.xlu1 %v4330_v63, %s7102_s20 }
 0x129   : > { %1015 = vrot.lane.b32.xlu0 %v4290_v44, %s3921_s16 }
 0x12b   : > { %2744 = vrot.lane.b32.xlu1 %v4330_v63, %s7100_s21 }
 0x12d   : > { %1647 = vrot.lane.b32.xlu0 %v4387_v14, %s3919_s27 }
 0x12f   : > { %930 = vrot.lane.b32.xlu1 %v4394_v15, %s3920_s28 }
 0x131   : > { %1791 = vrot.lane.b32.xlu0 %v4387_v14, %s3920_s28 }
 0x133   : > { %1649 = vrot.lane.b32.xlu1 %v4405_v18, %s3919_s27 }
 0x135   : > { %1936 = vrot.lane.b32.xlu0 %v4387_v14, %s3921_s16 }
 0x137   : > { %1793 = vrot.lane.b32.xlu1 %v4405_v18, %s3920_s28 }
 0x139   : > { %2081 = vrot.lane.b32.xlu0 %v4387_v14, %s7108_s17 }
 0x13b   : > { %1938 = vrot.lane.b32.xlu1 %v4405_v18, %s3921_s16 }
 0x13d   : > { %2323 = vrot.lane.b32.xlu0 %v4387_v14, %s7104_s18 }
 0x13f   : > { %2083 = vrot.lane.b32.xlu1 %v4405_v18, %s7108_s17 }
 0x141   : > { %2468 = vrot.lane.b32.xlu0 %v4387_v14, %s7106_s19 }
 0x143   : > { %2325 = vrot.lane.b32.xlu1 %v4405_v18, %s7104_s18 }
 0x145   : > { %2613 = vrot.lane.b32.xlu0 %v4387_v14, %s7102_s20 }
 0x147   : > { %2470 = vrot.lane.b32.xlu1 %v4405_v18, %s7106_s19 }
 0x149   : > { %2758 = vrot.lane.b32.xlu0 %v4387_v14, %s7100_s21 }
 0x14b   : > { %2615 = vrot.lane.b32.xlu1 %v4405_v18, %s7102_s20 }
 0x14d   : > { %849 = vrot.lane.b32.xlu0 %v4303_v52, %s3919_s27 }
 0x14f   : > { %2760 = vrot.lane.b32.xlu1 %v4405_v18, %s7100_s21 }
 0x151   : > { %843 = vrot.lane.b32.xlu0 %v4394_v15, %s3919_s27 }
 0x153   : > { %851 = vrot.lane.b32.xlu1 %v4461_v43, %s3919_s27 }
 0x155   : > { %1635 = vrot.lane.b32.xlu0 %v4465_v45, %s3919_s27 }
 0x157   : > { %2311 = vrot.lane.b32.xlu1 %v4465_v45, %s7104_s18 }
 0x159   : > { %1779 = vrot.lane.b32.xlu0 %v4465_v45, %s3920_s28 }
 0x15b   : > { %2327 = vrot.lane.b32.xlu1 %v4483_v50, %s7104_s18 }
 0x15d   : > { %1924 = vrot.lane.b32.xlu0 %v4465_v45, %s3921_s16 }
 0x15f   : > { %1637 = vrot.lane.b32.xlu1 %v4493_v54, %s3919_s27 }
 0x161   : > { %2069 = vrot.lane.b32.xlu0 %v4465_v45, %s7108_s17 }
 0x163   : > { %1781 = vrot.lane.b32.xlu1 %v4493_v54, %s3920_s28 }
 0x165   : > { %2456 = vrot.lane.b32.xlu0 %v4465_v45, %s7106_s19 }
 0x167   : > { %1926 = vrot.lane.b32.xlu1 %v4493_v54, %s3921_s16 }
 0x169   : > { %2601 = vrot.lane.b32.xlu0 %v4465_v45, %s7102_s20 }
 0x16b   : > { %2071 = vrot.lane.b32.xlu1 %v4493_v54, %s7108_s17 }
 0x16d   : > { %1651 = vrot.lane.b32.xlu0 %v4483_v50, %s3919_s27 }
 0x16f   : > { %2458 = vrot.lane.b32.xlu1 %v4493_v54, %s7106_s19 }
 0x171   : > { %1795 = vrot.lane.b32.xlu0 %v4483_v50, %s3920_s28 }
 0x173   : > { %2603 = vrot.lane.b32.xlu1 %v4493_v54, %s7102_s20 }
 0x175   : > { %1940 = vrot.lane.b32.xlu0 %v4483_v50, %s3921_s16  ;;  %v4539_v27 = vpop.permute.xlu1 %841 }
 0x176   : > { %7168 = vst [vmem:[#allocation44_spill] sm:$0xff] %v4539_v27 }
 0x177   : > { %v4541_v48 = vpop.permute.xlu0 %1631  ;;  %1653 = vrot.lane.b32.xlu1 %v4537_v5, %s3919_s27 }
 0x179   : > { %2085 = vrot.lane.b32.xlu0 %v4483_v50, %s7108_s17  ;;  %v4547_v57 = vpop.permute.xlu1 %936 }
 0x17a   : > { %7169 = vst [vmem:[#allocation45_spill] sm:$0xff] %v4547_v57 }
 0x17b   : > { %v4549_v55 = vpop.permute.xlu0 %1775  ;;  %1797 = vrot.lane.b32.xlu1 %v4537_v5, %s3920_s28 }
 0x17d   : > { %2472 = vrot.lane.b32.xlu0 %v4483_v50, %s7106_s19  ;;  %v4555_v29 = vpop.permute.xlu1 %1023 }
 0x17e   : > { %7170 = vst [vmem:[#allocation46_spill] sm:$0xff] %v4555_v29 }
 0x17f   : > { %v4557_v2 = vpop.permute.xlu0 %1920  ;;  %1942 = vrot.lane.b32.xlu1 %v4537_v5, %s3921_s16 }
 0x181   : > { %2617 = vrot.lane.b32.xlu0 %v4483_v50, %s7102_s20  ;;  %v4563_v25 = vpop.permute.xlu1 %1633 }
 0x183   : > { %v4565_v24 = vpop.permute.xlu0 %2065  ;;  %2087 = vrot.lane.b32.xlu1 %v4537_v5, %s7108_s17 }
 0x185   : > { %2313 = vrot.lane.b32.xlu0 %v4493_v54, %s7104_s18  ;;  %v4571_v57 = vpop.permute.xlu1 %1777 }
 0x187   : > { %v4573_v29 = vpop.permute.xlu0 %2307  ;;  %2474 = vrot.lane.b32.xlu1 %v4537_v5, %s7106_s19 }
 0x189   : > { %2329 = vrot.lane.b32.xlu0 %v4537_v5, %s7104_s18  ;;  %v4579_v27 = vpop.permute.xlu1 %1922 }
 0x18b   : > { %v4581_v47 = vpop.permute.xlu0 %2452  ;;  %2619 = vrot.lane.b32.xlu1 %v4537_v5, %s7102_s20 }
 0x18d   : > { %938 = vrot.lane.b32.xlu0 %v4461_v43, %s3920_s28  ;;  %v4590_v30 = vpop.permute.xlu1 %2067 }
 0x18f   : > { %v4592_v21 = vpop.permute.xlu0 %2597  ;;  %991 = vperm.xlu1 %3856, %v3668_v0  }
 0x191   : > { %1102 = vrot.lane.b32.xlu0 %v4290_v44, %s7108_s17  ;;  %v4596_v53 = vpop.permute.xlu1 %2309 }
 0x193   : > { %v4601_v59 = vpop.permute.xlu0 %2742  ;;  %1110 = vrot.lane.b32.xlu1 %v4303_v52, %s7108_s17 }
 0x194   : > { %7171 = vst [vmem:[#allocation47_spill] sm:$0xff] %v4601_v59 }
 0x195   : > { %1160 = vperm.xlu0 %3855, %v3677_v16   ;;  %v4608_v0 = vpop.permute.xlu1 %2454 }
 0x196   : > { %7172 = vst [vmem:[#allocation48_spill] sm:$0xff] %v4608_v0 }
 0x197   : > { %v4610_v31 = vpop.permute.xlu0 %928  ;;  %1304 = vperm.xlu1 %3856, %v3686_v28  }
 0x198   : > { %7173 = vst [vmem:[#allocation49_spill] sm:$0xff] %v4610_v31  ;;  %v2889_v31 = vld [vmem:[%s6952_s10 + $0x10] sm:$0xff] }
 0x199   : > { %2746 = vrot.lane.b32.xlu0 %v4465_v45, %s7100_s21  ;;  %v4614_v23 = vpop.permute.xlu1 %2599 }
 0x19a   : > { %7174 = vst [vmem:[#allocation50_spill] sm:$0xff] %v4614_v23 }
 0x19b   : > { %v4616_v26 = vpop.permute.xlu0 %1015  ;;  %2748 = vrot.lane.b32.xlu1 %v4493_v54, %s7100_s21 }
 0x19c   : > { %7175 = vst [vmem:[#allocation51_spill] sm:$0xff] %v4616_v26  ;;  %v2890_v26 = vld [vmem:[%s6952_s10 + $0x18] sm:$0xff] }
 0x19d   : > { %2762 = vrot.lane.b32.xlu0 %v4483_v50, %s7100_s21  ;;  %v4622_v16 = vpop.permute.xlu1 %2744 }
 0x19e   : > { %7176 = vst [vmem:[#allocation52_spill] sm:$0xff] %v4622_v16 }
 0x19f   : > { %v4627_v28 = vpop.permute.xlu0 %1647  ;;  %2764 = vrot.lane.b32.xlu1 %v4537_v5, %s7100_s21 }
 0x1a1   : > { %2907 = vperm.xlu0 %3855, %v2889_v31   ;;  %v4634_v22 = vpop.permute.xlu1 %930  ;;  %v3682_v31 = vld [vmem:[%s6949_s7 + $0x88] sm:$0xff] }
 0x1a2   : > { %7177 = vst [vmem:[#allocation53_spill] sm:$0xff] %v4634_v22  ;;  %v3691_v22 = vld [vmem:[%s6949_s7 + $0xc0] sm:$0xff] }
 0x1a3   : > { %v4636_v12 = vpop.permute.xlu0 %1791  ;;  %2912 = vperm.xlu1 %3856, %v2890_v26  }
 0x1a5   : > { %1017 = vrot.lane.b32.xlu0 %v4394_v15, %s3921_s16  ;;  %v4640_v16 = vpop.permute.xlu1 %1649 }
 0x1a7   : > { %v4645_v60 = vpop.permute.xlu0 %1936  ;;  %1025 = vrot.lane.b32.xlu1 %v4461_v43, %s3921_s16 }
 0x1a9   : > { %1078 = vperm.xlu0 %3855, %v3673_v8   ;;  %v4652_v26 = vpop.permute.xlu1 %1793  ;;  %v4667_v8 = vadd.f32 %v4315_v58, %v4268_v32  ;;  %v3669_v58 = vld [vmem:[%s6949_s7 + $0x38] sm:$0xff] }
 0x1ab   : > { %v4657_v3 = vpop.permute.xlu0 %2081  ;;  %1222 = vperm.xlu1 %3856, %v3682_v31   ;;  %7179 = vst [vmem:[#allocation55_spill] sm:$0xff] %v4667_v8 }
 0x1ad   : > { %1391 = vperm.xlu0 %3855, %v3691_v22   ;;  %v4663_v7 = vpop.permute.xlu1 %1938  ;;  %v871_v22 = vld [vmem:[%s6949_s7 + $0x18] sm:$0xff] }
 0x1af   : > { %v4669_v51 = vpop.permute.xlu0 %2323  ;;  %845 = vrot.lane.b32.xlu1 %v4661_v11, %s3919_s27 }
 0x1b1   : > { %853 = vrot.lane.b32.xlu0 %v4667_v8, %s3919_s27  ;;  %v4678_v56 = vpop.permute.xlu1 %2083 }
 0x1b3   : > { %v4680_v31 = vpop.permute.xlu0 %2468  ;;  %909 = vperm.xlu1 %3856, %v871_v22   ;;  %v3678_v22 = vld [vmem:[%s6949_s7 + $0x70] sm:$0xff] }
 0x1b5   : > { %932 = vrot.lane.b32.xlu0 %v4661_v11, %s3920_s28  ;;  %v4684_v32 = vpop.permute.xlu1 %2325 }
 0x1b7   : > { %v4689_v61 = vpop.permute.xlu0 %2613  ;;  %940 = vrot.lane.b32.xlu1 %v4667_v8, %s3920_s28 }
 0x1b9   : > { %996 = vperm.xlu0 %3855, %v3669_v58   ;;  %v4693_v23 = vpop.permute.xlu1 %2470 }
 0x1ba   : > { %7180 = vst [vmem:[#allocation56_spill] sm:$0xff] %v4693_v23  ;;  %v3685_v23 = vld [vmem:[%s6953_s11 + $0x8] sm:$0x3] }
 0x1bb   : > { %v4695_v10 = vpop.permute.xlu0 %2758  ;;  %1104 = vrot.lane.b32.xlu1 %v4394_v15, %s7108_s17 }
 0x1bc   : > { %7181 = vst [vmem:[#allocation57_spill] sm:$0xff] %v4695_v10 }
 0x1bd   : > { %1112 = vrot.lane.b32.xlu0 %v4461_v43, %s7108_s17  ;;  %v4704_v20 = vpop.permute.xlu1 %2615 }
 0x1be   : > { %7182 = vst [vmem:[#allocation58_spill] sm:$0xff] %v4704_v20 }
 0x1bf   : > { %v4706_v6 = vpop.permute.xlu0 %849  ;;  %1165 = vperm.xlu1 %3856, %v3678_v22  }
 0x1c0   : > { %7183 = vst [vmem:[#allocation59_spill] sm:$0xff] %v4706_v6  ;;  %v3696_v6 = vld [vmem:[%s6949_s7 + $0xe0] sm:$0xff] }
 0x1c1   : > { %1251 = vrot.lane.b32.xlu0 %v4290_v44, %s7104_s18  ;;  %v4710_v58 = vpop.permute.xlu1 %2760 }
 0x1c2   : > { %7184 = vst [vmem:[#allocation60_spill] sm:$0xff] %v4710_v58 }
 0x1c3   : > { %v4715_v19 = vpop.permute.xlu0 %843  ;;  %1259 = vrot.lane.b32.xlu1 %v4303_v52, %s7104_s18 }
 0x1c4   : > { %7185 = vst [vmem:[#allocation61_spill] sm:$0xff] %v4715_v19  ;;  %v3674_v19 = vld [vmem:[%s6949_s7 + $0x58] sm:$0xff] }
 0x1c5   : > { %1309 = vperm.xlu0 %3855, %v3687_v13   ;;  %v4722_v22 = vpop.permute.xlu1 %851  ;;  %v3683_v13 = vld [vmem:[%s6949_s7 + $0x90] sm:$0xff] }
 0x1c6   : > { %7186 = vst [vmem:[#allocation62_spill] sm:$0xff] %v4722_v22 }
 0x1c7   : > { %v4724_v20 = vpop.permute.xlu0 %1635  ;;  %1478 = vperm.xlu1 %3856, %v3696_v6  }
 0x1c8   : > { %7187 = vst [vmem:[#allocation63_spill] sm:$0xff] %v4724_v20  ;;  %v3692_v20 = vld [vmem:[%s6949_s7 + $0xc8] sm:$0xff] }
 0x1c9   : > { %1019 = vrot.lane.b32.xlu0 %v4661_v11, %s3921_s16  ;;  %v4728_v58 = vpop.permute.xlu1 %2311 }
 0x1ca   : > { %7188 = vst [vmem:[#allocation64_spill] sm:$0xff] %v4728_v58 }
 0x1cb   : > { %v4733_v0 = vpop.permute.xlu0 %1779  ;;  %1027 = vrot.lane.b32.xlu1 %v4667_v8, %s3921_s16 }
 0x1cc   : > { %7189 = vst [vmem:[#allocation65_spill] sm:$0xff] %v4733_v0 }
 0x1cd   : > { %1083 = vperm.xlu0 %3855, %v3674_v19   ;;  %v4740_v6 = vpop.permute.xlu1 %2327  ;;  %v3701_v19 = vld [vmem:[%s6949_s7 + $0x100] sm:$0xff] }
 0x1ce   : > { %7190 = vst [vmem:[#allocation66_spill] sm:$0xff] %v4740_v6  ;;  %v4762_v6 = vadd.f32 %v4327_v62, %v4270_v33 }
 0x1cf   : > { %v4742_v22 = vpop.permute.xlu0 %1924  ;;  %1227 = vperm.xlu1 %3856, %v3683_v13  }
 0x1d0   : > { %7191 = vst [vmem:[#allocation67_spill] sm:$0xff] %v4742_v22  ;;  %7195 = vst [vmem:[#allocation71_spill] sm:$0xff] %v4762_v6 }
 0x1d1   : > { %1338 = vrot.lane.b32.xlu0 %v4290_v44, %s7106_s19  ;;  %v4746_v58 = vpop.permute.xlu1 %1637 }
 0x1d2   : > { %7192 = vst [vmem:[#allocation68_spill] sm:$0xff] %v4746_v58 }
 0x1d3   : > { %v4751_v0 = vpop.permute.xlu0 %2069  ;;  %1346 = vrot.lane.b32.xlu1 %v4303_v52, %s7106_s19 }
 0x1d4   : > { %7193 = vst [vmem:[#allocation69_spill] sm:$0xff] %v4751_v0  ;;  %v4770_v0 = vadd.f32 %v4334_v1, %v4270_v33  ;;  %v3679_v1 = vld [vmem:[%s6949_s7 + $0x78] sm:$0xff] }
 0x1d5   : > { %1396 = vperm.xlu0 %3855, %v3692_v20   ;;  %v4758_v13 = vpop.permute.xlu1 %1781 }
 0x1d6   : > { %7194 = vst [vmem:[#allocation70_spill] sm:$0xff] %v4758_v13  ;;  %7197 = vst [vmem:[#allocation73_spill] sm:$0xff] %v4770_v0 }
 0x1d7   : > { %v4764_v58 = vpop.permute.xlu0 %2456  ;;  %1565 = vperm.xlu1 %3856, %v3701_v19  }
 0x1d8   : > { %7196 = vst [vmem:[#allocation72_spill] sm:$0xff] %v4764_v58 }
 0x1d9   : > { %847 = vrot.lane.b32.xlu0 %v4762_v6, %s3919_s27  ;;  %v4772_v20 = vpop.permute.xlu1 %1926 }
 0x1da   : > { %7198 = vst [vmem:[#allocation74_spill] sm:$0xff] %v4772_v20 }
 0x1db   : > { %v4774_v22 = vpop.permute.xlu0 %2601  ;;  %855 = vrot.lane.b32.xlu1 %v4770_v0, %s3919_s27 }
 0x1dc   : > { %7199 = vst [vmem:[#allocation75_spill] sm:$0xff] %v4774_v22 }
 0x1dd   : > { %934 = vrot.lane.b32.xlu0 %v4762_v6, %s3920_s28  ;;  %v4780_v62 = vpop.permute.xlu1 %2071 }
 0x1de   : > { %7200 = vst [vmem:[#allocation76_spill] sm:$0xff] %v4780_v62 }
 0x1df   : > { %v4782_v19 = vpop.permute.xlu0 %1651  ;;  %942 = vrot.lane.b32.xlu1 %v4770_v0, %s3920_s28 }
 0x1e0   : > { %7201 = vst [vmem:[#allocation77_spill] sm:$0xff] %v4782_v19 }
 0x1e1   : > { %1106 = vrot.lane.b32.xlu0 %v4661_v11, %s7108_s17  ;;  %v4788_v33 = vpop.permute.xlu1 %2458 }
 0x1e2   : > { %7202 = vst [vmem:[#allocation78_spill] sm:$0xff] %v4788_v33  ;;  %v3688_v33 = vld [vmem:[%s6949_s7 + $0xb0] sm:$0xff] }
 0x1e3   : > { %v4793_v22 = vpop.permute.xlu0 %1795  ;;  %1114 = vrot.lane.b32.xlu1 %v4667_v8, %s7108_s17 }
 0x1e4   : > { %7203 = vst [vmem:[#allocation79_spill] sm:$0xff] %v4793_v22  ;;  %v654_v22 = vld [vmem:[%s6947_s5 + $0x30] sm:$0xff] }
 0x1e5   : > { %1170 = vperm.xlu0 %3855, %v3679_v1   ;;  %v4799_v62 = vpop.permute.xlu1 %2603  ;;  %v3697_v1 = vld [vmem:[%s6949_s7 + $0xe8] sm:$0xff] }
 0x1e6   : > { %7205 = vst [vmem:[#allocation81_spill] sm:$0xff] %v4799_v62 }
 0x1e7   : > { %v4797_v58 = vpop.permute.xlu0 %1940  ;;  %1253 = vrot.lane.b32.xlu1 %v4394_v15, %s7104_s18 }
 0x1e8   : > { %7204 = vst [vmem:[#allocation80_spill] sm:$0xff] %v4797_v58 }
 0x1e9   : > { %1261 = vrot.lane.b32.xlu0 %v4461_v43, %s7104_s18  ;;  %v4810_v13 = vpop.permute.xlu1 %1653 }
 0x1ea   : > { %7207 = vst [vmem:[#allocation83_spill] sm:$0xff] %v4810_v13 }
 0x1eb   : > { %v4808_v20 = vpop.permute.xlu0 %2085  ;;  %1314 = vperm.xlu1 %3856, %v3688_v33   ;;  %v3684_v33 = vld [vmem:[%s6949_s7 + $0x98] sm:$0xff] }
 0x1ec   : > { %7206 = vst [vmem:[#allocation82_spill] sm:$0xff] %v4808_v20 }
 0x1ed   : > { %1425 = vrot.lane.b32.xlu0 %v4290_v44, %s7102_s20  ;;  %v4821_v58 = vpop.permute.xlu1 %1797 }
 0x1ee   : > { %7209 = vst [vmem:[#allocation85_spill] sm:$0xff] %v4821_v58  ;;  %v857_v58 = vlaneseq }
 0x1ef   : > { %1433 = vrot.lane.b32.xlu1 %v4303_v52, %s7102_s20  ;;  %v4819_v62 = vpop.permute.xlu0 %2472 }
 0x1f0   : > { %7208 = vst [vmem:[#allocation84_spill] sm:$0xff] %v4819_v62  ;;  %v652_v62 = vld [vmem:[%s6947_s5 + $0x20] sm:$0xff]  ;;  %v875_v19 = vshrl.u32 %v857_v58, 7 }
 0x1f1   : > { %1483 = vperm.xlu0 %3855, %v3697_v1   ;;  %v4832_v20 = vpop.permute.xlu1 %1942  ;;  %v3693_v1 = vld [vmem:[%s6949_s7 + $0xd0] sm:$0xff]  ;;  %3662 = vmatmul.mubr.msk.f32.gmra.mrb[8].mxu1 %vm546_vm0, %v652_v62  ;;  %v3702_v62 = vld [vmem:[%s6949_s7 + $0x108] sm:$0xff] }
 0x1f2   : > { %7211 = vst [vmem:[#allocation87_spill] sm:$0xff] %v4832_v20 }
 0x1f3   : > { %1021 = vrot.lane.b32.xlu1 %v4762_v6, %s3921_s16  ;;  %v4830_v13 = vpop.permute.xlu0 %2617 }
 0x1f4   : > { %7210 = vst [vmem:[#allocation86_spill] sm:$0xff] %v4830_v13  ;;  %v7213_v13 = vmov 0.0  }
 0x1f5   : > { %1029 = vrot.lane.b32.xlu0 %v4770_v0, %s3921_s16  ;;  %822 = vmatprep.mubr.f32.mxu1 %v7213_v13  ;;  %v4848_v20 = vpop.permute.xlu1 %2087 }
 0x1f6   : > { %7214 = vst [vmem:[#allocation89_spill] sm:$0xff] %v4848_v20  ;;  %v4867_v20 = vsub.s32 1, %v875_v19 }
 0x1f7   : > { %1232 = vperm.xlu1 %3856, %v3684_v33   ;;  %v4845_v33 = vpop.permute.xlu0 %2313 }
 0x1f8   : > { %7212 = vst [vmem:[#allocation88_spill] sm:$0xff] %v4845_v33  ;;  %v1599_v33 = vld [vmem:[%s6950_s8] sm:$0xff] }
 0x1f9   : > { %1340 = vrot.lane.b32.xlu0 %v4394_v15, %s7106_s19  ;;  %v4877_v59 = vpop.permute.xlu1 %2474 }
 0x1fa   : > { %7216 = vst [vmem:[#allocation91_spill] sm:$0xff] %v4877_v59 }
 0x1fb   : > { %1348 = vrot.lane.b32.xlu1 %v4461_v43, %s7106_s19 }
 0x1fd   : > { %1401 = vperm.xlu0 %3855, %v3693_v1   ;;  %v653_v1 = vld [vmem:[%s6947_s5 + $0x28] sm:$0xff] }
 0x1fe   : > { %3663 = vmatmul.mubr.msk.f32.gmra.mrb[10].mxu1 %vm546_vm0, %v653_v1 }
 0x1ff   : > { %1512 = vrot.lane.b32.xlu1 %v4290_v44, %s7100_s21  ;;  %828 = vmatprep.mubr.f32.mxu1 %v7213_v13  ;;  %v4865_v44 = vsub.s32 0, %v875_v19 }
 0x201   : > { %1520 = vrot.lane.b32.xlu0 %v4303_v52, %s7100_s21  ;;  %v4869_v52 = vpop.permute.xlu0 %2329  ;;  %v4882_v19 = vrot.slane %v3685_v23, %v4865_v44 }
 0x202   : > { %7215 = vst [vmem:[#allocation90_spill] sm:$0xff] %v4869_v52  ;;  %3664 = vmatmul.mubr.msk.f32.gmra.mrb[12].mxu1 %vm546_vm0, %v654_v22  ;;  %v655_v22 = vld [vmem:[%s6947_s5 + $0x38] sm:$0xff] }
 0x203   : > { %1570 = vperm.xlu1 %3856, %v3702_v62   ;;  %834 = vmatprep.mubr.f32.mxu1 %v7213_v13  ;;  %7217 = vst [vmem:[#allocation92_spill] sm:$0xff] %v4882_v19  ;;  %v4885_v62 = vrot.slane %v3685_v23, %v4867_v20  ;;  %v2219_v23 = vmul.f32 %v4882_v19, %v4293_v46  ;;  %v3689_v46 = vld [vmem:[%s6949_s7 + $0xb8] sm:$0xff] }
 0x205   : > { %1605 = vperm.xlu0 %3855, %v1599_v33   ;;  %7218 = vst [vmem:[#allocation93_spill] sm:$0xff] %v4885_v62  ;;  %v4891_v1 = vpop.permute.xlu0 %938  ;;  %v4896_v33 = vpop.permute.xlu1 %2619  ;;  %v2220_v59 = vmul.f32 %v4885_v62, %v4387_v14  ;;  %v2222_v52 = vmul.f32 %v4885_v62, %v4405_v18  ;;  %v4917_v14 = vand.u32 127, %v857_v58 }
 0x206   : > { %7219 = vst [vmem:[#allocation94_spill] sm:$0xff] %v4891_v1  ;;  %7220 = vst [vmem:[#allocation95_spill] sm:$0xff] %v4896_v33  ;;  %3665 = vmatmul.mubr.msk.f32.gmra.mrb[14].mxu1 %vm546_vm0, %v655_v22  ;;  %v2221_v1 = vmul.f32 %v4882_v19, %v4330_v63  ;;  %v2223_v22 = vmul.f32 %v4882_v19, %v4465_v45  ;;  %v3670_v63 = vld [vmem:[%s6953_s11 + $0x2] sm:$0x3]  ;;  %v872_v45 = vld [vmem:[%s6953_s11] sm:$0x3]  ;;  %v4930_v33 = vmul.f32 %v4288_v42, %v2219_v23 }
 0x207   : > { %1108 = vrot.lane.b32.xlu1 %v4762_v6, %s7108_s17  ;;  %3529 = vmatprep.mubr.f32.mxu1 %v7213_v13  ;;  %v2224_v13 = vmul.f32 %v4885_v62, %v4483_v50  ;;  %v4933_v10 = vmul.f32 %v4288_v42, %v2220_v59  ;;  %vm859_vm1 = vcmp.lt.s32.totalorder %v4917_v14, 17  ;;  %vm944_vm2 = vcmp.lt.s32.totalorder %v4917_v14, 16 }
 0x208   : > { %v4939_v50 = vmul.f32 %v4297_v49, %v2221_v1  ;;  %v4945_v9 = vmul.f32 %v4400_v17, %v2223_v22  ;;  %v4951_v42 = vrot.slane %v3670_v63, %v4865_v44  ;;  %v4958_v1 = vmul.f32 %v4882_v19, %v4493_v54 }
 0x209   : > { %1116 = vrot.lane.b32.xlu0 %v4770_v0, %s7108_s17  ;;  %v4935_v58 = vpop.permute.xlu0 %1102  ;;  %v4954_v59 = vmul.f32 %v4400_v17, %v2224_v13  ;;  %v4967_v23 = vrot.slane %v872_v45, %v4865_v44  ;;  %v4970_v22 = vrot.slane %v872_v45, %v4867_v20  ;;  %v1807_v17 = vsel %vm944_vm2, %v4549_v55, %v4636_v12 }
 0x20a   : > { %7222 = vst [vmem:[#allocation97_spill] sm:$0xff] %v4935_v58  ;;  %7223 = vst [vmem:[#allocation98_spill] sm:$0xff] %v4939_v50  ;;  %v1815_v54 = vsel %vm944_vm2, %v4636_v12, %v4549_v55  ;;  %vm1031_vm3 = vcmp.lt.s32.totalorder %v4917_v14, 15  ;;  %v1663_v45 = vsel %vm859_vm1, %v4541_v48, %v4627_v28  ;;  %v1671_v19 = vsel %vm859_vm1, %v4627_v28, %v4541_v48  ;;  %v3680_v12 = vld [vmem:[%s6953_s11 + $0x6] sm:$0x3] }
 0x20b   : > { %1255 = vrot.lane.b32.xlu1 %v4661_v11, %s7104_s18  ;;  %7225 = vst [vmem:[#allocation100_spill] sm:$0xff] %v4945_v9  ;;  %7226 = vst [vmem:[#allocation101_spill] sm:$0xff] %v4954_v59  ;;  %v1960_v58 = vsel %vm1031_vm3, %v4645_v60, %v4557_v2  ;;  %vm1118_vm4 = vcmp.lt.s32.totalorder %v4917_v14, 1  ;;  %v5012_v48 = vmul.f32 %v4885_v62, %v4537_v5  ;;  %vm1267_vm5 = vcmp.lt.s32.totalorder %v4917_v14, 127 }
 0x20c   : > { %7227 = vst [vmem:[#allocation102_spill] sm:$0xff] %v4958_v1  ;;  %v1688_v5 = vmul.f32 %v1663_v45, %v4970_v22  ;;  %v5031_v62 = vrot.slane %v3680_v12, %v4867_v20  ;;  %v2097_v9 = vsel %vm1118_vm4, %v4565_v24, %v4657_v3  ;;  %v3695_v45 = vld [vmem:[%s6953_s11 + $0xc] sm:$0x3]  ;;  %vm1354_vm6 = vcmp.lt.s32.totalorder %v4917_v14, 113 }
 0x20d   : > { %1263 = vrot.lane.b32.xlu0 %v4667_v8, %s7104_s18  ;;  %7230 = vst [vmem:[#allocation105_spill] sm:$0xff] %v5012_v48  ;;  %v5078_v48 = vrot.slane %v3695_v45, %v4865_v44  ;;  %vm1441_vm7 = vcmp.lt.s32.totalorder %v4917_v14, 112  ;;  %vm1528_vm8 = vcmp.lt.s32.totalorder %v4917_v14, 111  ;;  %vm3162_vm9 = vcmp.ge.s32.totalorder %v4917_v14, 8 }
 0x20e   : > { %v4924_v18 = vpop.permute.xlu1 %991  ;;  %v2123_v50 = vmul.f32 %v2097_v9, %v5031_v62  ;;  %vm3163_vm10 = vmand %vm3162_vm9, %vm944_vm2  ;;  %vm3126_vm11 = vcmp.lt.s32.totalorder %v4917_v14, 8  ;;  %vm3243_vm12 = vcmp.ge.s32.totalorder %v4917_v14, 24  ;;  %vm3244_vm13 = vcmp.lt.s32.totalorder %v4917_v14, 32 }
 0x20f   : > { %7221 = vst [vmem:[#allocation96_spill] sm:$0xff] %v4924_v18  ;;  %1319 = vperm.xlu1 %3856, %v3689_v46   ;;  %v4942_v18 = vmul.f32 %v4297_v49, %v2222_v52  ;;  %v3698_v49 = vld [vmem:[%s6949_s7 + $0xf0] sm:$0xff]  ;;  %v3675_v52 = vld [vmem:[%s6953_s11 + $0x4] sm:$0x3]  ;;  %v4983_v46 = vrot.slane %v3670_v63, %v4867_v20  ;;  %v1952_v63 = vsel %vm1031_vm3, %v4557_v2, %v4645_v60  ;;  %v3690_v60 = vld [vmem:[%s6953_s11 + $0xa] sm:$0x3] }
 0x210   : > { %v5015_v28 = vrot.slane %v3675_v52, %v4865_v44  ;;  %v1687_v2 = vmul.f32 %v1671_v19, %v4967_v23  ;;  %v2105_v19 = vsel %vm1118_vm4, %v4657_v3, %v4565_v24  ;;  %v3694_v3 = vld [vmem:[%s6949_s7 + $0xd8] sm:$0xff]  ;;  %7233 = vst [vmem:[#allocation108_spill] sm:$0xff] %v5078_v48  ;;  %vm3245_vm14 = vmand %vm3243_vm12, %vm3244_vm13  ;;  %vm3202_vm15 = vcmp.ge.s32.totalorder %v4917_v14, 16 }
 0x211   : > { %7224 = vst [vmem:[#allocation99_spill] sm:$0xff] %v4942_v18  ;;  %1427 = vrot.lane.b32.xlu0 %v4394_v15, %s7102_s20  ;;  %v1833_v59 = vmul.f32 %v1807_v17, %v4983_v46 }
 0x212   : > { %v4980_v13 = vpop.permute.xlu1 %1110  ;;  %v1743_v1 = vmul.f32 %v4272_v34, %v1687_v2 }
 0x213   : > { %7228 = vst [vmem:[#allocation103_spill] sm:$0xff] %v4980_v13  ;;  %1435 = vrot.lane.b32.xlu1 %v4461_v43, %s7102_s20  ;;  %v1832_v13 = vmul.f32 %v1815_v54, %v4951_v42  ;;  %v1977_v54 = vmul.f32 %v1960_v58, %v5015_v28  ;;  %v5054_v58 = vrot.slane %v3690_v60, %v4865_v44 }
 0x214   : > { %v4997_v55 = vpop.permute.xlu0 %1160 }
 0x215   : > { %7229 = vst [vmem:[#allocation104_spill] sm:$0xff] %v4997_v55  ;;  %1488 = vperm.xlu0 %3855, %v3698_v49   ;;  %v5018_v55 = vrot.slane %v3675_v52, %v4867_v20  ;;  %v5028_v49 = vrot.slane %v3680_v12, %v4865_v44  ;;  %v1888_v24 = vmul.f32 %v4276_v36, %v1832_v13 }
 0x216   : > { %v5033_v52 = vpop.permute.xlu1 %1304  ;;  %v5081_v13 = vrot.slane %v3695_v45, %v4867_v20  ;;  %v1664_v45 = vsel %vm859_vm1, %v4563_v25, %v4640_v16 }
 0x217   : > { %7231 = vst [vmem:[#allocation106_spill] sm:$0xff] %v5033_v52  ;;  %v1978_v17 = vmul.f32 %v1952_v63, %v5018_v55  ;;  %1342 = vrot.lane.b32.xlu1 %v4661_v11, %s7106_s19  ;;  %v5057_v63 = vrot.slane %v3690_v60, %v4867_v20  ;;  %v1889_v52 = vmul.f32 %v4276_v36, %v1833_v59  ;;  %v3700_v36 = vld [vmem:[%s6953_s11 + $0xe] sm:$0x3] }
 0x218   : > { %v5048_v12 = vpop.permute.xlu0 %2746  ;;  %v1816_v60 = vsel %vm944_vm2, %v4652_v26, %v4571_v57  ;;  %v2122_v18 = vmul.f32 %v2105_v19, %v5028_v49  ;;  %7234 = vst [vmem:[#allocation109_spill] sm:$0xff] %v5081_v13 }
 0x219   : > { %7232 = vst [vmem:[#allocation107_spill] sm:$0xff] %v5048_v12  ;;  %1350 = vrot.lane.b32.xlu0 %v4667_v8, %s7106_s19  ;;  %v1808_v12 = vsel %vm944_vm2, %v4571_v57, %v4652_v26  ;;  %v1744_v57 = vmul.f32 %v4272_v34, %v1688_v5  ;;  %v2033_v26 = vmul.f32 %v4280_v38, %v1977_v54 }
 0x21a   : > { %v5086_v59 = vpop.permute.xlu1 %2748  ;;  %v2034_v9 = vmul.f32 %v4280_v38, %v1978_v17  ;;  %v1834_v2 = vmul.f32 %v1816_v60, %v4951_v42  ;;  %v1835_v34 = vmul.f32 %v1808_v12, %v4983_v46  ;;  %v1904_v38 = vadd.f32 %v1888_v24, %v1743_v1 }
 0x21b   : > { %7235 = vst [vmem:[#allocation110_spill] sm:$0xff] %v5086_v59  ;;  %1406 = vperm.xlu1 %3856, %v3694_v3   ;;  %v1672_v59 = vsel %vm859_vm1, %v4640_v16, %v4563_v25  ;;  %v1905_v5 = vadd.f32 %v1889_v52, %v1744_v57  ;;  %v5108_v54 = vrot.slane %v3700_v36, %v4865_v44  ;;  %v3703_v25 = vld [vmem:[%s6949_s7 + $0x110] sm:$0xff] }
 0x21c   : > { %v5092_v19 = vpop.permute.xlu0 %2762  ;;  %v5111_v17 = vrot.slane %v3700_v36, %v4867_v20  ;;  %v2178_v16 = vmul.f32 %v4284_v40, %v2122_v18  ;;  %v2179_v12 = vmul.f32 %v4284_v40, %v2123_v50  ;;  %v1953_v1 = vsel %vm1031_vm3, %v4579_v27, %v4663_v7 }
 0x21d   : > { %1514 = vrot.lane.b32.xlu0 %v4394_v15, %s7100_s21  ;;  %7236 = vst [vmem:[#allocation111_spill] sm:$0xff] %v5108_v54  ;;  %v1961_v52 = vsel %vm1031_vm3, %v4663_v7, %v4579_v27  ;;  %v2049_v24 = vadd.f32 %v2033_v26, %v1904_v38  ;;  %v2050_v60 = vadd.f32 %v2034_v9, %v1905_v5  ;;  %v1600_v26 = vld [vmem:[%s6950_s8 + $0x8] sm:$0xff]  ;;  %v7290_v15 = vld [vmem:[#allocation8_spill] sm:$0xff] }
 0x21e   : > { %7237 = vst [vmem:[#allocation112_spill] sm:$0xff] %v5111_v17  ;;  %v5126_v3 = vpop.permute.xlu1 %2764  ;;  %v1689_v36 = vmul.f32 %v1672_v59, %v4967_v23  ;;  %v1690_v18 = vmul.f32 %v1664_v45, %v4970_v22  ;;  %v1890_v50 = vmul.f32 %v4278_v37, %v1834_v2  ;;  %v1891_v57 = vmul.f32 %v4278_v37, %v1835_v34  ;;  %v3705_v59 = vld [vmem:[%s6953_s11 + $0x10] sm:$0x3] }
 0x21f   : > { %1522 = vrot.lane.b32.xlu1 %v4461_v43, %s7100_s21  ;;  %v2339_v7 = vsel %vm1267_vm5, %v4573_v29, %v4669_v51  ;;  %v2347_v27 = vsel %vm1267_vm5, %v4669_v51, %v4573_v29  ;;  %v1979_v37 = vmul.f32 %v1961_v52, %v5015_v28  ;;  %v1980_v9 = vmul.f32 %v1953_v1, %v5018_v55 }
 0x220   : > { %v5131_v40 = vpop.permute.xlu0 %2907  ;;  %v2098_v45 = vsel %vm1118_vm4, %v4590_v30, %v4678_v56  ;;  %v2106_v51 = vsel %vm1118_vm4, %v4678_v56, %v4590_v30  ;;  %v2194_v29 = vadd.f32 %v2178_v16, %v2049_v24  ;;  %v2195_v2 = vadd.f32 %v2179_v12, %v2050_v60 }
 0x221   : > { %1575 = vperm.xlu0 %3855, %v3703_v25   ;;  %v2484_v34 = vsel %vm1354_vm6, %v4581_v47, %v4680_v31  ;;  %v2492_v38 = vsel %vm1354_vm6, %v4680_v31, %v4581_v47  ;;  %v2364_v25 = vmul.f32 %v2339_v7, %v5054_v58  ;;  %v2365_v1 = vmul.f32 %v2347_v27, %v5057_v63 }
 0x222   : > { %v5169_v5 = vpop.permute.xlu1 %2912  ;;  %v5174_v30 = vrot.slane %v3705_v59, %v4865_v44  ;;  %v5177_v56 = vrot.slane %v3705_v59, %v4867_v20  ;;  %v1745_v12 = vmul.f32 %v4274_v35, %v1689_v36  ;;  %v1746_v52 = vmul.f32 %v4274_v35, %v1690_v18 }
 0x223   : > { %1610 = vperm.xlu1 %3856, %v1600_v26   ;;  %v2124_v47 = vmul.f32 %v2106_v51, %v5028_v49  ;;  %v2125_v31 = vmul.f32 %v2098_v45, %v5031_v62  ;;  %v2035_v44 = vmul.f32 %v4282_v39, %v1979_v37  ;;  %v2036_v24 = vmul.f32 %v4282_v39, %v1980_v9  ;;  %v7241_v9 = vld [vmem:[#allocation14_spill] sm:$0xff] }
 0x224   : > { %7238 = vst [vmem:[#allocation113_spill] sm:$0xff] %v5174_v30  ;;  %7239 = vst [vmem:[#allocation114_spill] sm:$0xff] %v5177_v56  ;;  %v5179_v16 = vpop.permute.xlu0 %1017  ;;  %v2509_v20 = vmul.f32 %v2484_v34, %v5078_v48  ;;  %v2510_v60 = vmul.f32 %v2492_v38, %v5081_v13  ;;  %v1906_v7 = vadd.f32 %v1890_v50, %v1745_v12  ;;  %v7242_v34 = vld [vmem:[#allocation57_spill] sm:$0xff]  ;;  %v7243_v38 = vld [vmem:[#allocation47_spill] sm:$0xff] }
 0x225   : > { %1257 = vrot.lane.b32.xlu0 %v4762_v6, %s7104_s18  ;;  %v1907_v27 = vadd.f32 %v1891_v57, %v1746_v52  ;;  %v2291_v36 = vadd.f32 %v4930_v33, %v2194_v29  ;;  %v2292_v35 = vadd.f32 %v4933_v10, %v2195_v2  ;;  %v2420_v59 = vmul.f32 %v4344_v4, %v2364_v25  ;;  %v7245_v52 = vld [vmem:[#allocation56_spill] sm:$0xff] }
 0x226   : > { %v5193_v18 = vpop.permute.xlu1 %1025  ;;  %v2421_v26 = vmul.f32 %v4344_v4, %v2365_v1  ;;  %v2629_v39 = vsel %vm1441_vm7, %v4592_v21, %v4689_v61  ;;  %v2637_v50 = vsel %vm1441_vm7, %v4689_v61, %v4592_v21  ;;  %v2180_v10 = vmul.f32 %v4286_v41, %v2124_v47  ;;  %v7246_v47 = vld [vmem:[#allocation48_spill] sm:$0xff] }
 0x227   : > { %1265 = vrot.lane.b32.xlu1 %v4770_v0, %s7104_s18  ;;  %v2181_v33 = vmul.f32 %v4286_v41, %v2125_v31  ;;  %v2340_v4 = vsel %vm1267_vm5, %v4596_v53, %v4684_v32  ;;  %v2348_v37 = vsel %vm1267_vm5, %v4684_v32, %v4596_v53  ;;  %v2051_v61 = vadd.f32 %v2035_v44, %v1906_v7  ;;  %v3699_v41 = vld [vmem:[%s6949_s7 + $0xf8] sm:$0xff]  ;;  %v7247_v7 = vld [vmem:[#allocation102_spill] sm:$0xff] }
 0x228   : > { %v5205_v57 = vpop.permute.xlu0 %1078  ;;  %v2052_v21 = vadd.f32 %v2036_v24, %v1907_v27  ;;  %v2565_v45 = vmul.f32 %v7241_v9, %v2509_v20  ;;  %v2566_v51 = vmul.f32 %v7241_v9, %v2510_v60  ;;  %v2654_v29 = vmul.f32 %v2629_v39, %v5108_v54  ;;  %v7248_v27 = vld [vmem:[#allocation21_spill] sm:$0xff] }
 0x229   : > { %7240 = vst [vmem:[#allocation115_spill] sm:$0xff] %v5205_v57  ;;  %1429 = vrot.lane.b32.xlu0 %v4661_v11, %s7102_s20  ;;  %v2655_v2 = vmul.f32 %v2637_v50, %v5111_v17  ;;  %v2774_v53 = vsel %vm1528_vm8, %v7243_v38, %v7242_v34  ;;  %v2782_v32 = vsel %vm1528_vm8, %v7242_v34, %v7243_v38  ;;  %v7249_v50 = vld [vmem:[#allocation105_spill] sm:$0xff] }
 0x22a   : > { %v5236_v25 = vpop.permute.xlu1 %1222  ;;  %v2366_v1 = vmul.f32 %v2340_v4, %v5054_v58  ;;  %v2367_v12 = vmul.f32 %v2348_v37, %v5057_v63  ;;  %v2485_v31 = vsel %vm1354_vm6, %v7246_v47, %v7245_v52  ;;  %v2493_v44 = vsel %vm1354_vm6, %v7245_v52, %v7246_v47  ;;  %v7250_v52 = vld [vmem:[#allocation18_spill] sm:$0xff] }
 0x22b   : > { %7244 = vst [vmem:[#allocation14_spill] sm:$0xff] %v5236_v25  ;;  %1437 = vrot.lane.b32.xlu1 %v4667_v8, %s7102_s20  ;;  %v2196_v20 = vadd.f32 %v2180_v10, %v2051_v61  ;;  %v2197_v60 = vadd.f32 %v2181_v33, %v2052_v21  ;;  %v5254_v39 = vmul.f32 %v7248_v27, %v7247_v7 }
 0x22c   : > { %v5248_v24 = vpop.permute.xlu0 %1391  ;;  %v5258_v4 = vmul.f32 %v7248_v27, %v7249_v50  ;;  %v2436_v37 = vadd.f32 %v2420_v59, %v2291_v36  ;;  %v2437_v9 = vadd.f32 %v2421_v26, %v2292_v35  ;;  %v2799_v34 = vmul.f32 %v2774_v53, %v5174_v30  ;;  %v7252_v50 = vld [vmem:[#allocation11_spill] sm:$0xff]  ;;  %v7254_v59 = vld [vmem:[#allocation98_spill] sm:$0xff] }
 0x22d   : > { %1493 = vperm.xlu0 %3855, %v3699_v41   ;;  %v2800_v38 = vmul.f32 %v2782_v32, %v5177_v56  ;;  %v2710_v47 = vmul.f32 %v7250_v52, %v2654_v29  ;;  %v2711_v10 = vmul.f32 %v7250_v52, %v2655_v2  ;;  %v2511_v33 = vmul.f32 %v2485_v31, %v5078_v48  ;;  %v7255_v29 = vld [vmem:[#allocation99_spill] sm:$0xff]  ;;  %v7257_v32 = vld [vmem:[#allocation65_spill] sm:$0xff] }
 0x22e   : > { %v2512_v61 = vmul.f32 %v2493_v44, %v5081_v13  ;;  %v5266_v21 = vpop.permute.xlu1 %845  ;;  %v2581_v7 = vadd.f32 %v2565_v45, %v2436_v37  ;;  %v2582_v27 = vadd.f32 %v2566_v51, %v2437_v9  ;;  %v2422_v41 = vmul.f32 %v7252_v50, %v2366_v1  ;;  %v7256_v53 = vld [vmem:[#allocation79_spill] sm:$0xff]  ;;  %v7258_v51 = vld [vmem:[#allocation22_spill] sm:$0xff]  ;;  %v7259_v44 = vld [vmem:[#allocation77_spill] sm:$0xff] }
 0x22f   : > { %7251 = vst [vmem:[#allocation57_spill] sm:$0xff] %v5266_v21  ;;  %v2423_v36 = vmul.f32 %v7252_v50, %v2367_v12  ;;  %1344 = vrot.lane.b32.xlu1 %v4762_v6, %s7106_s19  ;;  %v2293_v26 = vadd.f32 %v7254_v59, %v2196_v20  ;;  %v2294_v2 = vadd.f32 %v7255_v29, %v2197_v60  ;;  %v7260_v20 = vld [vmem:[#allocation63_spill] sm:$0xff]  ;;  %v7274_v21 = vld [vmem:[#allocation85_spill] sm:$0xff] }
 0x230   : > { %v5270_v35 = vpop.permute.xlu0 %853  ;;  %v1809_v31 = vsel %vm944_vm2, %v7257_v32, %v7256_v53  ;;  %v1817_v45 = vsel %vm944_vm2, %v7256_v53, %v7257_v32  ;;  %v2855_v1 = vmul.f32 %v7258_v51, %v2799_v34  ;;  %v2856_v12 = vmul.f32 %v7258_v51, %v2800_v38  ;;  %v7261_v50 = vld [vmem:[#allocation15_spill] sm:$0xff]  ;;  %v7263_v32 = vld [vmem:[#allocation80_spill] sm:$0xff] }
 0x231   : > { %7253 = vst [vmem:[#allocation47_spill] sm:$0xff] %v5270_v35  ;;  %1352 = vrot.lane.b32.xlu0 %v4770_v0, %s7106_s19  ;;  %v1665_v60 = vsel %vm859_vm1, %v7260_v20, %v7259_v44  ;;  %v1673_v37 = vsel %vm859_vm1, %v7259_v44, %v7260_v20  ;;  %v2726_v9 = vadd.f32 %v2710_v47, %v2581_v7  ;;  %v7264_v51 = vld [vmem:[#allocation67_spill] sm:$0xff]  ;;  %v7266_v20 = vld [vmem:[#allocation58_spill] sm:$0xff] }
 0x232   : > { %v2727_v52 = vadd.f32 %v2711_v10, %v2582_v27  ;;  %v2567_v59 = vmul.f32 %v7261_v50, %v2511_v33  ;;  %v2568_v29 = vmul.f32 %v7261_v50, %v2512_v61  ;;  %v5298_v53 = vpop.permute.xlu1 %909  ;;  %v1836_v34 = vmul.f32 %v1817_v45, %v4951_v42  ;;  %v7267_v50 = vld [vmem:[#allocation50_spill] sm:$0xff] }
 0x233   : > { %7262 = vst [vmem:[#allocation56_spill] sm:$0xff] %v5298_v53  ;;  %v1837_v38 = vmul.f32 %v1809_v31, %v4983_v46  ;;  %v1954_v57 = vsel %vm1031_vm3, %v7264_v51, %v7263_v32  ;;  %v1962_v47 = vsel %vm1031_vm3, %v7263_v32, %v7264_v51  ;;  %1516 = vrot.lane.b32.xlu1 %v4661_v11, %s7100_s21  ;;  %v3704_v31 = vld [vmem:[%s6949_s7 + $0x118] sm:$0xff]  ;;  %v7273_v53 = vld [vmem:[#allocation6_spill] sm:$0xff] }
 0x234   : > { %v5310_v10 = vpop.permute.xlu0 %932  ;;  %v2438_v33 = vadd.f32 %v2422_v41, %v2293_v26  ;;  %v2439_v61 = vadd.f32 %v2423_v36, %v2294_v2  ;;  %v1691_v7 = vmul.f32 %v1673_v37, %v4967_v23  ;;  %v1692_v27 = vmul.f32 %v1665_v60, %v4970_v22  ;;  %v1601_v26 = vld [vmem:[%s6950_s8 + $0x10] sm:$0xff]  ;;  %v7269_v60 = vld [vmem:[#allocation69_spill] sm:$0xff]  ;;  %v7275_v35 = vld [vmem:[#allocation70_spill] sm:$0xff] }
 0x235   : > { %7265 = vst [vmem:[#allocation48_spill] sm:$0xff] %v5310_v10  ;;  %1524 = vrot.lane.b32.xlu0 %v4667_v8, %s7100_s21  ;;  %v5321_v45 = vadd.f32 %v2855_v1, %v2726_v9  ;;  %v5323_v44 = vadd.f32 %v2856_v12, %v2727_v52  ;;  %v5329_v41 = vsel %vm1441_vm7, %v7267_v50, %v7266_v20  ;;  %v7268_v12 = vld [vmem:[#allocation82_spill] sm:$0xff]  ;;  %v7284_v10 = vld [vmem:[#allocation76_spill] sm:$0xff] }
 0x236   : > { %v5335_v36 = vsel %vm1441_vm7, %v7266_v20, %v7267_v50  ;;  %v1981_v2 = vmul.f32 %v1962_v47, %v5015_v28  ;;  %v1982_v1 = vmul.f32 %v1954_v57, %v5018_v55  ;;  %v2099_v37 = vsel %vm1118_vm4, %v7269_v60, %v7268_v12  ;;  %v5350_v52 = vpop.permute.xlu1 %940  ;;  %v7271_v20 = vld [vmem:[#allocation9_spill] sm:$0xff] }
 0x237   : > { %v2107_v9 = vsel %vm1118_vm4, %v7268_v12, %v7269_v60  ;;  %7270 = vst [vmem:[#allocation102_spill] sm:$0xff] %v5350_v52  ;;  %v5352_v32 = vadd.f32 %v2567_v59, %v2438_v33  ;;  %v5354_v51 = vadd.f32 %v2568_v29, %v2439_v61  ;;  %v1892_v47 = vmul.f32 %v7271_v20, %v1836_v34  ;;  %v7277_v33 = vld [vmem:[#allocation68_spill] sm:$0xff] }
 0x238   : > { %v1893_v57 = vmul.f32 %v7271_v20, %v1837_v38  ;;  %v5358_v50 = vpop.permute.xlu0 %996  ;;  %1580 = vperm.xlu1 %3856, %v3704_v31   ;;  %v1747_v8 = vmul.f32 %v7273_v53, %v1691_v7  ;;  %v1748_v11 = vmul.f32 %v7273_v53, %v1692_v27  ;;  %v1810_v12 = vsel %vm944_vm2, %v7275_v35, %v7274_v21  ;;  %v7276_v38 = vld [vmem:[#allocation83_spill] sm:$0xff]  ;;  %v7278_v7 = vld [vmem:[#allocation12_spill] sm:$0xff] }
 0x239   : > { %7272 = vst [vmem:[#allocation21_spill] sm:$0xff] %v5358_v50  ;;  %v1818_v59 = vsel %vm944_vm2, %v7274_v21, %v7275_v35  ;;  %1615 = vperm.xlu0 %3855, %v1601_v26   ;;  %v2126_v29 = vmul.f32 %v2107_v9, %v5028_v49  ;;  %v2127_v34 = vmul.f32 %v2099_v37, %v5031_v62  ;;  %v7279_v21 = vld [vmem:[#allocation87_spill] sm:$0xff]  ;;  %v7280_v35 = vld [vmem:[#allocation74_spill] sm:$0xff]  ;;  %v7283_v50 = vld [vmem:[#allocation89_spill] sm:$0xff] }
 0x23a   : > { %v1666_v53 = vsel %vm859_vm1, %v7277_v33, %v7276_v38  ;;  %v1674_v61 = vsel %vm859_vm1, %v7276_v38, %v7277_v33  ;;  %v2037_v27 = vmul.f32 %v7278_v7, %v1981_v2  ;;  %v2038_v31 = vmul.f32 %v7278_v7, %v1982_v1  ;;  %v5390_v37 = vpop.permute.xlu1 %1104 }
 0x23b   : > { %v1955_v26 = vsel %vm1031_vm3, %v7280_v35, %v7279_v21  ;;  %v1963_v60 = vsel %vm1031_vm3, %v7279_v21, %v7280_v35  ;;  %7281 = vst [vmem:[#allocation105_spill] sm:$0xff] %v5390_v37  ;;  %v1908_v9 = vadd.f32 %v1892_v47, %v1747_v8  ;;  %v1909_v20 = vadd.f32 %v1893_v57, %v1748_v11  ;;  %v7285_v8 = vld [vmem:[#allocation16_spill] sm:$0xff] }
 0x23c   : > { %v1838_v38 = vmul.f32 %v1818_v59, %v4951_v42  ;;  %v1839_v2 = vmul.f32 %v1810_v12, %v4983_v46  ;;  %v5394_v33 = vpop.permute.xlu0 %1112  ;;  %1431 = vrot.lane.b32.xlu1 %v4762_v6, %s7102_s20  ;;  %v1693_v1 = vmul.f32 %v1674_v61, %v4967_v23  ;;  %v1694_v7 = vmul.f32 %v1666_v53, %v4970_v22  ;;  %v7286_v53 = vld [vmem:[#allocation66_spill] sm:$0xff]  ;;  %v7287_v61 = vld [vmem:[#allocation64_spill] sm:$0xff] }
 0x23d   : > { %7282 = vst [vmem:[#allocation18_spill] sm:$0xff] %v5394_v33  ;;  %v2100_v21 = vsel %vm1118_vm4, %v7284_v10, %v7283_v50  ;;  %v2108_v11 = vsel %vm1118_vm4, %v7283_v50, %v7284_v10  ;;  %1439 = vrot.lane.b32.xlu0 %v4770_v0, %s7102_s20  ;;  %v2182_v47 = vmul.f32 %v7285_v8, %v2126_v29  ;;  %v7289_v29 = vld [vmem:[#allocation10_spill] sm:$0xff] }
 0x23e   : > { %v2183_v57 = vmul.f32 %v7285_v8, %v2127_v34  ;;  %v1983_v12 = vmul.f32 %v1963_v60, %v5015_v28  ;;  %v1984_v59 = vmul.f32 %v1955_v26, %v5018_v55  ;;  %v2341_v35 = vsel %vm1267_vm5, %v7287_v61, %v7286_v53  ;;  %v5422_v25 = vpop.permute.xlu1 %1165 }
 0x23f   : > { %v2349_v10 = vsel %vm1267_vm5, %v7286_v53, %v7287_v61  ;;  %v2053_v50 = vadd.f32 %v2037_v27, %v1908_v9  ;;  %v2054_v52 = vadd.f32 %v2038_v31, %v1909_v20  ;;  %7288 = vst [vmem:[#allocation11_spill] sm:$0xff] %v5422_v25  ;;  %v1894_v34 = vmul.f32 %v7289_v29, %v1838_v38  ;;  %v7291_v31 = vld [vmem:[#allocation84_spill] sm:$0xff] }
 0x240   : > { %v1895_v60 = vmul.f32 %v7289_v29, %v1839_v2  ;;  %v2128_v26 = vmul.f32 %v2108_v11, %v5028_v49  ;;  %v2129_v8 = vmul.f32 %v2100_v21, %v5031_v62  ;;  %v5428_v43 = vpop.permute.xlu0 %1251  ;;  %1518 = vrot.lane.b32.xlu1 %v4762_v6, %s7100_s21  ;;  %v1749_v37 = vmul.f32 %v7290_v15, %v1693_v1  ;;  %v7292_v9 = vld [vmem:[#allocation72_spill] sm:$0xff]  ;;  %v7302_v6 = vld [vmem:[#allocation75_spill] sm:$0xff] }
 0x241   : > { %v1750_v27 = vmul.f32 %v7290_v15, %v1694_v7  ;;  %v2486_v20 = vsel %vm1354_vm6, %v7292_v9, %v7291_v31  ;;  %v2494_v38 = vsel %vm1354_vm6, %v7291_v31, %v7292_v9  ;;  %1526 = vrot.lane.b32.xlu0 %v4770_v0, %s7100_s21  ;;  %v1602_v2 = vld [vmem:[%s6950_s8 + $0x18] sm:$0xff]  ;;  %v2198_v1 = vadd.f32 %v2182_v47, %v2053_v50  ;;  %v7293_v15 = vld [vmem:[#allocation13_spill] sm:$0xff]  ;;  %s6278_s21 = sld [smem:[#allocation2 + $0x2]] }
 0x242   : > { %v2199_v21 = vadd.f32 %v2183_v57, %v2054_v52  ;;  %v2039_v7 = vmul.f32 %v7293_v15, %v1983_v12  ;;  %v2040_v11 = vmul.f32 %v7293_v15, %v1984_v59  ;;  %v5451_v53 = vmul.f32 %v5329_v41, %v5108_v54  ;;  %v5459_v9 = vpop.permute.xlu1 %1259  ;;  %v7294_v57 = vld [vmem:[#allocation17_spill] sm:$0xff]  ;;  %v7296_v15 = vld [vmem:[#allocation90_spill] sm:$0xff]  ;;  %v7297_v0 = vld [vmem:[#allocation88_spill] sm:$0xff] }
 0x243   : > { %v5455_v61 = vmul.f32 %v5335_v36, %v5111_v17  ;;  %v2368_v29 = vmul.f32 %v2341_v35, %v5054_v58  ;;  %v2369_v31 = vmul.f32 %v2349_v10, %v5057_v63  ;;  %v1910_v47 = vadd.f32 %v1894_v34, %v1749_v37  ;;  %v7298_v10 = vld [vmem:[#allocation100_spill] sm:$0xff] }
 0x244   : > { %v1911_v52 = vadd.f32 %v1895_v60, %v1750_v27  ;;  %v2184_v12 = vmul.f32 %v7294_v57, %v2128_v26  ;;  %v2185_v59 = vmul.f32 %v7294_v57, %v2129_v8  ;;  %v5463_v50 = vpop.permute.xlu0 %1309  ;;  %1620 = vperm.xlu1 %3856, %v1602_v2   ;;  %v2513_v41 = vmul.f32 %v2486_v20, %v5078_v48  ;;  %v7299_v60 = vld [vmem:[#allocation101_spill] sm:$0xff]  ;;  %v7300_v2 = vld [vmem:[#allocation24_spill] sm:$0xff]  ;;  %v7301_v57 = vld [vmem:[#allocation86_spill] sm:$0xff] }
 0x245   : > { %7295 = vst [vmem:[#allocation98_spill] sm:$0xff] %v5463_v50  ;;  %v2514_v36 = vmul.f32 %v2494_v38, %v5081_v13  ;;  %v2342_v35 = vsel %vm1267_vm5, %v7297_v0, %v7296_v15  ;;  %v2350_v37 = vsel %vm1267_vm5, %v7296_v15, %v7297_v0  ;;  %v2295_v34 = vadd.f32 %v7298_v10, %v2198_v1  ;;  %v7306_v10 = vld [vmem:[#allocation28_spill] sm:$0xff]  ;;  %v7313_v50 = vld [vmem:[#allocation95_spill] sm:$0xff] }
 0x246   : > { %v2296_v26 = vadd.f32 %v7299_v60, %v2199_v21  ;;  %v2055_v8 = vadd.f32 %v2039_v7, %v1910_v47  ;;  %v2056_v27 = vadd.f32 %v2040_v11, %v1911_v52  ;;  %v2424_v20 = vmul.f32 %v7300_v2, %v2368_v29  ;;  %v5487_v15 = vpop.permute.xlu1 %1478  ;;  %v7305_v47 = vld [vmem:[#allocation52_spill] sm:$0xff] }
 0x247   : > { %v2425_v38 = vmul.f32 %v7300_v2, %v2369_v31  ;;  %v2631_v25 = vsel %vm1441_vm7, %v7302_v6, %v7301_v57  ;;  %v2639_v0 = vsel %vm1441_vm7, %v7301_v57, %v7302_v6  ;;  %v2370_v7 = vmul.f32 %v2342_v35, %v5054_v58  ;;  %v7304_v31 = vld [vmem:[#allocation60_spill] sm:$0xff] }
 0x248   : > { %v2200_v1 = vadd.f32 %v2184_v12, %v2055_v8  ;;  %v2201_v21 = vadd.f32 %v2185_v59, %v2056_v27  ;;  %v2371_v11 = vmul.f32 %v2350_v37, %v5057_v63  ;;  %v5491_v29 = vpop.permute.xlu0 %1019  ;;  %v2775_v52 = vsel %vm1528_vm8, %v7305_v47, %v7304_v31  ;;  %v7307_v8 = vld [vmem:[#allocation91_spill] sm:$0xff]  ;;  %v7308_v37 = vld [vmem:[#allocation78_spill] sm:$0xff] }
 0x249   : > { %7303 = vst [vmem:[#allocation99_spill] sm:$0xff] %v5491_v29  ;;  %v2783_v6 = vsel %vm1528_vm8, %v7304_v31, %v7305_v47  ;;  %v2569_v60 = vmul.f32 %v7306_v10, %v2513_v41  ;;  %v2570_v12 = vmul.f32 %v7306_v10, %v2514_v36  ;;  %v2440_v59 = vadd.f32 %v2424_v20, %v2295_v34  ;;  %v7309_v41 = vld [vmem:[#allocation107_spill] sm:$0xff]  ;;  %v7311_v47 = vld [vmem:[#allocation25_spill] sm:$0xff] }
 0x24a   : > { %v2441_v35 = vadd.f32 %v2425_v38, %v2296_v26  ;;  %v2487_v27 = vsel %vm1354_vm6, %v7308_v37, %v7307_v8  ;;  %v2495_v2 = vsel %vm1354_vm6, %v7307_v8, %v7308_v37  ;;  %v2658_v57 = vmul.f32 %v2631_v25, %v5108_v54  ;;  %v5521_v26 = vpop.permute.xlu1 %1027  ;;  %v7314_v29 = vld [vmem:[#allocation81_spill] sm:$0xff] }
 0x24b   : > { %v2659_v31 = vmul.f32 %v2639_v0, %v5111_v17  ;;  %v2776_v36 = vsel %vm1528_vm8, %v7309_v41, %v5092_v19  ;;  %v2784_v34 = vsel %vm1528_vm8, %v5092_v19, %v7309_v41  ;;  %7310 = vst [vmem:[#allocation79_spill] sm:$0xff] %v5521_v26  ;;  %v2297_v20 = vadd.f32 %v5254_v39, %v2200_v1  ;;  %v7316_v41 = vld [vmem:[#allocation110_spill] sm:$0xff]  ;;  %v7319_v26 = vld [vmem:[#allocation39_spill] sm:$0xff] }
 0x24c   : > { %v2298_v38 = vadd.f32 %v5258_v4, %v2201_v21  ;;  %v2426_v25 = vmul.f32 %v7311_v47, %v2370_v7  ;;  %v2427_v0 = vmul.f32 %v7311_v47, %v2371_v11  ;;  %v5527_v10 = vpop.permute.xlu0 %1083  ;;  %v2515_v8 = vmul.f32 %v2487_v27, %v5078_v48  ;;  %v7315_v11 = vld [vmem:[#allocation34_spill] sm:$0xff] }
 0x24d   : > { %7312 = vst [vmem:[#allocation65_spill] sm:$0xff] %v5527_v10  ;;  %v2516_v37 = vmul.f32 %v2495_v2, %v5081_v13  ;;  %v2632_v19 = vsel %vm1441_vm7, %v7314_v29, %v7313_v50  ;;  %v2640_v39 = vsel %vm1441_vm7, %v7313_v50, %v7314_v29  ;;  %v2585_v4 = vadd.f32 %v2569_v60, %v2440_v59 }
 0x24e   : > { %v2586_v1 = vadd.f32 %v2570_v12, %v2441_v35  ;;  %v2803_v21 = vmul.f32 %v2776_v36, %v5174_v30  ;;  %v2804_v7 = vmul.f32 %v2784_v34, %v5177_v56  ;;  %v2714_v27 = vmul.f32 %v7315_v11, %v2658_v57  ;;  %v5551_v29 = vpop.permute.xlu1 %1227  ;;  %v7318_v34 = vld [vmem:[#allocation29_spill] sm:$0xff] }
 0x24f   : > { %v2715_v2 = vmul.f32 %v7315_v11, %v2659_v31  ;;  %v2777_v47 = vsel %vm1528_vm8, %v7316_v41, %v5126_v3  ;;  %v2785_v50 = vsel %vm1528_vm8, %v5126_v3, %v7316_v41  ;;  %7317 = vst [vmem:[#allocation22_spill] sm:$0xff] %v5551_v29  ;;  %v2442_v60 = vadd.f32 %v2426_v25, %v2297_v20  ;;  %v7320_v25 = vld [vmem:[#allocation20_spill] sm:$0xff] }
 0x250   : > { %v2443_v12 = vadd.f32 %v2427_v0, %v2298_v38  ;;  %v2660_v59 = vmul.f32 %v2632_v19, %v5108_v54  ;;  %v2661_v35 = vmul.f32 %v2640_v39, %v5111_v17  ;;  %v5555_v57 = vpop.permute.xlu0 %1338  ;;  %v2801_v31 = vmul.f32 %v2775_v52, %v5174_v30 }
 0x251   : > { %v2802_v36 = vmul.f32 %v2783_v6, %v5177_v56  ;;  %v2571_v11 = vmul.f32 %v7318_v34, %v2515_v8  ;;  %v2572_v10 = vmul.f32 %v7318_v34, %v2516_v37  ;;  %v2859_v3 = vmul.f32 %v7319_v26, %v2803_v21  ;;  %v7321_v34 = vld [vmem:[#allocation35_spill] sm:$0xff] }
 0x252   : > { %v2860_v41 = vmul.f32 %v7319_v26, %v2804_v7  ;;  %v2805_v20 = vmul.f32 %v2777_v47, %v5174_v30  ;;  %v2806_v38 = vmul.f32 %v2785_v50, %v5177_v56  ;;  %v2712_v0 = vmul.f32 %v7320_v25, %v5451_v53  ;;  %v5569_v39 = vpop.permute.xlu1 %1346  ;;  %v7322_v47 = vld [vmem:[#allocation23_spill] sm:$0xff]  ;;  %v7323_v53 = vld [vmem:[#allocation30_spill] sm:$0xff] }
 0x253   : > { %v2713_v52 = vmul.f32 %v7320_v25, %v5455_v61  ;;  %v2730_v19 = vadd.f32 %v2714_v27, %v2585_v4  ;;  %v2731_v6 = vadd.f32 %v2715_v2, %v2586_v1  ;;  %v2587_v8 = vadd.f32 %v2571_v11, %v2442_v60  ;;  %v7326_v1 = vld [vmem:[#allocation40_spill] sm:$0xff] }
 0x254   : > { %v2588_v37 = vadd.f32 %v2572_v10, %v2443_v12  ;;  %v2716_v21 = vmul.f32 %v7321_v34, %v2660_v59  ;;  %v2717_v26 = vmul.f32 %v7321_v34, %v2661_v35  ;;  %v5573_v7 = vpop.permute.xlu0 %1396  ;;  %v2857_v50 = vmul.f32 %v7322_v47, %v2801_v31 }
 0x255   : > { %v2858_v29 = vmul.f32 %v7322_v47, %v2802_v36  ;;  %v5579_v33 = vadd.f32 %v7323_v53, %v5321_v45  ;;  %v5583_v61 = vadd.f32 %v7323_v53, %v5323_v44  ;;  %v2875_v4 = vadd.f32 %v2859_v3, %v2730_v19 }
 0x256   : > { %v2876_v10 = vadd.f32 %v2860_v41, %v2731_v6  ;;  %v2861_v27 = vmul.f32 %v7326_v1, %v2805_v20  ;;  %v2862_v2 = vmul.f32 %v7326_v1, %v2806_v38  ;;  %v2728_v60 = vadd.f32 %v2712_v0, %v5352_v32  ;;  %v5589_v59 = vpop.permute.xlu1 %1565 }
 0x257   : > { %7324 = vst [vmem:[#allocation77_spill] sm:$0xff] %v5579_v33  ;;  %7325 = vst [vmem:[#allocation63_spill] sm:$0xff] %v5583_v61  ;;  %v2729_v12 = vadd.f32 %v2713_v52, %v5354_v51  ;;  %v2732_v35 = vadd.f32 %v2716_v21, %v2587_v8  ;;  %v2733_v31 = vadd.f32 %v2717_v26, %v2588_v37 }
 0x258   : > { %v5591_v45 = vpop.permute.xlu0 %847  ;;  %v2873_v36 = vadd.f32 %v2857_v50, %v2728_v60  ;;  %v2987_v44 = vmul.f32 %v5579_v33, %v5579_v33  ;;  %v2988_v3 = vmul.f32 %v5583_v61, %v5583_v61  ;;  %v5598_v41 = vadd.f32 %v5131_v40, %v2875_v4 }
 0x259   : > { %v2874_v11 = vadd.f32 %v2858_v29, %v2729_v12  ;;  %v5601_v32 = vadd.f32 %v5131_v40, %v2876_v10  ;;  %v2877_v51 = vadd.f32 %v2861_v27, %v2732_v35  ;;  %v2878_v20 = vadd.f32 %v2862_v2, %v2733_v31  ;;  %v7329_v29 = vld [vmem:[#allocation32_spill] sm:$0xff]  ;;  %v7335_v12 = vld [vmem:[#allocation59_spill] sm:$0xff] }
 0x25a   : > { %7327 = vst [vmem:[#allocation15_spill] sm:$0xff] %v5598_v41  ;;  %v5603_v38 = vpop.permute.xlu1 %855  ;;  %v2995_v0 = vadd.f32 %v2988_v3, %v2987_v44  ;;  %v5608_v52 = vadd.f32 %v7329_v29, %v2873_v36  ;;  %v2991_v6 = vmul.f32 %v5598_v41, %v5598_v41  ;;  %v7336_v35 = vld [vmem:[#allocation44_spill] sm:$0xff]  ;;  %v7338_v44 = vld [vmem:[#allocation49_spill] sm:$0xff] }
 0x25b   : > { %7328 = vst [vmem:[#allocation80_spill] sm:$0xff] %v5601_v32  ;;  %v5611_v19 = vadd.f32 %v7329_v29, %v2874_v11  ;;  %v2992_v40 = vmul.f32 %v5601_v32, %v5601_v32  ;;  %v5618_v8 = vadd.f32 %v5169_v5, %v2877_v51  ;;  %v5621_v37 = vadd.f32 %v5169_v5, %v2878_v20  ;;  %v7337_v11 = vld [vmem:[#allocation45_spill] sm:$0xff] }
 0x25c   : > { %v5605_v25 = vpop.permute.xlu0 %934  ;;  %7330 = vst [vmem:[#allocation67_spill] sm:$0xff] %v5608_v52  ;;  %v2989_v26 = vmul.f32 %v5608_v52, %v5608_v52  ;;  %v860_v31 = vsel %vm859_vm1, %v7336_v35, %v7335_v12  ;;  %v864_v36 = vsel %vm859_vm1, %v7335_v12, %v7336_v35  ;;  %v945_v3 = vsel %vm944_vm2, %v7338_v44, %v7337_v11 }
 0x25d   : > { %7331 = vst [vmem:[#allocation58_spill] sm:$0xff] %v5611_v19  ;;  %7332 = vst [vmem:[#allocation50_spill] sm:$0xff] %v5618_v8  ;;  %v2993_v47 = vmul.f32 %v5618_v8, %v5618_v8  ;;  %v2994_v50 = vmul.f32 %v5621_v37, %v5621_v37  ;;  %v3001_v53 = vadd.f32 %v2992_v40, %v2991_v6 }
 0x25e   : > { %7333 = vst [vmem:[#allocation82_spill] sm:$0xff] %v5621_v37  ;;  %v5623_v34 = vpop.permute.xlu1 %942  ;;  %v2990_v4 = vmul.f32 %v5611_v19, %v5611_v19  ;;  %v949_v51 = vsel %vm944_vm2, %v7337_v11, %v7338_v44  ;;  %v885_v29 = vmul.f32 %v4970_v22, %v860_v31  ;;  %v1355_v19 = vsel %vm1354_vm6, %v5555_v57, %v5569_v39 }
 0x25f   : > { %v3004_v1 = vadd.f32 %v2994_v50, %v2993_v47  ;;  %v971_v40 = vmul.f32 %v4951_v42, %v949_v51  ;;  %v7340_v47 = vld [vmem:[#allocation46_spill] sm:$0xff]  ;;  %v7341_v50 = vld [vmem:[#allocation51_spill] sm:$0xff] }
 0x260   : > { %2996 = vadd.xlane.f32.xlu0 %v2995_v0  ;;  %v5625_v21 = vpop.permute.xlu0 %1106  ;;  %v2998_v27 = vadd.f32 %v2990_v4, %v2989_v26  ;;  %v884_v0 = vmul.f32 %v4967_v23, %v864_v36  ;;  %v972_v26 = vmul.f32 %v4983_v46, %v945_v3  ;;  %v1036_v4 = vsel %vm1031_vm3, %v7340_v47, %v7341_v50  ;;  %v7344_v36 = vld [vmem:[#allocation26_spill] sm:$0xff]  ;;  %v7345_v51 = vld [vmem:[#allocation27_spill] sm:$0xff] }
 0x261   : > { %v913_v44 = vmul.f32 %v7344_v36, %v885_v29  ;;  %v999_v41 = vmul.f32 %v7345_v51, %v971_v40  ;;  %v1268_v29 = vsel %vm1267_vm5, %v5428_v43, %v5459_v9  ;;  %v1272_v40 = vsel %vm1267_vm5, %v5459_v9, %v5428_v43 }
 0x262   : > { %v5635_v5 = vpop.permute.xlu1 %1114  ;;  %v912_v11 = vmul.f32 %v7344_v36, %v884_v0  ;;  %v7348_v36 = vld [vmem:[#allocation5_spill] sm:$0xff]  ;;  %v1359_v43 = vsel %vm1354_vm6, %v5569_v39, %v5555_v57  ;;  %v1381_v57 = vmul.f32 %v5078_v48, %v1355_v19 }
 0x263   : > { %v1382_v39 = vmul.f32 %v5081_v13, %v1359_v43 }
 0x264   : > { %v5637_v10 = vpop.permute.xlu0 %1170  ;;  %3002 = vadd.xlane.f32.xlu0 %v3001_v53  ;;  %v1032_v53 = vsel %vm1031_vm3, %v7341_v50, %v7340_v47  ;;  %v1000_v47 = vmul.f32 %v7345_v51, %v972_v26  ;;  %v1058_v50 = vmul.f32 %v5015_v28, %v1036_v4  ;;  %v7346_v26 = vld [vmem:[#allocation33_spill] sm:$0xff]  ;;  %v7350_v51 = vld [vmem:[#allocation7_spill] sm:$0xff] }
 0x265   : > { %7334 = vst [vmem:[#allocation69_spill] sm:$0xff] %v5637_v10  ;;  %v1059_v8 = vmul.f32 %v5018_v55, %v1032_v53 }
 0x266   : > { %v5639_v2 = vpop.permute.xlu1 %1253  ;;  %v1008_v0 = vadd.f32 %v1000_v47, %v913_v44  ;;  %v1086_v53 = vmul.f32 %v7346_v26, %v1058_v50  ;;  %v7351_v47 = vld [vmem:[#allocation93_spill] sm:$0xff]  ;;  %v1295_v50 = vmul.f32 %v5057_v63, %v1272_v40  ;;  %v7354_v40 = vld [vmem:[#allocation106_spill] sm:$0xff] }
 0x267   : > { %v1087_v4 = vmul.f32 %v7346_v26, %v1059_v8  ;;  %v1208_v33 = vmul.f32 %v7351_v47, %v7350_v51 }
 0x268   : > { %v5641_v60 = vpop.permute.xlu0 %1261  ;;  %3005 = vadd.xlane.f32.xlu0 %v3004_v1  ;;  %2999 = vadd.xlane.f32.xlu1 %v2998_v27  ;;  %v7342_v1 = vld [vmem:[#allocation103_spill] sm:$0xff]  ;;  %v7343_v27 = vld [vmem:[#allocation97_spill] sm:$0xff] }
 0x269   : > { %v1119_v12 = vsel %vm1118_vm4, %v7343_v27, %v7342_v1  ;;  %v1123_v35 = vsel %vm1118_vm4, %v7342_v1, %v7343_v27  ;;  %v1007_v27 = vadd.f32 %v999_v41, %v912_v11  ;;  %v7349_v11 = vld [vmem:[#allocation92_spill] sm:$0xff]  ;;  %v1095_v8 = vadd.f32 %v1087_v4, %v1008_v0 }
 0x26a   : > { %v5659_v20 = vpop.permute.xlu1 %1314  ;;  %v1145_v32 = vmul.f32 %v5028_v49, %v1123_v35  ;;  %v1146_v37 = vmul.f32 %v5031_v62, %v1119_v12  ;;  %v7347_v12 = vld [vmem:[#allocation38_spill] sm:$0xff]  ;;  %v1207_v44 = vmul.f32 %v7349_v11, %v7348_v36 }
 0x26b   : > { %7339 = vst [vmem:[#allocation9_spill] sm:$0xff] %v5659_v20  ;;  %v7381_v20 = vld [vmem:[#allocation96_spill] sm:$0xff] }
 0x26c   : > { %v1426_v6 = vpop.permute.xlu0 %1425  ;;  %v1173_v35 = vmul.f32 %v7347_v12, %v1145_v32  ;;  %v1174_v41 = vmul.f32 %v7347_v12, %v1146_v37  ;;  %v1094_v32 = vadd.f32 %v1086_v53, %v1007_v27  ;;  %v1294_v37 = vmul.f32 %v5054_v58, %v1268_v29  ;;  %v7353_v27 = vld [vmem:[#allocation42_spill] sm:$0xff] }
 0x26d   : > { %v1235_v0 = vmul.f32 %v7353_v27, %v1207_v44  ;;  %v1236_v29 = vmul.f32 %v7353_v27, %v1208_v33  ;;  %v1410_v44 = vmul.f32 %v5248_v24, %v1382_v39 }
 0x26e   : > { %v1434_v31 = vpop.permute.xlu1 %1433  ;;  %v1181_v51 = vadd.f32 %v1173_v35, %v1094_v32  ;;  %v1182_v61 = vadd.f32 %v1174_v41, %v1095_v8  ;;  %v1322_v4 = vmul.f32 %v7354_v40, %v1294_v37  ;;  %v1409_v41 = vmul.f32 %v5248_v24, %v1381_v57 }
 0x26f   : > { %v1442_v12 = vsel %vm1441_vm7, %v1426_v6, %v1434_v31  ;;  %v1446_v36 = vsel %vm1441_vm7, %v1434_v31, %v1426_v6 }
 0x270   : > { %v5683_v3 = vpop.permute.xlu0 %1483  ;;  %v1468_v10 = vmul.f32 %v5108_v54, %v1442_v12  ;;  %v1469_v6 = vmul.f32 %v5111_v17, %v1446_v36  ;;  %v1244_v35 = vadd.f32 %v1236_v29, %v1182_v61  ;;  %v1243_v19 = vadd.f32 %v1235_v0, %v1181_v51 }
 0x272   : > { %v5691_v1 = vpop.permute.xlu1 %1021  ;;  %v1330_v33 = vadd.f32 %v1322_v4, %v1243_v19  ;;  %v1496_v8 = vmul.f32 %v5487_v15, %v1468_v10  ;;  %v1497_v37 = vmul.f32 %v5487_v15, %v1469_v6  ;;  %v7356_v4 = vld [vmem:[#allocation94_spill] sm:$0xff]  ;;  %v7357_v6 = vld [vmem:[#allocation53_spill] sm:$0xff] }
 0x273   : > { %v950_v19 = vsel %vm944_vm2, %v7356_v4, %v7357_v6 }
 0x274   : > { %v5693_v52 = vpop.permute.xlu0 %1029  ;;  %v1417_v61 = vadd.f32 %v1409_v41, %v1330_v33 }
 0x276   : > { %v5719_v9 = vpop.permute.xlu1 %1232  ;;  %v1504_v27 = vadd.f32 %v1496_v8, %v1417_v61 }
 0x277   : > { %7352 = vst [vmem:[#allocation6_spill] sm:$0xff] %v5719_v9  ;;  %v1323_v9 = vmul.f32 %v7354_v40, %v1295_v50 }
 0x278   : > { %v5723_v26 = vpop.permute.xlu0 %1340 }
 0x279   : > { %v1331_v32 = vadd.f32 %v1323_v9, %v1244_v35  ;;  %v946_v35 = vsel %vm944_vm2, %v7357_v6, %v7356_v4  ;;  %v7365_v6 = vld [vmem:[#allocation18_spill] sm:$0xff] }
 0x27a   : > { %v5733_v53 = vpop.permute.xlu1 %1348 }
 0x27b   : > { %v1418_v51 = vadd.f32 %v1410_v44, %v1331_v32  ;;  %v7359_v44 = vld [vmem:[#allocation61_spill] sm:$0xff] }
 0x27c   : > { %v5739_v31 = vpop.permute.xlu0 %1401 }
 0x27d   : > { %7355 = vst [vmem:[#allocation85_spill] sm:$0xff] %v5739_v31  ;;  %v1505_v0 = vadd.f32 %v1497_v37, %v1418_v51 }
 0x27e   : > { %v1513_v43 = vpop.permute.xlu1 %1512 }
 0x280   : > { %v1521_v50 = vpop.permute.xlu0 %1520 }
 0x281   : > { %v1529_v12 = vsel %vm1528_vm8, %v1513_v43, %v1521_v50  ;;  %v1533_v36 = vsel %vm1528_vm8, %v1521_v50, %v1513_v43  ;;  %v7360_v43 = vld [vmem:[#allocation62_spill] sm:$0xff]  ;;  %v1037_v50 = vsel %vm1031_vm3, %v5193_v18, %v5179_v16 }
 0x282   : > { %v1555_v57 = vmul.f32 %v5174_v30, %v1529_v12  ;;  %v1556_v24 = vmul.f32 %v5177_v56, %v1533_v36  ;;  %v5751_v39 = vpop.permute.xlu1 %1570  ;;  %v861_v37 = vsel %vm859_vm1, %v7359_v44, %v7360_v43  ;;  %v973_v12 = vmul.f32 %v4951_v42, %v950_v19 }
 0x283   : > { %v974_v36 = vmul.f32 %v4983_v46, %v946_v35  ;;  %v7366_v35 = vld [vmem:[#allocation105_spill] sm:$0xff] }
 0x284   : > { %v1583_v9 = vmul.f32 %v5589_v59, %v1555_v57  ;;  %v1584_v10 = vmul.f32 %v5589_v59, %v1556_v24  ;;  %v1606_v15 = vpop.permute.xlu0 %1605  ;;  %v865_v59 = vsel %vm859_vm1, %v7360_v43, %v7359_v44  ;;  %v1120_v19 = vsel %vm1118_vm4, %v7366_v35, %v7365_v6  ;;  %v7368_v43 = vld [vmem:[#allocation36_spill] sm:$0xff] }
 0x285   : > { %v886_v57 = vmul.f32 %v4967_v23, %v865_v59  ;;  %v1124_v44 = vsel %vm1118_vm4, %v7365_v6, %v7366_v35  ;;  %v7371_v35 = vld [vmem:[#allocation31_spill] sm:$0xff] }
 0x286   : > { %v1591_v29 = vadd.f32 %v1583_v9, %v1504_v27  ;;  %v1592_v40 = vadd.f32 %v1584_v10, %v1505_v0  ;;  %v5763_v41 = vpop.permute.xlu1 %1108  ;;  %v887_v9 = vmul.f32 %v4970_v22, %v861_v37  ;;  %v1033_v10 = vsel %vm1031_vm3, %v5179_v16, %v5193_v18 }
 0x287   : > { %7358 = vst [vmem:[#allocation70_spill] sm:$0xff] %v5763_v41  ;;  %v1061_v16 = vmul.f32 %v5018_v55, %v1033_v10  ;;  %v914_v59 = vmul.f32 %v7368_v43, %v886_v57  ;;  %v1210_v10 = vmul.f32 %v7351_v47, %v7371_v35  ;;  %v7372_v57 = vld [vmem:[#allocation14_spill] sm:$0xff] }
 0x288   : > { %v5769_v33 = vadd.f32 %v1606_v15, %v1591_v29  ;;  %v5771_v32 = vadd.f32 %v1606_v15, %v1592_v40  ;;  %v5773_v8 = vpop.permute.xlu0 %1116  ;;  %v1060_v15 = vmul.f32 %v5015_v28, %v1037_v50  ;;  %v7364_v29 = vld [vmem:[#allocation37_spill] sm:$0xff]  ;;  %v915_v37 = vmul.f32 %v7368_v43, %v887_v9  ;;  %v7373_v9 = vld [vmem:[#allocation102_spill] sm:$0xff]  ;;  %v7374_v43 = vld [vmem:[#allocation48_spill] sm:$0xff] }
 0x289   : > { %7363 = vst [vmem:[#allocation12_spill] sm:$0xff] %v5773_v8  ;;  %v1001_v40 = vmul.f32 %v7364_v29, %v973_v12  ;;  %v1002_v4 = vmul.f32 %v7364_v29, %v974_v36  ;;  %v7369_v50 = vld [vmem:[#allocation41_spill] sm:$0xff]  ;;  %v1147_v29 = vmul.f32 %v5028_v49, %v1124_v44  ;;  %v951_v44 = vsel %vm944_vm2, %v7373_v9, %v7374_v43 }
 0x28a   : > { %7361 = vst [vmem:[#allocation83_spill] sm:$0xff] %v5769_v33  ;;  %7362 = vst [vmem:[#allocation68_spill] sm:$0xff] %v5771_v32  ;;  %v2951_v61 = vmul.f32 %v5769_v33, %v5769_v33  ;;  %v2952_v51 = vmul.f32 %v5771_v32, %v5771_v32  ;;  %v5790_v24 = vpop.permute.xlu1 %1255  ;;  %v1088_v12 = vmul.f32 %v7369_v50, %v1060_v15 }
 0x28b   : > { %v1148_v33 = vmul.f32 %v5031_v62, %v1120_v19  ;;  %v1009_v6 = vadd.f32 %v1001_v40, %v914_v59  ;;  %v1089_v32 = vmul.f32 %v7369_v50, %v1061_v16  ;;  %v947_v15 = vsel %vm944_vm2, %v7374_v43, %v7373_v9  ;;  %v7376_v50 = vld [vmem:[#allocation47_spill] sm:$0xff] }
 0x28c   : > { %v5798_v27 = vpop.permute.xlu0 %1263  ;;  %v2959_v0 = vadd.f32 %v2952_v51, %v2951_v61  ;;  %v7370_v61 = vld [vmem:[#allocation19_spill] sm:$0xff]  ;;  %v1269_v16 = vsel %vm1267_vm5, %v5639_v2, %v5641_v60  ;;  %v1273_v59 = vsel %vm1267_vm5, %v5641_v60, %v5639_v2  ;;  %v976_v2 = vmul.f32 %v4983_v46, %v947_v15 }
 0x28d   : > { %v1209_v51 = vmul.f32 %v7349_v11, %v7370_v61  ;;  %v1096_v40 = vadd.f32 %v1088_v12, %v1009_v6  ;;  %v7377_v61 = vld [vmem:[#allocation57_spill] sm:$0xff]  ;;  %v7378_v6 = vld [vmem:[#allocation104_spill] sm:$0xff]  ;;  %v1356_v60 = vsel %vm1354_vm6, %v5723_v26, %v5733_v53  ;;  %v1360_v9 = vsel %vm1354_vm6, %v5733_v53, %v5723_v26 }
 0x28e   : > { %2960 = vadd.xlane.f32.xlu1 %v2959_v0  ;;  %v5811_v18 = vpop.permute.xlu1 %1319  ;;  %v1010_v0 = vadd.f32 %v1002_v4, %v915_v37  ;;  %v1238_v4 = vmul.f32 %v7372_v57, %v1210_v10  ;;  %v866_v12 = vsel %vm859_vm1, %v7376_v50, %v7377_v61  ;;  %v1175_v35 = vmul.f32 %v7378_v6, %v1147_v29 }
 0x28f   : > { %7367 = vst [vmem:[#allocation87_spill] sm:$0xff] %v5811_v18  ;;  %v1237_v18 = vmul.f32 %v7372_v57, %v1209_v51  ;;  %v862_v51 = vsel %vm859_vm1, %v7377_v61, %v7376_v50  ;;  %v1176_v10 = vmul.f32 %v7378_v6, %v1148_v33  ;;  %v975_v57 = vmul.f32 %v4951_v42, %v951_v44  ;;  %v7379_v50 = vld [vmem:[#allocation99_spill] sm:$0xff] }
 0x290   : > { %v1428_v36 = vpop.permute.xlu0 %1427  ;;  %v1097_v43 = vadd.f32 %v1089_v32, %v1010_v0  ;;  %v7380_v61 = vld [vmem:[#allocation79_spill] sm:$0xff]  ;;  %v1296_v29 = vmul.f32 %v5054_v58, %v1269_v16  ;;  %v1297_v15 = vmul.f32 %v5057_v63, %v1273_v59  ;;  %v888_v6 = vmul.f32 %v4967_v23, %v866_v12 }
 0x291   : > { %v1038_v33 = vsel %vm1031_vm3, %v7380_v61, %v7379_v50  ;;  %v1183_v32 = vadd.f32 %v1175_v35, %v1096_v40  ;;  %v1383_v16 = vmul.f32 %v5078_v48, %v1356_v60  ;;  %v1384_v59 = vmul.f32 %v5081_v13, %v1360_v9 }
 0x292   : > { %v1436_v19 = vpop.permute.xlu1 %1435  ;;  %v1184_v0 = vadd.f32 %v1176_v10, %v1097_v43  ;;  %v1003_v41 = vmul.f32 %v7381_v20, %v975_v57  ;;  %v1004_v12 = vmul.f32 %v7381_v20, %v976_v2  ;;  %v1062_v8 = vmul.f32 %v5015_v28, %v1038_v33  ;;  %v7384_v57 = vld [vmem:[#allocation43_spill] sm:$0xff]  ;;  %v7385_v2 = vld [vmem:[#allocation54_spill] sm:$0xff] }
 0x293   : > { %v1443_v31 = vsel %vm1441_vm7, %v1428_v36, %v1436_v19  ;;  %v1447_v26 = vsel %vm1441_vm7, %v1436_v19, %v1428_v36  ;;  %v7382_v36 = vld [vmem:[#allocation98_spill] sm:$0xff]  ;;  %v916_v9 = vmul.f32 %v7384_v57, %v888_v6  ;;  %v1211_v43 = vmul.f32 %v7349_v11, %v7385_v2  ;;  %v7387_v6 = vld [vmem:[#allocation115_spill] sm:$0xff] }
 0x294   : > { %v5841_v37 = vpop.permute.xlu0 %1488  ;;  %v1324_v19 = vmul.f32 %v7382_v36, %v1296_v29  ;;  %v1325_v40 = vmul.f32 %v7382_v36, %v1297_v15  ;;  %v1470_v35 = vmul.f32 %v5108_v54, %v1443_v31  ;;  %v1471_v10 = vmul.f32 %v5111_v17, %v1447_v26 }
 0x295   : > { %7375 = vst [vmem:[#allocation74_spill] sm:$0xff] %v5841_v37  ;;  %v889_v37 = vmul.f32 %v4970_v22, %v862_v51  ;;  %v1034_v51 = vsel %vm1031_vm3, %v7379_v50, %v7380_v61  ;;  %v7386_v50 = vld [vmem:[#allocation55_spill] sm:$0xff]  ;;  %v1245_v29 = vadd.f32 %v1237_v18, %v1183_v32  ;;  %v1246_v13 = vadd.f32 %v1238_v4, %v1184_v0 }
 0x296   : > { %v5869_v44 = vpop.permute.xlu1 %1342  ;;  %v1212_v61 = vmul.f32 %v7351_v47, %v7386_v50  ;;  %v1411_v15 = vmul.f32 %v5573_v7, %v1383_v16  ;;  %v1412_v31 = vmul.f32 %v5573_v7, %v1384_v59  ;;  %v1011_v26 = vadd.f32 %v1003_v41, %v916_v9 }
 0x297   : > { %v917_v20 = vmul.f32 %v7384_v57, %v889_v37  ;;  %v1090_v17 = vmul.f32 %v7387_v6, %v1062_v8  ;;  %v1332_v37 = vadd.f32 %v1324_v19, %v1245_v29  ;;  %v1333_v57 = vadd.f32 %v1325_v40, %v1246_v13 }
 0x298   : > { %v5877_v53 = vpop.permute.xlu0 %1350  ;;  %v1498_v2 = vmul.f32 %v5683_v3, %v1470_v35  ;;  %v1499_v11 = vmul.f32 %v5683_v3, %v1471_v10  ;;  %v1121_v18 = vsel %vm1118_vm4, %v5625_v21, %v5635_v5  ;;  %v1125_v7 = vsel %vm1118_vm4, %v5635_v5, %v5625_v21  ;;  %v7388_v10 = vld [vmem:[#allocation22_spill] sm:$0xff] }
 0x299   : > { %v1012_v36 = vadd.f32 %v1004_v12, %v917_v20  ;;  %v1419_v3 = vadd.f32 %v1411_v15, %v1332_v37  ;;  %v1420_v4 = vadd.f32 %v1412_v31, %v1333_v57  ;;  %v867_v21 = vsel %vm859_vm1, %v5603_v38, %v5591_v45 }
 0x29a   : > { %v5892_v60 = vpop.permute.xlu1 %1406  ;;  %v948_v5 = vsel %vm944_vm2, %v5605_v25, %v5623_v34  ;;  %v952_v59 = vsel %vm944_vm2, %v5623_v34, %v5605_v25  ;;  %v1240_v9 = vmul.f32 %v7388_v10, %v1212_v61  ;;  %v1149_v20 = vmul.f32 %v5028_v49, %v1125_v7 }
 0x29b   : > { %7383 = vst [vmem:[#allocation89_spill] sm:$0xff] %v5892_v60  ;;  %v1063_v60 = vmul.f32 %v5018_v55, %v1034_v51  ;;  %v1506_v19 = vadd.f32 %v1498_v2, %v1419_v3  ;;  %v1507_v40 = vadd.f32 %v1499_v11, %v1420_v4  ;;  %v1098_v15 = vadd.f32 %v1090_v17, %v1011_v26 }
 0x29c   : > { %v1515_v33 = vpop.permute.xlu0 %1514  ;;  %v977_v25 = vmul.f32 %v4951_v42, %v952_v59  ;;  %v863_v11 = vsel %vm859_vm1, %v5591_v45, %v5603_v38  ;;  %v1035_v61 = vsel %vm1031_vm3, %v5691_v1, %v5693_v52  ;;  %v1039_v17 = vsel %vm1031_vm3, %v5693_v52, %v5691_v1  ;;  %v7389_v45 = vld [vmem:[#allocation11_spill] sm:$0xff] }
 0x29d   : > { %v1091_v16 = vmul.f32 %v7387_v6, %v1063_v60  ;;  %v1239_v60 = vmul.f32 %v7388_v10, %v1211_v43  ;;  %v978_v43 = vmul.f32 %v4983_v46, %v948_v5  ;;  %v1177_v38 = vmul.f32 %v7389_v45, %v1149_v20  ;;  %v7393_v10 = vld [vmem:[#allocation109_spill] sm:$0xff] }
 0x29e   : > { %v1523_v50 = vpop.permute.xlu1 %1522  ;;  %v1270_v2 = vsel %vm1267_vm5, %v5790_v24, %v5798_v27  ;;  %v891_v1 = vmul.f32 %v4970_v22, %v863_v11  ;;  %v1064_v3 = vmul.f32 %v5015_v28, %v1039_v17  ;;  %v1065_v4 = vmul.f32 %v5018_v55, %v1035_v61 }
 0x29f   : > { %v1530_v13 = vsel %vm1528_vm8, %v1515_v33, %v1523_v50  ;;  %v1534_v8 = vsel %vm1528_vm8, %v1523_v50, %v1515_v33  ;;  %v1150_v33 = vmul.f32 %v5031_v62, %v1121_v18  ;;  %v1099_v6 = vadd.f32 %v1091_v16, %v1012_v36  ;;  %v7390_v18 = vld [vmem:[#allocation21_spill] sm:$0xff] }
 0x2a0   : > { %v5914_v41 = vpop.permute.xlu0 %1575  ;;  %v1557_v32 = vmul.f32 %v5174_v30, %v1530_v13  ;;  %v1558_v0 = vmul.f32 %v5177_v56, %v1534_v8  ;;  %v1274_v50 = vsel %vm1267_vm5, %v5798_v27, %v5790_v24  ;;  %v1005_v7 = vmul.f32 %v7390_v18, %v977_v25  ;;  %v7394_v25 = vld [vmem:[#allocation56_spill] sm:$0xff] }
 0x2a1   : > { %v1178_v57 = vmul.f32 %v7389_v45, %v1150_v33  ;;  %v1357_v24 = vsel %vm1354_vm6, %v5869_v44, %v5877_v53  ;;  %v1361_v27 = vsel %vm1354_vm6, %v5877_v53, %v5869_v44  ;;  %v1299_v16 = vmul.f32 %v5057_v63, %v1274_v50  ;;  %v7396_v45 = vld [vmem:[#allocation9_spill] sm:$0xff] }
 0x2a2   : > { %v1585_v12 = vmul.f32 %v5751_v39, %v1557_v32  ;;  %v1586_v51 = vmul.f32 %v5751_v39, %v1558_v0  ;;  %v1611_v35 = vpop.permute.xlu1 %1610  ;;  %v890_v39 = vmul.f32 %v4967_v23, %v867_v21  ;;  %v1006_v32 = vmul.f32 %v7390_v18, %v978_v43 }
 0x2a3   : > { %v1298_v0 = vmul.f32 %v5054_v58, %v1270_v2  ;;  %v1185_v59 = vadd.f32 %v1177_v38, %v1098_v15  ;;  %v1386_v20 = vmul.f32 %v7393_v10, %v1361_v27 }
 0x2a4   : > { %v5941_v29 = vpop.permute.xlu0 %1257  ;;  %v1593_v34 = vadd.f32 %v1585_v12, %v1506_v19  ;;  %v1594_v31 = vadd.f32 %v1586_v51, %v1507_v40  ;;  %v1186_v12 = vadd.f32 %v1178_v57, %v1099_v6  ;;  %v7391_v51 = vld [vmem:[#allocation12_spill] sm:$0xff]  ;;  %v7392_v19 = vld [vmem:[#allocation70_spill] sm:$0xff]  ;;  %v7395_v6 = vld [vmem:[#allocation65_spill] sm:$0xff]  ;;  %v1327_v57 = vmul.f32 %v7396_v45, %v1299_v16 }
 0x2a5   : > { %v1122_v40 = vsel %vm1118_vm4, %v7392_v19, %v7391_v51  ;;  %v1126_v44 = vsel %vm1118_vm4, %v7391_v51, %v7392_v19  ;;  %v1092_v11 = vmul.f32 %v7395_v6, %v1064_v3  ;;  %v1093_v43 = vmul.f32 %v7395_v6, %v1065_v4  ;;  %v7399_v51 = vld [vmem:[#allocation71_spill] sm:$0xff]  ;;  %v7401_v16 = vld [vmem:[#allocation73_spill] sm:$0xff] }
 0x2a6   : > { %v5958_v26 = vadd.f32 %v1611_v35, %v1593_v34  ;;  %v5960_v36 = vadd.f32 %v1611_v35, %v1594_v31  ;;  %v1266_v37 = vpop.permute.xlu1 %1265  ;;  %v1385_v35 = vmul.f32 %v5078_v48, %v1357_v24  ;;  %v918_v34 = vmul.f32 %v7394_v25, %v890_v39  ;;  %v7397_v39 = vld [vmem:[#allocation112_spill] sm:$0xff]  ;;  %v7398_v24 = vld [vmem:[#allocation85_spill] sm:$0xff] }
 0x2a7   : > { %v919_v31 = vmul.f32 %v7394_v25, %v891_v1  ;;  %v1151_v61 = vmul.f32 %v5028_v49, %v1126_v44  ;;  %v1152_v17 = vmul.f32 %v5031_v62, %v1122_v40  ;;  %v1326_v38 = vmul.f32 %v7396_v45, %v1298_v0  ;;  %v7400_v0 = vld [vmem:[#allocation92_spill] sm:$0xff] }
 0x2a8   : > { %v1430_v52 = vpop.permute.xlu0 %1429  ;;  %v2953_v13 = vmul.f32 %v5958_v26, %v5958_v26  ;;  %v2954_v8 = vmul.f32 %v5960_v36, %v5960_v36  ;;  %v1013_v50 = vadd.f32 %v1005_v7, %v918_v34  ;;  %v1248_v3 = vadd.f32 %v1240_v9, %v1186_v12  ;;  %v7403_v12 = vld [vmem:[#allocation74_spill] sm:$0xff] }
 0x2a9   : > { %v1413_v4 = vmul.f32 %v7398_v24, %v1385_v35  ;;  %v1414_v27 = vmul.f32 %v7398_v24, %v1386_v20  ;;  %v1213_v19 = vmul.f32 %v7400_v0, %v7399_v51  ;;  %v1214_v7 = vmul.f32 %v7351_v47, %v7401_v16  ;;  %v7404_v24 = vld [vmem:[#allocation6_spill] sm:$0xff]  ;;  %v7405_v16 = vld [vmem:[#allocation87_spill] sm:$0xff] }
 0x2aa   : > { %v1438_v21 = vpop.permute.xlu1 %1437  ;;  %v2962_v5 = vadd.f32 %v2954_v8, %v2953_v13  ;;  %v1247_v8 = vadd.f32 %v1239_v60, %v1185_v59  ;;  %v1271_v9 = vsel %vm1267_vm5, %v5941_v29, %v1266_v37  ;;  %v1275_v59 = vsel %vm1267_vm5, %v1266_v37, %v5941_v29 }
 0x2ab   : > { %v1444_v33 = vsel %vm1441_vm7, %v1430_v52, %v1438_v21  ;;  %v1448_v15 = vsel %vm1441_vm7, %v1438_v21, %v1430_v52  ;;  %v1014_v52 = vadd.f32 %v1006_v32, %v919_v31  ;;  %v1100_v21 = vadd.f32 %v1092_v11, %v1013_v50  ;;  %v7402_v32 = vld [vmem:[#allocation69_spill] sm:$0xff] }
 0x2ac   : > { %v5999_v53 = vpop.permute.xlu0 %1493  ;;  %2963 = vadd.xlane.f32.xlu0 %v2962_v5  ;;  %v1472_v18 = vmul.f32 %v5108_v54, %v1444_v33  ;;  %v1473_v13 = vmul.f32 %v7397_v39, %v1448_v15  ;;  %v1179_v40 = vmul.f32 %v7402_v32, %v1151_v61  ;;  %v1180_v44 = vmul.f32 %v7402_v32, %v1152_v17 }
 0x2ad   : > { %v1101_v5 = vadd.f32 %v1093_v43, %v1014_v52  ;;  %v1334_v33 = vadd.f32 %v1326_v38, %v1247_v8  ;;  %v1335_v15 = vadd.f32 %v1327_v57, %v1248_v3  ;;  %v1300_v38 = vmul.f32 %v5054_v58, %v1271_v9 }
 0x2ae   : > { %v1345_v2 = vpop.permute.xlu1 %1344  ;;  %v1500_v35 = vmul.f32 %v7403_v12, %v1472_v18  ;;  %v1501_v20 = vmul.f32 %v7403_v12, %v1473_v13  ;;  %v1187_v17 = vadd.f32 %v1179_v40, %v1100_v21  ;;  %v1301_v57 = vmul.f32 %v5057_v63, %v1275_v59 }
 0x2af   : > { %v1421_v34 = vadd.f32 %v1413_v4, %v1334_v33  ;;  %v1422_v31 = vadd.f32 %v1414_v27, %v1335_v15  ;;  %v1188_v45 = vadd.f32 %v1180_v44, %v1101_v5  ;;  %v1242_v27 = vmul.f32 %v7404_v24, %v1214_v7 }
 0x2b0   : > { %v1353_v1 = vpop.permute.xlu0 %1352  ;;  %v1328_v32 = vmul.f32 %v7405_v16, %v1300_v38 }
 0x2b1   : > { %v1358_v43 = vsel %vm1354_vm6, %v1345_v2, %v1353_v1  ;;  %v1362_v61 = vsel %vm1354_vm6, %v1353_v1, %v1345_v2  ;;  %v1508_v8 = vadd.f32 %v1500_v35, %v1421_v34  ;;  %v1509_v3 = vadd.f32 %v1501_v20, %v1422_v31 }
 0x2b2   : > { %v1517_v60 = vpop.permute.xlu1 %1516  ;;  %v1241_v2 = vmul.f32 %v7404_v24, %v1213_v19  ;;  %v1387_v1 = vmul.f32 %v5078_v48, %v1358_v43  ;;  %v1388_v4 = vmul.f32 %v7393_v10, %v1362_v61  ;;  %v1250_v44 = vadd.f32 %v1242_v27, %v1188_v45 }
 0x2b4   : > { %v1525_v25 = vpop.permute.xlu0 %1524  ;;  %v1249_v51 = vadd.f32 %v1241_v2, %v1187_v17 }
 0x2b5   : > { %v1531_v6 = vsel %vm1528_vm8, %v1517_v60, %v1525_v25  ;;  %v1535_v11 = vsel %vm1528_vm8, %v1525_v25, %v1517_v60  ;;  %v7406_v60 = vld [vmem:[#allocation89_spill] sm:$0xff] }
 0x2b6   : > { %v1559_v29 = vmul.f32 %v5174_v30, %v1531_v6  ;;  %v1560_v37 = vmul.f32 %v5177_v56, %v1535_v11  ;;  %v1415_v9 = vmul.f32 %v7406_v60, %v1387_v1  ;;  %v1416_v59 = vmul.f32 %v7406_v60, %v1388_v4 }
 0x2b7   : > { %v1581_v50 = vpop.permute.xlu1 %1580  ;;  %v1336_v31 = vadd.f32 %v1328_v32, %v1249_v51 }
 0x2b8   : > { %v1587_v52 = vmul.f32 %v5914_v41, %v1559_v29  ;;  %v1588_v18 = vmul.f32 %v5914_v41, %v1560_v37  ;;  %v1616_v13 = vpop.permute.xlu0 %1615  ;;  %v1329_v41 = vmul.f32 %v7405_v16, %v1301_v57 }
 0x2b9   : > { %v1423_v38 = vadd.f32 %v1415_v9, %v1336_v31  ;;  %v3710_v31 = vld [vmem:[%s6951_s9 + $0x60] sm:$0xff] }
 0x2ba   : > { %v1595_v21 = vadd.f32 %v1587_v52, %v1508_v8  ;;  %v1596_v5 = vadd.f32 %v1588_v18, %v1509_v3  ;;  %v1337_v11 = vadd.f32 %v1329_v41, %v1250_v44 }
 0x2bb   : > { %v1432_v40 = vpop.permute.xlu1 %1431 }
 0x2bc   : > { %v6053_v33 = vadd.f32 %v1616_v13, %v1595_v21  ;;  %v6055_v15 = vadd.f32 %v1616_v13, %v1596_v5  ;;  %v1440_v19 = vpop.permute.xlu0 %1439  ;;  %v1424_v57 = vadd.f32 %v1416_v59, %v1337_v11  ;;  %v1684_v59 = vld [vmem:[%s6951_s9 + $0x28] sm:$0xff]  ;;  %v3718_v11 = vld [vmem:[%s6951_s9 + $0xa0] sm:$0xff] }
 0x2bd   : > { %v1445_v7 = vsel %vm1441_vm7, %v1432_v40, %v1440_v19  ;;  %v1449_v12 = vsel %vm1441_vm7, %v1440_v19, %v1432_v40  ;;  %v662_v40 = vld [vmem:[%s6948_s6 + $0x30] sm:$0xff]  ;;  %v663_v19 = vld [vmem:[%s6948_s6 + $0x38] sm:$0xff] }
 0x2be   : > { %v2955_v35 = vmul.f32 %v6053_v33, %v6053_v33  ;;  %v2956_v20 = vmul.f32 %v6055_v15, %v6055_v15  ;;  %v1474_v25 = vmul.f32 %v5108_v54, %v1445_v7  ;;  %v1475_v34 = vmul.f32 %v7397_v39, %v1449_v12 }
 0x2bf   : > { %v1519_v6 = vpop.permute.xlu1 %1518 }
 0x2c0   : > { %v1502_v43 = vmul.f32 %v5999_v53, %v1474_v25  ;;  %v1503_v61 = vmul.f32 %v5999_v53, %v1475_v34  ;;  %v1527_v29 = vpop.permute.xlu0 %1526  ;;  %v2965_v37 = vadd.f32 %v2956_v20, %v2955_v35  ;;  %v3711_v35 = vld [vmem:[%s6951_s9 + $0x68] sm:$0xff]  ;;  %v1683_v34 = vld [vmem:[%s6951_s9 + $0x20] sm:$0xff] }
 0x2c1   : > { %v1532_v17 = vsel %vm1528_vm8, %v1519_v6, %v1527_v29  ;;  %v1536_v45 = vsel %vm1528_vm8, %v1527_v29, %v1519_v6  ;;  %v661_v20 = vld [vmem:[%s6948_s6 + $0x28] sm:$0xff] }
 0x2c2   : > { %v1561_v52 = vmul.f32 %v5174_v30, %v1532_v17  ;;  %v1562_v18 = vmul.f32 %v5177_v56, %v1536_v45  ;;  %2966 = vadd.xlane.f32.xlu1 %v2965_v37  ;;  %v1510_v3 = vadd.f32 %v1502_v43, %v1423_v38  ;;  %v1511_v24 = vadd.f32 %v1503_v61, %v1424_v57  ;;  %v3719_v25 = vld [vmem:[%s6951_s9 + $0xa8] sm:$0xff] }
 0x2c3   : > { %v1621_v1 = vpop.permute.xlu1 %1620 }
 0x2c4   : > { %v1589_v13 = vmul.f32 %v1581_v50, %v1561_v52  ;;  %v1590_v8 = vmul.f32 %v1581_v50, %v1562_v18  ;;  %v660_v50 = vld [vmem:[%s6948_s6 + $0x20] sm:$0xff]  ;;  %v6088_v16 = vpop.f32.mrb[8].mxu1 }
 0x2c5   : > { %v6090_v32 = vpop.f32.mrb[9].mxu1 }
 0x2c6   : > { %v1597_v53 = vadd.f32 %v1589_v13, %v1510_v3  ;;  %v1598_v2 = vadd.f32 %v1590_v8, %v1511_v24  ;;  %v7407_v8 = vld [vmem:[#allocation63_spill] sm:$0xff]  ;;  %v7408_v24 = vld [vmem:[#allocation58_spill] sm:$0xff] }
 0x2c8   : > { %v6077_v4 = vadd.f32 %v1621_v1, %v1597_v53  ;;  %v6079_v27 = vadd.f32 %v1621_v1, %v1598_v2  ;;  %v7409_v2 = vld [vmem:[#allocation77_spill] sm:$0xff] }
 0x2ca   : > { %v2957_v21 = vmul.f32 %v6077_v4, %v6077_v4  ;;  %v2958_v5 = vmul.f32 %v6079_v27, %v6079_v27 }
 0x2cc   : > { %v2968_v51 = vadd.f32 %v2958_v5, %v2957_v21  ;;  %v7410_v21 = vld [vmem:[#allocation67_spill] sm:$0xff] }
 0x2ce   : > { %2969 = vadd.xlane.f32.xlu0 %v2968_v51  ;;  %v7411_v51 = vld [vmem:[#allocation82_spill] sm:$0xff] }
 0x2d1   : > { %v6095_v44 = vpop.f32.mrb[10].mxu1 }
 0x2d2   : > { %v6097_v41 = vpop.f32.mrb[11].mxu1 }
 0x2d3   : > { %686 = vperm.xlu1 %3856, %v660_v50  }
 0x2d5   : > { %v6102_v60 = vpop.f32.mrb[12].mxu1 }
 0x2d6   : > { %v6104_v9 = vpop.f32.mrb[13].mxu1 }
 0x2d7   : > { %696 = vperm.xlu1 %3856, %v662_v40  }
 0x2d9   : > { %v6109_v7 = vpop.f32.mrb[14].mxu1 }
 0x2da   : > { %v6111_v12 = vpop.f32.mrb[15].mxu1 }
 0x2db   : > { %701 = vperm.xlu1 %3856, %v663_v19  }
 0x2df   : > { %1730 = vperm.xlu1 %3856, %v1684_v59   ;;  %v7412_v59 = vld [vmem:[#allocation80_spill] sm:$0xff] }
 0x2e3   : > { %1875 = vperm.xlu1 %3856, %v3711_v35  }
 0x2e4   : > { %691 = vperm.xlu0 %3855, %v661_v20  }
 0x2e7   : > { %2020 = vperm.xlu1 %3856, %v3719_v25   ;;  %v7413_v25 = vld [vmem:[#allocation50_spill] sm:$0xff] }
 0x2e8   : > { %1725 = vperm.xlu0 %3855, %v1683_v34  }
 0x2ec   : > { %1870 = vperm.xlu0 %3855, %v3710_v31   ;;  %v7414_v31 = vld [vmem:[#allocation15_spill] sm:$0xff] }
 0x2ed   : > { %v2997_v6 = vpop.xlane.xlu0 %2996 }
 0x2ee   : > { %v3007_v61 = vmax.f32 %v2997_v6, 1e-24 }
 0x2f0   : > { %2015 = vperm.xlu0 %3855, %v3718_v11   ;;  %3857 = vrsqrt.f32 %v3007_v61 }
 0x2f1   : > { %v3003_v43 = vpop.xlane.xlu0 %3002 }
 0x2f2   : > { %v3009_v29 = vmax.f32 %v3003_v43, 1e-24 }
 0x2f4   : > { %3859 = vrsqrt.f32 %v3009_v29 }
 0x2f5   : > { %v3006_v37 = vpop.xlane.xlu0 %3005  ;;  %v3000_v17 = vpop.xlane.xlu1 %2999 }
 0x2f6   : > { %v3010_v45 = vmax.f32 %v3006_v37, 1e-24  ;;  %v3008_v38 = vmax.f32 %v3000_v17, 1e-24  ;;  %v7415_v37 = vld [vmem:[#allocation68_spill] sm:$0xff] }
 0x2f8   : > { %3861 = vrsqrt.f32 %v3010_v45  ;;  %v7416_v45 = vld [vmem:[#allocation83_spill] sm:$0xff] }
 0x2f9   : > { %3863 = vrsqrt.f32 %v3008_v38 }
 0x2fa   : > { %v3858_v57 = vpop.eup %3857 }
 0x2fb   : > { %v3016_v3 = vmul.f32 %v3858_v57, %v7407_v8  ;;  %v3015_v1 = vmul.f32 %v3858_v57, %v7409_v2 }
 0x2fe   : > { %v3860_v52 = vpop.eup %3859 }
 0x2ff   : > { %v3020_v35 = vmul.f32 %v3860_v52, %v7412_v59  ;;  %v3019_v6 = vmul.f32 %v3860_v52, %v7414_v31 }
 0x302   : > { %v3862_v18 = vpop.eup %3861 }
 0x303   : > { %v3864_v13 = vpop.eup %3863  ;;  %v3022_v50 = vmul.f32 %v3862_v18, %v7411_v51  ;;  %v3021_v34 = vmul.f32 %v3862_v18, %v7413_v25  ;;  %v3734_v25 = vld [vmem:[%s6951_s9 + $0x120] sm:$0xff] }
 0x304   : > { %v3018_v53 = vmul.f32 %v3864_v13, %v7408_v24  ;;  %v3017_v5 = vmul.f32 %v3864_v13, %v7410_v21 }
 0x305   : > { %v3806_v20 = vpack.c.bf16 %v3022_v50, %v3020_v35  ;;  %v3808_v11 = vpack.c.bf16 %v3021_v34, %v3019_v6  ;;  %v3726_v35 = vld [vmem:[%s6951_s9 + $0xe0] sm:$0xff] }
 0x306   : > { %v3802_v40 = vpack.c.bf16 %v3018_v53, %v3016_v3  ;;  %v3804_v19 = vpack.c.bf16 %v3017_v5, %v3015_v1 }
 0x308   : > { %3803 = vmatprep.subr.bf16.mxu0 %v3802_v40 }
 0x309   : > { %3805 = vmatpush1.bf16.xpose.msra.mxu0 %v3804_v19 }
 0x30a   : > { %3807 = vmatprep.subr.bf16.mxu0 %v3806_v20  ;;  %v3727_v20 = vld [vmem:[%s6951_s9 + $0xe8] sm:$0xff] }
 0x311   : > { %3809 = vmatpush1.bf16.xpose.msra.mxu0 %v3808_v11  ;;  %v3735_v11 = vld [vmem:[%s6951_s9 + $0x128] sm:$0xff] }
 0x31b   : > { %v2961_v43 = vpop.xlane.xlu1 %2960 }
 0x31c   : > { %v2971_v61 = vmax.f32 %v2961_v43, 1e-24 }
 0x31e   : > { %3865 = vrsqrt.f32 %v2971_v61 }
 0x328   : > { %v3866_v29 = vpop.eup %3865 }
 0x329   : > { %v2980_v17 = vmul.f32 %v3866_v29, %v7415_v37  ;;  %v2979_v38 = vmul.f32 %v3866_v29, %v7416_v45  ;;  %v3742_v29 = vld [vmem:[%s6951_s9 + $0x160] sm:$0xff]  ;;  %v3729_v37 = vld [vmem:[%s6951_s9 + $0xf8] sm:$0xff]  ;;  %v3743_v45 = vld [vmem:[%s6951_s9 + $0x168] sm:$0xff] }
 0x32b   : > { %3087 = vmatprep.mubr.f32.mxu0 %v2980_v17  ;;  %v3750_v17 = vld [vmem:[%s6951_s9 + $0x1a0] sm:$0xff] }
 0x32c   : > { %3088 = vmatmul.mubr.f32.vlgmr.msra.gmra.mrb[8].mxu0 %v2979_v38 }
 0x339   : > { %v2964_v57 = vpop.xlane.xlu0 %2963 }
 0x33a   : > { %v2972_v13 = vmax.f32 %v2964_v57, 1e-24  ;;  %v3744_v57 = vld [vmem:[%s6951_s9 + $0x170] sm:$0xff] }
 0x33c   : > { %3867 = vrsqrt.f32 %v2972_v13  ;;  %v7111_v13 = vstv %s6268_s24 }
 0x346   : > { %v3868_v8 = vpop.eup %3867 }
 0x347   : > { %v2982_v18 = vmul.f32 %v3868_v8, %v5960_v36  ;;  %v2981_v52 = vmul.f32 %v3868_v8, %v5958_v26  ;;  %v1685_v26 = vld [vmem:[%s6951_s9 + $0x30] sm:$0xff] }
 0x349   : > { %3092 = vmatprep.mubr.f32.mxu0 %v2982_v18  ;;  %v6291_v18 = vmul.f32 0.0, %v7111_v13 }
 0x34a   : > { %3093 = vmatmul.mubr.f32.gmra.mrb[10].mxu0 %v2981_v52  ;;  %v7110_v52 = vstv %s6270_s25 }
 0x34f   : > { %v2967_v3 = vpop.xlane.xlu1 %2966 }
 0x350   : > { %v2973_v24 = vmax.f32 %v2967_v3, 1e-24 }
 0x352   : > { %3869 = vrsqrt.f32 %v2973_v24  ;;  %v7112_v24 = vstv %s6278_s21 }
 0x353   : > { %v687_v53 = vpop.permute.xlu1 %686 }
 0x354   : > { %v6144_v2 = vadd.f32 %v6088_v16, %v687_v53  ;;  %v6149_v1 = vadd.f32 %v6090_v32, %v687_v53  ;;  %v6303_v53 = vmul.f32 0.0, %v7110_v52 }
 0x356   : > { %1639 = vrot.lane.b32.xlu0 %v6144_v2, %s3919_s27 }
 0x357   : > { %v697_v34 = vpop.permute.xlu1 %696 }
 0x358   : > { %v6205_v31 = vadd.f32 %v6102_v60, %v697_v34  ;;  %v6212_v6 = vadd.f32 %v6104_v9, %v697_v34  ;;  %v3721_v60 = vld [vmem:[%s6951_s9 + $0xb8] sm:$0xff] }
 0x35a   : > { %1655 = vrot.lane.b32.xlu0 %v6149_v1, %s3919_s27 }
 0x35b   : > { %v2970_v36 = vpop.xlane.xlu0 %2969  ;;  %v702_v9 = vpop.permute.xlu1 %701 }
 0x35c   : > { %v3870_v21 = vpop.eup %3869  ;;  %v2974_v5 = vmax.f32 %v2970_v36, 1e-24  ;;  %v6229_v43 = vadd.f32 %v6109_v7, %v702_v9  ;;  %v6236_v61 = vadd.f32 %v6111_v12, %v702_v9  ;;  %v3728_v7 = vld [vmem:[%s6951_s9 + $0xf0] sm:$0xff] }
 0x35d   : > { %v2984_v51 = vmul.f32 %v3870_v21, %v6055_v15  ;;  %v2983_v16 = vmul.f32 %v3870_v21, %v6053_v33  ;;  %v3712_v33 = vld [vmem:[%s6951_s9 + $0x70] sm:$0xff]  ;;  %v3753_v21 = vld [vmem:[%s6951_s9 + $0x1b8] sm:$0xff] }
 0x35e   : > { %3871 = vrsqrt.f32 %v2974_v5  ;;  %1735 = vperm.xlu0 %3855, %v1685_v26   ;;  %7418 = vst [vmem:[#allocation76_spill] sm:$0xff] %v6229_v43  ;;  %7419 = vst [vmem:[#allocation16_spill] sm:$0xff] %v6236_v61  ;;  %v3736_v12 = vld [vmem:[%s6951_s9 + $0x130] sm:$0xff]  ;;  %v3737_v5 = vld [vmem:[%s6951_s9 + $0x138] sm:$0xff] }
 0x35f   : > { %3097 = vmatprep.mubr.f32.mxu0 %v2984_v51  ;;  %v3767_v51 = vld [vmem:[%s6951_s9 + $0x228] sm:$0xff] }
 0x360   : > { %3098 = vmatmul.mubr.f32.gmra.mrb[12].mxu0 %v2983_v16  ;;  %v3751_v16 = vld [vmem:[%s6951_s9 + $0x1a8] sm:$0xff] }
 0x362   : > { %1783 = vrot.lane.b32.xlu0 %v6144_v2, %s3920_s28 }
 0x363   : > { %v692_v32 = vpop.permute.xlu0 %691 }
 0x364   : > { %v6161_v50 = vadd.f32 %v6095_v44, %v692_v32  ;;  %v6171_v40 = vadd.f32 %v6097_v41, %v692_v32  ;;  %v1686_v44 = vld [vmem:[%s6951_s9 + $0x38] sm:$0xff]  ;;  %v7417_v41 = vmov 0.0  }
 0x366   : > { %1641 = vrot.lane.b32.xlu1 %v6161_v50, %s3919_s27  ;;  %1799 = vrot.lane.b32.xlu0 %v6149_v1, %s3920_s28 }
 0x367   : > { %v1726_v32 = vpop.permute.xlu0 %1725 }
 0x368   : > { %v3872_v15 = vpop.eup %3871 }
 0x369   : > { %v2986_v19 = vmul.f32 %v3872_v15, %v6079_v27  ;;  %v2985_v59 = vmul.f32 %v3872_v15, %v6077_v4  ;;  %v3713_v4 = vld [vmem:[%s6951_s9 + $0x78] sm:$0xff]  ;;  %v3720_v27 = vld [vmem:[%s6951_s9 + $0xb0] sm:$0xff] }
 0x36a   : > { %1657 = vrot.lane.b32.xlu1 %v6171_v40, %s3919_s27  ;;  %1880 = vperm.xlu0 %3855, %v3712_v33  }
 0x36b   : > { %3102 = vmatprep.mubr.f32.mxu0 %v2986_v19  ;;  %v1871_v33 = vpop.permute.xlu0 %1870  ;;  %v6347_v19 = vpop.permute.xlu1 %1730 }
 0x36c   : > { %3103 = vmatmul.mubr.f32.gmra.mrb[14].mxu0 %v2985_v59 }
 0x36d   : > { %3400 = vmatprep.mubr.f32.mxu0 %v7417_v41 }
 0x36e   : > { %1740 = vperm.xlu1 %3856, %v1686_v44   ;;  %2160 = vperm.xlu0 %3855, %v3726_v35  }
 0x36f   : > { %v2016_v15 = vpop.permute.xlu0 %2015  ;;  %v6353_v44 = vpop.permute.xlu1 %1875 }
 0x372   : > { %1785 = vrot.lane.b32.xlu1 %v6161_v50, %s3920_s28  ;;  %1928 = vrot.lane.b32.xlu0 %v6144_v2, %s3921_s16 }
 0x376   : > { %1801 = vrot.lane.b32.xlu1 %v6171_v40, %s3920_s28  ;;  %1944 = vrot.lane.b32.xlu0 %v6149_v1, %s3921_s16 }
 0x37a   : > { %1885 = vperm.xlu1 %3856, %v3713_v4   ;;  %2025 = vperm.xlu0 %3855, %v3720_v27   ;;  %v6365_v27 = vpop.permute.xlu1 %2020 }
 0x37e   : > { %2165 = vperm.xlu1 %3856, %v3727_v20   ;;  %2257 = vperm.xlu0 %3855, %v3734_v25   ;;  %v3760_v20 = vld [vmem:[%s6951_s9 + $0x1f0] sm:$0xff]  ;;  %v3745_v25 = vld [vmem:[%s6951_s9 + $0x178] sm:$0xff] }
 0x382   : > { %1930 = vrot.lane.b32.xlu1 %v6161_v50, %s3921_s16  ;;  %1643 = vrot.lane.b32.xlu0 %v6205_v31, %s3919_s27 }
 0x386   : > { %1946 = vrot.lane.b32.xlu1 %v6171_v40, %s3921_s16  ;;  %1659 = vrot.lane.b32.xlu0 %v6212_v6, %s3919_s27 }
 0x38a   : > { %2030 = vperm.xlu1 %3856, %v3721_v60   ;;  %1787 = vrot.lane.b32.xlu0 %v6205_v31, %s3920_s28 }
 0x38e   : > { %2262 = vperm.xlu1 %3856, %v3735_v11   ;;  %1803 = vrot.lane.b32.xlu0 %v6212_v6, %s3920_s28  ;;  %v3758_v11 = vld [vmem:[%s6951_s9 + $0x1e0] sm:$0xff] }
 0x392   : > { %2073 = vrot.lane.b32.xlu0 %v6144_v2, %s7108_s17  ;;  %1645 = vrot.lane.b32.xlu1 %v6229_v43, %s3919_s27 }
 0x396   : > { %2089 = vrot.lane.b32.xlu0 %v6149_v1, %s7108_s17  ;;  %1661 = vrot.lane.b32.xlu1 %v6236_v61, %s3919_s27  ;;  %s6256_s27 = sld [smem:[#allocation2 + $0x1]] }
 0x39a   : > { %2170 = vperm.xlu0 %3855, %v3728_v7   ;;  %1789 = vrot.lane.b32.xlu1 %v6229_v43, %s3920_s28  ;;  %v3759_v7 = vld [vmem:[%s6951_s9 + $0x1e8] sm:$0xff] }
 0x39c   : > { %v7113_v38 = vstv %s6256_s27  ;;  %v7425_v56 = vstv %s6256_s27 }
 0x39d   : > { %v6287_v8 = vmul.f32 0.0, %v7113_v38  ;;  %v3187_v30 = vadd.f32 %v7425_v56, %v6291_v18 }
 0x39e   : > { %2402 = vperm.xlu0 %3855, %v3742_v29   ;;  %1805 = vrot.lane.b32.xlu1 %v6236_v61, %s3920_s28  ;;  %s7420_s28 = smov 113  }
 0x39f   : > { %v6298_v3 = vadd.f32 %v6287_v8, %v6291_v18 }
 0x3a1   : > { %v3229_v36 = vadd.f32 %v7112_v24, %v6298_v3 }
 0x3a2   : > { %1932 = vrot.lane.b32.xlu0 %v6205_v31, %s3921_s16  ;;  %2075 = vrot.lane.b32.xlu1 %v6161_v50, %s7108_s17 }
 0x3a3   : > { %v6313_v26 = vadd.f32 %v6303_v53, %v3229_v36 }
 0x3a6   : > { %1948 = vrot.lane.b32.xlu0 %v6212_v6, %s3921_s16  ;;  %2091 = vrot.lane.b32.xlu1 %v6171_v40, %s7108_s17  ;;  %s7423_s17 = smov 112  }
 0x3aa   : > { %2267 = vperm.xlu0 %3855, %v3736_v12   ;;  %2175 = vperm.xlu1 %3856, %v3729_v37  }
 0x3ae   : > { %2547 = vperm.xlu0 %3855, %v3750_v17   ;;  %2407 = vperm.xlu1 %3856, %v3743_v45  }
 0x3b2   : > { %2412 = vperm.xlu0 %3855, %v3744_v57   ;;  %1934 = vrot.lane.b32.xlu1 %v6229_v43, %s3921_s16 }
 0x3b6   : > { %2478 = vrot.lane.b32.xlu0 %v6171_v40, %s7420_s28  ;;  %1950 = vrot.lane.b32.xlu1 %v6236_v61, %s3921_s16  ;;  %s7421_s16 = smov 127  }
 0x3ba   : > { %2562 = vperm.xlu0 %3855, %v3753_v21   ;;  %2272 = vperm.xlu1 %3856, %v3737_v5  }
 0x3be   : > { %2842 = vperm.xlu0 %3855, %v3767_v51   ;;  %2552 = vperm.xlu1 %3856, %v3751_v16  }
 0x3c2   : > { %2319 = vrot.lane.b32.xlu0 %v6205_v31, %s7421_s16  ;;  %2077 = vrot.lane.b32.xlu1 %v6205_v31, %s7422_s30 }
 0x3c6   : > { %2321 = vrot.lane.b32.xlu0 %v6229_v43, %s7421_s16  ;;  %2079 = vrot.lane.b32.xlu1 %v6229_v43, %s7422_s30 }
 0x3c8   : > { %v1640_v59 = vpop.permute.xlu0 %1639 }
 0x3ca   : > { %2335 = vrot.lane.b32.xlu0 %v6212_v6, %s7421_s16  ;;  %2093 = vrot.lane.b32.xlu1 %v6212_v6, %s7422_s30 }
 0x3cc   : > { %v1656_v35 = vpop.permute.xlu0 %1655 }
 0x3cd   : > { %v1667_v36 = vsel %vm859_vm1, %v1640_v59, %v1656_v35  ;;  %v1675_v21 = vsel %vm859_vm1, %v1656_v35, %v1640_v59 }
 0x3ce   : > { %2337 = vrot.lane.b32.xlu0 %v6236_v61, %s7421_s16  ;;  %2095 = vrot.lane.b32.xlu1 %v6236_v61, %s7422_s30 }
 0x3d2   : > { %2605 = vrot.lane.b32.xlu0 %v6144_v2, %s7423_s17  ;;  %2315 = vrot.lane.b32.xlu1 %v6144_v2, %s7421_s16 }
 0x3d6   : > { %2607 = vrot.lane.b32.xlu0 %v6161_v50, %s7423_s17  ;;  %2317 = vrot.lane.b32.xlu1 %v6161_v50, %s7421_s16 }
 0x3d8   : > { %v6373_v60 = vpop.permute.xlu1 %1641 }
 0x3da   : > { %2621 = vrot.lane.b32.xlu0 %v6149_v1, %s7423_s17  ;;  %2331 = vrot.lane.b32.xlu1 %v6149_v1, %s7421_s16 }
 0x3dc   : > { %v6383_v29 = vpop.permute.xlu1 %1657 }
 0x3dd   : > { %v6359_v4 = vpop.permute.xlu0 %1735 }
 0x3de   : > { %2623 = vrot.lane.b32.xlu0 %v6171_v40, %s7423_s17  ;;  %2333 = vrot.lane.b32.xlu1 %v6171_v40, %s7421_s16 }
 0x3e1   : > { %v1784_v34 = vpop.permute.xlu0 %1783 }
 0x3e2   : > { %2702 = vperm.xlu0 %3855, %v3760_v20   ;;  %2417 = vperm.xlu1 %3856, %v3745_v25   ;;  %v1695_v25 = vmul.f32 %v1675_v21, %v4967_v23 }
 0x3e5   : > { %v1800_v9 = vpop.permute.xlu0 %1799 }
 0x3e6   : > { %2464 = vrot.lane.b32.xlu0 %v6205_v31, %s7420_s28  ;;  %2692 = vperm.xlu1 %3856, %v3758_v11   ;;  %v1811_v45 = vsel %vm944_vm2, %v1784_v34, %v1800_v9  ;;  %v1819_v57 = vsel %vm944_vm2, %v1800_v9, %v1784_v34  ;;  %v1696_v34 = vmul.f32 %v1667_v36, %v4970_v22 }
 0x3e7   : > { %v1840_v5 = vmul.f32 %v1819_v57, %v4951_v42  ;;  %v1841_v51 = vmul.f32 %v1811_v45, %v4983_v46  ;;  %v1751_v57 = vmul.f32 %v1726_v32, %v1695_v25 }
 0x3e8   : > { %v1752_v52 = vmul.f32 %v1726_v32, %v1696_v34  ;;  %v3766_v34 = vld [vmem:[%s6951_s9 + $0x220] sm:$0xff] }
 0x3e9   : > { %v6385_v12 = vpop.permute.xlu0 %1880  ;;  %v1896_v11 = vmul.f32 %v1871_v33, %v1840_v5  ;;  %v1897_v9 = vmul.f32 %v1871_v33, %v1841_v51  ;;  %v3752_v33 = vld [vmem:[%s6951_s9 + $0x1b0] sm:$0xff] }
 0x3ea   : > { %2466 = vrot.lane.b32.xlu0 %v6229_v43, %s7420_s28  ;;  %2697 = vperm.xlu1 %3856, %v3759_v7  }
 0x3eb   : > { %v1912_v5 = vadd.f32 %v1896_v11, %v1751_v57  ;;  %v1913_v51 = vadd.f32 %v1897_v9, %v1752_v52 }
 0x3ed   : > { %v6389_v37 = vpop.permute.xlu0 %2160  ;;  %v6391_v17 = vpop.permute.xlu1 %1740 }
 0x3ee   : > { %2480 = vrot.lane.b32.xlu0 %v6212_v6, %s7420_s28  ;;  %2460 = vrot.lane.b32.xlu1 %v6144_v2, %s7420_s28 }
 0x3f1   : > { %v1929_v16 = vpop.permute.xlu0 %1928  ;;  %v6407_v20 = vpop.permute.xlu1 %1785 }
 0x3f2   : > { %2482 = vrot.lane.b32.xlu0 %v6236_v61, %s7420_s28  ;;  %2462 = vrot.lane.b32.xlu1 %v6161_v50, %s7420_s28  ;;  %v7426_v61 = vstv %s6278_s21  ;;  %s501_s21 = scalar_lea.vmem %s6956_s14, %s4046_s15 }
 0x3f3   : > { %v6479_v43 = vmul.f32 0.0, %v7426_v61 }
 0x3f5   : > { %v1945_v59 = vpop.permute.xlu0 %1944  ;;  %v6415_v35 = vpop.permute.xlu1 %1801 }
 0x3f6   : > { %v1956_v7 = vsel %vm1031_vm3, %v1929_v16, %v1945_v59  ;;  %v1964_v45 = vsel %vm1031_vm3, %v1945_v59, %v1929_v16  ;;  %2750 = vrot.lane.b32.xlu0 %v6144_v2, %s7424_s26  ;;  %2476 = vrot.lane.b32.xlu1 %v6149_v1, %s7420_s28 }
 0x3f7   : > { %v1985_v21 = vmul.f32 %v1964_v45, %v5015_v28  ;;  %v1986_v36 = vmul.f32 %v1956_v7, %v5018_v55  ;;  %v3761_v7 = vld [vmem:[%s6951_s9 + $0x1f8] sm:$0xff] }
 0x3f9   : > { %v2041_v13 = vmul.f32 %v2016_v15, %v1985_v21  ;;  %v2042_v16 = vmul.f32 %v2016_v15, %v1986_v36  ;;  %v6430_v59 = vpop.permute.xlu0 %2025  ;;  %v6432_v24 = vpop.permute.xlu1 %1885 }
 0x3fa   : > { %2766 = vrot.lane.b32.xlu0 %v6149_v1, %s7424_s26  ;;  %2557 = vperm.xlu1 %3856, %v3752_v33  }
 0x3fb   : > { %v6436_v32 = vadd.f32 %v2041_v13, %v1912_v5  ;;  %v6438_v25 = vadd.f32 %v2042_v16, %v1913_v51 }
 0x3fd   : > { %v2258_v11 = vpop.permute.xlu0 %2257  ;;  %v6443_v52 = vpop.permute.xlu1 %2165 }
 0x3fe   : > { %2837 = vperm.xlu1 %3856, %v3766_v34  }
 0x3ff   : > { %v6445_v15 = vpop.f32.mrb[8].mxu0 }
 0x400   : > { %v3091_v9 = vpop.f32.mrb[9].mxu0 }
 0x401   : > { %v1644_v13 = vpop.permute.xlu0 %1643  ;;  %v1931_v45 = vpop.permute.xlu1 %1930 }
 0x402   : > { %2707 = vperm.xlu1 %3856, %v3761_v7  }
 0x405   : > { %v1660_v57 = vpop.permute.xlu0 %1659  ;;  %v1947_v21 = vpop.permute.xlu1 %1946 }
 0x406   : > { %v1669_v36 = vsel %vm859_vm1, %v1644_v13, %v1660_v57  ;;  %v1677_v33 = vsel %vm859_vm1, %v1660_v57, %v1644_v13  ;;  %2752 = vrot.lane.b32.xlu1 %v6161_v50, %s7424_s26 }
 0x407   : > { %v1699_v16 = vmul.f32 %v1677_v33, %v4967_v23  ;;  %v1700_v34 = vmul.f32 %v1669_v36, %v4970_v22 }
 0x409   : > { %v1788_v5 = vpop.permute.xlu0 %1787  ;;  %v6456_v51 = vpop.permute.xlu1 %2030  ;;  %v1755_v33 = vmul.f32 %v6359_v4, %v1699_v16  ;;  %v1756_v36 = vmul.f32 %v6359_v4, %v1700_v34  ;;  %v3228_v4 = vadd.f32 %v6479_v43, %v3187_v30 }
 0x40a   : > { %2768 = vrot.lane.b32.xlu1 %v6171_v40, %s7424_s26 }
 0x40d   : > { %v1804_v9 = vpop.permute.xlu0 %1803  ;;  %v6462_v7 = vpop.permute.xlu1 %2262 }
 0x40e   : > { %v1813_v13 = vsel %vm944_vm2, %v1788_v5, %v1804_v9  ;;  %v1821_v57 = vsel %vm944_vm2, %v1804_v9, %v1788_v5 }
 0x40f   : > { %v1844_v38 = vmul.f32 %v1821_v57, %v4951_v42  ;;  %v1845_v41 = vmul.f32 %v1813_v13, %v4983_v46  ;;  %v7427_v13 = vstv %s6268_s24 }
 0x410   : > { %v3186_v56 = vadd.f32 %v6287_v8, %v7427_v13 }
 0x411   : > { %v1900_v10 = vmul.f32 %v6385_v12, %v1844_v38  ;;  %v1901_v48 = vmul.f32 %v6385_v12, %v1845_v41  ;;  %v2074_v39 = vpop.permute.xlu0 %2073  ;;  %v1646_v54 = vpop.permute.xlu1 %1645  ;;  %v2228_v12 = vmul.f32 %v7351_v47, %v6149_v1  ;;  %v1676_v1 = vsel %vm859_vm1, %v6383_v29, %v6373_v60 }
 0x412   : > { %v3227_v34 = vadd.f32 %v6479_v43, %v3186_v56 }
 0x413   : > { %v6481_v5 = vadd.f32 %v1900_v10, %v1755_v33  ;;  %v6483_v9 = vadd.f32 %v1901_v48, %v1756_v36  ;;  %v1820_v10 = vsel %vm944_vm2, %v6415_v35, %v6407_v20 }
 0x415   : > { %v2090_v18 = vpop.permute.xlu0 %2089  ;;  %v1662_v16 = vpop.permute.xlu1 %1661 }
 0x416   : > { %v2101_v38 = vsel %vm1118_vm4, %v2074_v39, %v2090_v18  ;;  %v2109_v41 = vsel %vm1118_vm4, %v2090_v18, %v2074_v39  ;;  %v1670_v61 = vsel %vm859_vm1, %v1646_v54, %v1662_v16  ;;  %v1678_v48 = vsel %vm859_vm1, %v1662_v16, %v1646_v54 }
 0x417   : > { %v2130_v8 = vmul.f32 %v2109_v41, %v5028_v49  ;;  %v2131_v30 = vmul.f32 %v2101_v38, %v5031_v62  ;;  %v2227_v39 = vmul.f32 %v7400_v0, %v6144_v2  ;;  %v1812_v54 = vsel %vm944_vm2, %v6407_v20, %v6415_v35 }
 0x418   : > { %v3269_v18 = vadd.f32 %v6303_v53, %v3228_v4  ;;  %v1668_v2 = vsel %vm859_vm1, %v6373_v60, %v6383_v29  ;;  %v1842_v20 = vmul.f32 %v1820_v10, %v4951_v42  ;;  %v2284_v35 = vmul.f32 %v2258_v11, %v2228_v12 }
 0x419   : > { %v2186_v57 = vmul.f32 %v6389_v37, %v2130_v8  ;;  %v2187_v33 = vmul.f32 %v6389_v37, %v2131_v30  ;;  %v6514_v36 = vpop.permute.xlu0 %2170  ;;  %v1790_v13 = vpop.permute.xlu1 %1789  ;;  %v2283_v37 = vmul.f32 %v2258_v11, %v2227_v39  ;;  %v1843_v4 = vmul.f32 %v1812_v54, %v4983_v46 }
 0x41a   : > { %v3268_v38 = vadd.f32 %v6303_v53, %v3227_v34  ;;  %v1957_v41 = vsel %vm1031_vm3, %v1931_v45, %v1947_v21  ;;  %v1701_v8 = vmul.f32 %v1678_v48, %v4967_v23  ;;  %v1965_v60 = vsel %vm1031_vm3, %v1947_v21, %v1931_v45 }
 0x41b   : > { %v2202_v56 = vadd.f32 %v2186_v57, %v6436_v32  ;;  %v2203_v16 = vadd.f32 %v2187_v33, %v6438_v25  ;;  %v1702_v29 = vmul.f32 %v1670_v61, %v4970_v22  ;;  %v1697_v30 = vmul.f32 %v1676_v1, %v4967_v23 }
 0x41c   : > { %v1698_v53 = vmul.f32 %v1668_v2, %v4970_v22  ;;  %v1898_v21 = vmul.f32 %v6353_v44, %v1842_v20  ;;  %v1899_v34 = vmul.f32 %v6353_v44, %v1843_v4  ;;  %v1987_v54 = vmul.f32 %v1965_v60, %v5015_v28 }
 0x41d   : > { %v6537_v10 = vpop.permute.xlu0 %2402  ;;  %v1806_v11 = vpop.permute.xlu1 %1805  ;;  %v6539_v32 = vadd.f32 %v2283_v37, %v2202_v56  ;;  %v6541_v25 = vadd.f32 %v2284_v35, %v2203_v16  ;;  %v1988_v57 = vmul.f32 %v1957_v41, %v5018_v55  ;;  %v1757_v33 = vmul.f32 %v6391_v17, %v1701_v8 }
 0x41e   : > { %v1814_v12 = vsel %vm944_vm2, %v1790_v13, %v1806_v11  ;;  %v1822_v48 = vsel %vm944_vm2, %v1806_v11, %v1790_v13  ;;  %v3094_v45 = vpop.f32.mrb[10].mxu0  ;;  %v1758_v13 = vmul.f32 %v6391_v17, %v1702_v29  ;;  %v1753_v44 = vmul.f32 %v6347_v19, %v1697_v30 }
 0x41f   : > { %v1846_v61 = vmul.f32 %v1822_v48, %v4951_v42  ;;  %v1847_v23 = vmul.f32 %v1814_v12, %v4983_v46  ;;  %v3273_v39 = vmul.f32 %v3269_v18, %v3094_v45  ;;  %v3096_v22 = vpop.f32.mrb[11].mxu0  ;;  %v1754_v37 = vmul.f32 %v6347_v19, %v1698_v53 }
 0x420   : > { %v2043_v17 = vmul.f32 %v6365_v27, %v1987_v54  ;;  %v2044_v16 = vmul.f32 %v6365_v27, %v1988_v57  ;;  %v1914_v4 = vadd.f32 %v1898_v21, %v1753_v44  ;;  %v3272_v41 = vmul.f32 %v3268_v38, %v6445_v15 }
 0x421   : > { %v1902_v2 = vmul.f32 %v6432_v24, %v1846_v61  ;;  %v1903_v1 = vmul.f32 %v6432_v24, %v1847_v23  ;;  %v6563_v20 = vsel %vm3163_vm10, %v3273_v39, -1e+30  ;;  %v1933_v42 = vpop.permute.xlu0 %1932  ;;  %v2076_v46 = vpop.permute.xlu1 %2075  ;;  %v1915_v24 = vadd.f32 %v1899_v34, %v1754_v37 }
 0x422   : > { %v3283_v18 = vsel %vm546_vm0, %v6563_v20, -inf  ;;  %v2059_v12 = vadd.f32 %v2043_v17, %v1914_v4  ;;  %v2229_v45 = vmul.f32 %v7400_v0, %v6161_v50  ;;  %v2230_v21 = vmul.f32 %v7351_v47, %v6171_v40 }
 0x423   : > { %v1918_v35 = vadd.f32 %v1902_v2, %v1757_v33  ;;  %v1919_v56 = vadd.f32 %v1903_v1, %v1758_v13  ;;  %3284 = vmax.xlane.f32.xlu0 %v3283_v18  ;;  %v2060_v48 = vadd.f32 %v2044_v16, %v1915_v24  ;;  %v6599_v57 = vsel %vm3126_vm11, %v3272_v41, -1e+30  ;;  %v3768_v41 = vld [vmem:[%s6951_s9 + $0x230] sm:$0xff] }
 0x424   : > { %v2285_v50 = vmul.f32 %v6462_v7, %v2229_v45  ;;  %v2286_v40 = vmul.f32 %v6462_v7, %v2230_v21  ;;  %v3280_v18 = vsel %vm546_vm0, %v6599_v57, -inf  ;;  %vm3203_vm1 = vcmp.lt.s32.totalorder %v4917_v14, 24 }
 0x425   : > { %v1949_v8 = vpop.permute.xlu0 %1948  ;;  %v2092_v60 = vpop.permute.xlu1 %2091  ;;  %vm3204_vm2 = vmand %vm3202_vm15, %vm3203_vm1 }
 0x426   : > { %v1958_v29 = vsel %vm1031_vm3, %v1933_v42, %v1949_v8  ;;  %v1966_v19 = vsel %vm1031_vm3, %v1949_v8, %v1933_v42  ;;  %v2102_v11 = vsel %vm1118_vm4, %v2076_v46, %v2092_v60  ;;  %v2110_v27 = vsel %vm1118_vm4, %v2092_v60, %v2076_v46 }
 0x427   : > { %v1989_v30 = vmul.f32 %v1966_v19, %v5015_v28  ;;  %v1990_v53 = vmul.f32 %v1958_v29, %v5018_v55  ;;  %v2132_v15 = vmul.f32 %v2110_v27, %v5028_v49  ;;  %v2133_v38 = vmul.f32 %v2102_v11, %v5031_v62 }
 0x429   : > { %v2045_v61 = vmul.f32 %v6430_v59, %v1989_v30  ;;  %v2046_v23 = vmul.f32 %v6430_v59, %v1990_v53  ;;  %v2188_v39 = vmul.f32 %v6443_v52, %v2132_v15  ;;  %v2189_v22 = vmul.f32 %v6443_v52, %v2133_v38  ;;  %v6593_v34 = vpop.permute.xlu0 %2267  ;;  %v6595_v54 = vpop.permute.xlu1 %2175 }
 0x42b   : > { %v6604_v33 = vadd.f32 %v2045_v61, %v6481_v5  ;;  %v6607_v59 = vadd.f32 %v2046_v23, %v6483_v9  ;;  %v2204_v13 = vadd.f32 %v2188_v39, %v2059_v12  ;;  %v2205_v52 = vadd.f32 %v2189_v22, %v2060_v48 }
 0x42d   : > { %v6609_v2 = vpop.permute.xlu0 %2547  ;;  %v6611_v1 = vpop.permute.xlu1 %2407  ;;  %v6613_v42 = vadd.f32 %v2285_v50, %v2204_v13  ;;  %v6615_v46 = vadd.f32 %v2286_v40, %v2205_v52  ;;  %v2231_v52 = vmul.f32 %v7400_v0, %v6205_v31 }
 0x42e   : > { %3281 = vmax.xlane.f32.xlu1 %v3280_v18  ;;  %v7428_v18 = vstv %s6270_s25 }
 0x431   : > { %v2413_v7 = vpop.permute.xlu0 %2412  ;;  %v1935_v5 = vpop.permute.xlu1 %1934 }
 0x433   : > { %v3099_v44 = vpop.f32.mrb[12].mxu0 }
 0x434   : > { %v6620_v9 = vmul.f32 %v6313_v26, %v3099_v44  ;;  %v3101_v37 = vpop.f32.mrb[13].mxu0 }
 0x435   : > { %v6622_v17 = vpop.permute.xlu0 %2478  ;;  %v1951_v16 = vpop.permute.xlu1 %1950 }
 0x436   : > { %v1959_v4 = vsel %vm1031_vm3, %v1935_v5, %v1951_v16  ;;  %v1967_v24 = vsel %vm1031_vm3, %v1951_v16, %v1935_v5 }
 0x437   : > { %v1991_v8 = vmul.f32 %v1967_v24, %v5015_v28  ;;  %v1992_v60 = vmul.f32 %v1959_v4, %v5018_v55  ;;  %v3769_v28 = vld [vmem:[%s6951_s9 + $0x238] sm:$0xff] }
 0x439   : > { %v2047_v26 = vmul.f32 %v6456_v51, %v1991_v8  ;;  %v2048_v29 = vmul.f32 %v6456_v51, %v1992_v60  ;;  %v6635_v19 = vpop.permute.xlu0 %2562  ;;  %v2273_v11 = vpop.permute.xlu1 %2272  ;;  %2847 = vperm.xlu0 %3855, %v3768_v41  }
 0x43b   : > { %v2063_v27 = vadd.f32 %v2047_v26, %v1918_v35  ;;  %v2064_v30 = vadd.f32 %v2048_v29, %v1919_v56  ;;  %v3230_v35 = vadd.f32 %v6479_v43, %v6298_v3  ;;  %v2232_v56 = vmul.f32 %v7351_v47, %v6212_v6 }
 0x43d   : > { %v6637_v53 = vpop.permute.xlu0 %2842  ;;  %v6639_v15 = vpop.permute.xlu1 %2552  ;;  %v3271_v5 = vadd.f32 %v7428_v18, %v3230_v35 }
 0x43f   : > { %v3104_v38 = vpop.f32.mrb[14].mxu0  ;;  %2852 = vperm.xlu1 %3856, %v3769_v28   ;;  %v2288_v28 = vmul.f32 %v6593_v34, %v2232_v56 }
 0x440   : > { %v3106_v55 = vpop.f32.mrb[15].mxu0 }
 0x441   : > { %v2320_v12 = vpop.permute.xlu0 %2319  ;;  %v2078_v48 = vpop.permute.xlu1 %2077 }
 0x445   : > { %v2322_v51 = vpop.permute.xlu0 %2321  ;;  %v2080_v45 = vpop.permute.xlu1 %2079 }
 0x449   : > { %v2336_v21 = vpop.permute.xlu0 %2335  ;;  %v2094_v61 = vpop.permute.xlu1 %2093 }
 0x44a   : > { %v2345_v23 = vsel %vm1267_vm5, %v2320_v12, %v2336_v21  ;;  %v2353_v39 = vsel %vm1267_vm5, %v2336_v21, %v2320_v12  ;;  %v2103_v22 = vsel %vm1118_vm4, %v2078_v48, %v2094_v61  ;;  %v2111_v50 = vsel %vm1118_vm4, %v2094_v61, %v2078_v48 }
 0x44b   : > { %v2376_v40 = vmul.f32 %v2345_v23, %v5054_v58  ;;  %v2377_v43 = vmul.f32 %v2353_v39, %v5057_v63  ;;  %v2134_v3 = vmul.f32 %v2111_v50, %v5028_v49  ;;  %v2135_v13 = vmul.f32 %v2103_v22, %v5031_v62 }
 0x44c   : > { %v3275_v12 = vmul.f32 %v3271_v5, %v3104_v38 }
 0x44d   : > { %v2432_v44 = vmul.f32 %v2413_v7, %v2376_v40  ;;  %v2433_v37 = vmul.f32 %v2413_v7, %v2377_v43  ;;  %v2190_v16 = vmul.f32 %v6514_v36, %v2134_v3  ;;  %v2191_v4 = vmul.f32 %v6514_v36, %v2135_v13  ;;  %v2338_v24 = vpop.permute.xlu0 %2337  ;;  %v2096_v41 = vpop.permute.xlu1 %2095 }
 0x44e   : > { %v2346_v8 = vsel %vm1267_vm5, %v2322_v51, %v2338_v24  ;;  %v2354_v60 = vsel %vm1267_vm5, %v2338_v24, %v2322_v51  ;;  %v2104_v26 = vsel %vm1118_vm4, %v2080_v45, %v2096_v41  ;;  %v2112_v29 = vsel %vm1118_vm4, %v2096_v41, %v2080_v45  ;;  %v7429_v51 = vld [vmem:[#allocation76_spill] sm:$0xff] }
 0x44f   : > { %v2287_v7 = vmul.f32 %v6593_v34, %v2231_v52  ;;  %v2206_v36 = vadd.f32 %v2190_v16, %v6604_v33  ;;  %v2207_v55 = vadd.f32 %v2191_v4, %v6607_v59  ;;  %v2136_v48 = vmul.f32 %v2112_v29, %v5028_v49  ;;  %v7430_v33 = vld [vmem:[#allocation16_spill] sm:$0xff] }
 0x450   : > { %v2137_v35 = vmul.f32 %v2104_v26, %v5031_v62  ;;  %v2233_v21 = vmul.f32 %v7400_v0, %v7429_v51  ;;  %v2234_v59 = vmul.f32 %v7351_v47, %v7430_v33  ;;  %v6696_v22 = vsel %vm3245_vm14, %v3275_v12, -1e+30 }
 0x451   : > { %v2606_v45 = vpop.permute.xlu0 %2605  ;;  %v2316_v61 = vpop.permute.xlu1 %2315  ;;  %v2303_v34 = vadd.f32 %v2287_v7, %v2206_v36  ;;  %v2304_v56 = vadd.f32 %v2288_v28, %v2207_v55  ;;  %v2192_v38 = vmul.f32 %v6595_v54, %v2136_v48  ;;  %v3289_v47 = vsel %vm546_vm0, %v6696_v22, -inf }
 0x452   : > { %v2193_v49 = vmul.f32 %v6595_v54, %v2137_v35  ;;  %v2289_v62 = vmul.f32 %v2273_v11, %v2233_v21  ;;  %v2290_v39 = vmul.f32 %v2273_v11, %v2234_v59  ;;  %v6723_v36 = vsel %vm3204_vm2, %v6620_v9, -1e+30  ;;  %v7431_v59 = vld [vmem:[#allocation111_spill] sm:$0xff] }
 0x453   : > { %v6692_v23 = vadd.f32 %v2432_v44, %v2303_v34  ;;  %v6694_v0 = vadd.f32 %v2433_v37, %v2304_v56  ;;  %v2208_v50 = vadd.f32 %v2192_v38, %v2063_v27  ;;  %v2378_v12 = vmul.f32 %v2346_v8, %v5054_v58  ;;  %v7432_v38 = vld [vmem:[#allocation112_spill] sm:$0xff] }
 0x454   : > { %v2209_v40 = vadd.f32 %v2193_v49, %v2064_v30  ;;  %v2379_v48 = vmul.f32 %v2354_v60, %v5057_v63  ;;  %v3286_v8 = vsel %vm546_vm0, %v6723_v36, -inf }
 0x455   : > { %v2608_v43 = vpop.permute.xlu0 %2607  ;;  %v2318_v3 = vpop.permute.xlu1 %2317  ;;  %v2305_v13 = vadd.f32 %v2289_v62, %v2208_v50 }
 0x456   : > { %v2306_v52 = vadd.f32 %v2290_v39, %v2209_v40 }
 0x458   : > { %3290 = vmax.xlane.f32.xlu0 %v3289_v47 }
 0x459   : > { %v2622_v54 = vpop.permute.xlu0 %2621  ;;  %v2332_v18 = vpop.permute.xlu1 %2331 }
 0x45a   : > { %v2633_v11 = vsel %vm1441_vm7, %v2606_v45, %v2622_v54  ;;  %v2641_v27 = vsel %vm1441_vm7, %v2622_v54, %v2606_v45  ;;  %v2343_v30 = vsel %vm1267_vm5, %v2316_v61, %v2332_v18  ;;  %v2351_v5 = vsel %vm1267_vm5, %v2332_v18, %v2316_v61 }
 0x45b   : > { %v2372_v44 = vmul.f32 %v2343_v30, %v5054_v58  ;;  %v2373_v37 = vmul.f32 %v2351_v5, %v5057_v63  ;;  %v2663_v49 = vmul.f32 %v2641_v27, %v7432_v38 }
 0x45d   : > { %v2428_v16 = vmul.f32 %v6537_v10, %v2372_v44  ;;  %v2429_v4 = vmul.f32 %v6537_v10, %v2373_v37  ;;  %v2624_v24 = vpop.permute.xlu0 %2623  ;;  %v2334_v41 = vpop.permute.xlu1 %2333 }
 0x45e   : > { %v2634_v26 = vsel %vm1441_vm7, %v2608_v43, %v2624_v24  ;;  %v2642_v29 = vsel %vm1441_vm7, %v2624_v24, %v2608_v43  ;;  %v2344_v7 = vsel %vm1267_vm5, %v2318_v3, %v2334_v41  ;;  %v2352_v28 = vsel %vm1267_vm5, %v2334_v41, %v2318_v3  ;;  %v2892_v24 = vld [vmem:[%s6952_s10 + $0x28] sm:$0xff]  ;;  %v7433_v41 = vld [vmem:[#allocation108_spill] sm:$0xff] }
 0x45f   : > { %v6726_v55 = vadd.f32 %v2428_v16, %v6539_v32  ;;  %v6729_v10 = vadd.f32 %v2429_v4, %v6541_v25  ;;  %v2374_v35 = vmul.f32 %v2344_v7, %v5054_v58  ;;  %v2375_v21 = vmul.f32 %v2352_v28, %v5057_v63 }
 0x460   : > { %v2662_v25 = vmul.f32 %v2633_v11, %v7431_v59  ;;  %v2664_v43 = vmul.f32 %v2634_v26, %v7431_v59  ;;  %v2665_v3 = vmul.f32 %v2642_v29, %v7432_v38  ;;  %v7434_v29 = vld [vmem:[#allocation109_spill] sm:$0xff] }
 0x461   : > { %v6735_v45 = vpop.permute.xlu0 %2702  ;;  %v2418_v61 = vpop.permute.xlu1 %2417  ;;  %v2430_v9 = vmul.f32 %v6611_v1, %v2374_v35  ;;  %v2431_v34 = vmul.f32 %v6611_v1, %v2375_v21 }
 0x462   : > { %v2434_v32 = vmul.f32 %v2418_v61, %v2378_v12  ;;  %v2435_v56 = vmul.f32 %v2418_v61, %v2379_v48 }
 0x463   : > { %v2446_v58 = vadd.f32 %v2430_v9, %v6613_v42  ;;  %v2447_v63 = vadd.f32 %v2431_v34, %v6615_v46  ;;  %3287 = vmax.xlane.f32.xlu1 %v3286_v8  ;;  %v2891_v42 = vld [vmem:[%s6952_s10 + $0x20] sm:$0xff] }
 0x464   : > { %v2450_v60 = vadd.f32 %v2434_v32, %v2305_v13  ;;  %v2451_v62 = vadd.f32 %v2435_v56, %v2306_v52 }
 0x465   : > { %v2465_v39 = vpop.permute.xlu0 %2464  ;;  %v2693_v50 = vpop.permute.xlu1 %2692 }
 0x466   : > { %v2718_v40 = vmul.f32 %v2693_v50, %v2662_v25  ;;  %v2719_v1 = vmul.f32 %v2693_v50, %v2663_v49 }
 0x469   : > { %v2467_v47 = vpop.permute.xlu0 %2466  ;;  %v2698_v54 = vpop.permute.xlu1 %2697 }
 0x46a   : > { %v2720_v18 = vmul.f32 %v2698_v54, %v2664_v43  ;;  %v2721_v11 = vmul.f32 %v2698_v54, %v2665_v3 }
 0x46d   : > { %v2481_v46 = vpop.permute.xlu0 %2480  ;;  %v2461_v13 = vpop.permute.xlu1 %2460 }
 0x46e   : > { %v2490_v52 = vsel %vm1354_vm6, %v2465_v39, %v2481_v46  ;;  %v2498_v27 = vsel %vm1354_vm6, %v2481_v46, %v2465_v39  ;;  %2917 = vperm.xlu0 %3855, %v2891_v42   ;;  %v7435_v42 = vld [vmem:[#allocation113_spill] sm:$0xff] }
 0x46f   : > { %v2522_v50 = vmul.f32 %v2498_v27, %v7434_v29 }
 0x471   : > { %v2483_v30 = vpop.permute.xlu0 %2482  ;;  %v2463_v5 = vpop.permute.xlu1 %2462 }
 0x472   : > { %v2491_v44 = vsel %vm1354_vm6, %v2467_v47, %v2483_v30  ;;  %v2499_v37 = vsel %vm1354_vm6, %v2483_v30, %v2467_v47  ;;  %v2489_v16 = vsel %vm1354_vm6, %v2463_v5, %v6622_v17  ;;  %v2497_v4 = vsel %vm1354_vm6, %v6622_v17, %v2463_v5 }
 0x473   : > { %v2523_v26 = vmul.f32 %v2491_v44, %v7433_v41  ;;  %v2524_v7 = vmul.f32 %v2499_v37, %v7434_v29  ;;  %v2519_v28 = vmul.f32 %v2489_v16, %v7433_v41  ;;  %v2520_v12 = vmul.f32 %v2497_v4, %v7434_v29 }
 0x474   : > { %2922 = vperm.xlu1 %3856, %v2892_v24  }
 0x475   : > { %v2579_v48 = vmul.f32 %v6635_v19, %v2523_v26  ;;  %v2580_v35 = vmul.f32 %v6635_v19, %v2524_v7  ;;  %v2575_v21 = vmul.f32 %v6639_v15, %v2519_v28  ;;  %v2576_v17 = vmul.f32 %v6639_v15, %v2520_v12  ;;  %v2751_v61 = vpop.permute.xlu0 %2750  ;;  %v2477_v9 = vpop.permute.xlu1 %2476  ;;  %v2894_v28 = vld [vmem:[%s6952_s10 + $0x38] sm:$0xff] }
 0x476   : > { %v2488_v34 = vsel %vm1354_vm6, %v2461_v13, %v2477_v9  ;;  %v2496_v32 = vsel %vm1354_vm6, %v2477_v9, %v2461_v13  ;;  %v2521_v15 = vmul.f32 %v2490_v52, %v7433_v41  ;;  %v7436_v13 = vld [vmem:[#allocation114_spill] sm:$0xff] }
 0x477   : > { %v6779_v56 = vadd.f32 %v2579_v48, %v2450_v60  ;;  %v6781_v25 = vadd.f32 %v2580_v35, %v2451_v62  ;;  %v2591_v49 = vadd.f32 %v2575_v21, %v2446_v58  ;;  %v2592_v8 = vadd.f32 %v2576_v17, %v2447_v63 }
 0x478   : > { %v2517_v19 = vmul.f32 %v2488_v34, %v7433_v41  ;;  %v2518_v39 = vmul.f32 %v2496_v32, %v7434_v29  ;;  %2609 = vrot.lane.b32.xlu1 %v6205_v31, %s7423_s17 }
 0x479   : > { %v2767_v43 = vpop.permute.xlu0 %2766  ;;  %v6789_v3 = vadd.f32 %v2720_v18, %v2591_v49  ;;  %v6791_v60 = vadd.f32 %v2721_v11, %v2592_v8  ;;  %v2558_v54 = vpop.permute.xlu1 %2557 }
 0x47a   : > { %v2573_v62 = vmul.f32 %v6609_v2, %v2517_v19  ;;  %v2574_v58 = vmul.f32 %v6609_v2, %v2518_v39  ;;  %v2778_v63 = vsel %vm1528_vm8, %v2751_v61, %v2767_v43  ;;  %v2786_v47 = vsel %vm1528_vm8, %v2767_v43, %v2751_v61 }
 0x47b   : > { %v2807_v46 = vmul.f32 %v2778_v63, %v7435_v42  ;;  %v2808_v52 = vmul.f32 %v2786_v47, %v7436_v13  ;;  %v2577_v27 = vmul.f32 %v2558_v54, %v2521_v15  ;;  %v2578_v18 = vmul.f32 %v2558_v54, %v2522_v50 }
 0x47c   : > { %v2589_v11 = vadd.f32 %v2573_v62, %v6726_v55  ;;  %v2590_v30 = vadd.f32 %v2574_v58, %v6729_v10  ;;  %2611 = vrot.lane.b32.xlu1 %v7429_v51, %s7423_s17 }
 0x47d   : > { %v6804_v5 = vadd.f32 %v2577_v27, %v6692_v23  ;;  %v6807_v2 = vadd.f32 %v2578_v18, %v6694_v0  ;;  %v2838_v44 = vpop.permute.xlu1 %2837 }
 0x47e   : > { %v2734_v37 = vadd.f32 %v2718_v40, %v2589_v11  ;;  %v2735_v16 = vadd.f32 %v2719_v1, %v2590_v30  ;;  %v2863_v4 = vmul.f32 %v2838_v44, %v2807_v46  ;;  %v2864_v24 = vmul.f32 %v2838_v44, %v2808_v52 }
 0x480   : > { %2625 = vrot.lane.b32.xlu1 %v6212_v6, %s7423_s17  ;;  %v2879_v55 = vadd.f32 %v2863_v4, %v2734_v37  ;;  %v2880_v41 = vadd.f32 %v2864_v24, %v2735_v16 }
 0x481   : > { %v6823_v23 = vpop.permute.xlu1 %2707 }
 0x484   : > { %2627 = vrot.lane.b32.xlu1 %v7430_v33, %s7423_s17 }
 0x485   : > { %v2753_v40 = vpop.permute.xlu1 %2752 }
 0x488   : > { %2754 = vrot.lane.b32.xlu1 %v6205_v31, %s7424_s26 }
 0x489   : > { %v2769_v26 = vpop.permute.xlu1 %2768 }
 0x48a   : > { %v2779_v21 = vsel %vm1528_vm8, %v2753_v40, %v2769_v26  ;;  %v2787_v17 = vsel %vm1528_vm8, %v2769_v26, %v2753_v40 }
 0x48b   : > { %v2809_v61 = vmul.f32 %v2779_v21, %v7435_v42  ;;  %v2810_v9 = vmul.f32 %v2787_v17, %v7436_v13 }
 0x48c   : > { %2756 = vrot.lane.b32.xlu1 %v7429_v51, %s7424_s26 }
 0x48d   : > { %v2865_v32 = vmul.f32 %v6637_v53, %v2809_v61  ;;  %v2866_v49 = vmul.f32 %v6637_v53, %v2810_v9 }
 0x48f   : > { %v2881_v50 = vadd.f32 %v2865_v32, %v6789_v3  ;;  %v2882_v43 = vadd.f32 %v2866_v49, %v6791_v60  ;;  %v3429_v32 = vld [vmem:[%s6955_s13] sm:$0xff] }
 0x490   : > { %2770 = vrot.lane.b32.xlu1 %v6212_v6, %s7424_s26 }
 0x494   : > { %2772 = vrot.lane.b32.xlu1 %v7430_v33, %s7424_s26 }
 0x4b0   : > { %v3285_v0 = vpop.xlane.xlu0 %3284 }
 0x4b1   : > { %v3293_v10 = vsub.f32 %v6563_v20, %v3285_v0 }
 0x4b3   : > { %v3298_v1 = vmul.f32 1.442695, %v3293_v10 }
 0x4b5   : > { %3873 = vpow2.f32 %v3298_v1 }
 0x4bb   : > { %v3282_v29 = vpop.xlane.xlu1 %3281 }
 0x4bc   : > { %v3292_v31 = vsub.f32 %v6599_v57, %v3282_v29  ;;  %v2848_v57 = vpop.permute.xlu0 %2847 }
 0x4be   : > { %v3296_v51 = vmul.f32 1.442695, %v3292_v31 }
 0x4bf   : > { %v6827_v7 = vpop.eup %3873  ;;  %v2853_v34 = vpop.permute.xlu1 %2852 }
 0x4c0   : > { %v3307_v6 = vsel %vm546_vm0, %v6827_v7, 0.0  ;;  %3875 = vpow2.f32 %v3296_v51 }
 0x4c1   : > { %3308 = vadd.xlane.f32.xlu1 %v3307_v6 }
 0x4ca   : > { %v6831_v33 = vpop.eup %3875 }
 0x4cb   : > { %v3304_v20 = vsel %vm546_vm0, %v6831_v33, 0.0 }
 0x4cc   : > { %3305 = vadd.xlane.f32.xlu0 %v3304_v20 }
 0x4d2   : > { %2932 = vperm.xlu1 %3856, %v2894_v28  }
 0x4e5   : > { %v3291_v12 = vpop.xlane.xlu0 %3290 }
 0x4e6   : > { %v3295_v48 = vsub.f32 %v6696_v22, %v3291_v12 }
 0x4e8   : > { %v3302_v35 = vmul.f32 1.442695, %v3295_v48 }
 0x4ea   : > { %3877 = vpow2.f32 %v3302_v35  ;;  %v2893_v35 = vld [vmem:[%s6952_s10 + $0x30] sm:$0xff] }
 0x4ed   : > { %v2918_v19 = vpop.permute.xlu0 %2917 }
 0x4ee   : > { %v2943_v62 = vadd.f32 %v2918_v19, %v2879_v55  ;;  %v2944_v47 = vadd.f32 %v2918_v19, %v2880_v41 }
 0x4f0   : > { %v3288_v8 = vpop.xlane.xlu1 %3287 }
 0x4f1   : > { %v3294_v22 = vsub.f32 %v6723_v36, %v3288_v8 }
 0x4f3   : > { %v3300_v15 = vmul.f32 1.442695, %v3294_v22 }
 0x4f4   : > { %v6848_v39 = vpop.eup %3877  ;;  %v2923_v58 = vpop.permute.xlu1 %2922 }
 0x4f5   : > { %v3313_v63 = vsel %vm546_vm0, %v6848_v39, 0.0  ;;  %3879 = vpow2.f32 %v3300_v15  ;;  %v2945_v54 = vadd.f32 %v2923_v58, %v2881_v50  ;;  %v2946_v53 = vadd.f32 %v2923_v58, %v2882_v43 }
 0x4f6   : > { %3314 = vadd.xlane.f32.xlu1 %v3313_v63 }
 0x4f7   : > { %v3810_v46 = vpack.c.bf16 %v2946_v53, %v2944_v47  ;;  %v3812_v52 = vpack.c.bf16 %v2945_v54, %v2943_v62 }
 0x4f8   : > { %v2610_v36 = vpop.permute.xlu1 %2609 }
 0x4f9   : > { %3811 = vmatprep.subr.bf16.mxu0 %v3810_v46 }
 0x4fa   : > { %3813 = vmatpush1.bf16.msra.mxu0 %v3812_v52 }
 0x4fc   : > { %v2612_v27 = vpop.permute.xlu1 %2611 }
 0x4ff   : > { %v6854_v18 = vpop.eup %3879 }
 0x500   : > { %v2626_v3 = vpop.permute.xlu1 %2625  ;;  %v3310_v60 = vsel %vm546_vm0, %v6854_v18, 0.0 }
 0x501   : > { %3311 = vadd.xlane.f32.xlu0 %v3310_v60  ;;  %v2635_v30 = vsel %vm1441_vm7, %v2610_v36, %v2626_v3  ;;  %v2643_v44 = vsel %vm1441_vm7, %v2626_v3, %v2610_v36 }
 0x502   : > { %v2666_v16 = vmul.f32 %v2635_v30, %v7431_v59  ;;  %v2667_v4 = vmul.f32 %v2643_v44, %v7432_v38 }
 0x504   : > { %v2628_v11 = vpop.permute.xlu1 %2627  ;;  %v2722_v0 = vmul.f32 %v6735_v45, %v2666_v16  ;;  %v2723_v10 = vmul.f32 %v6735_v45, %v2667_v4 }
 0x505   : > { %v2636_v55 = vsel %vm1441_vm7, %v2612_v27, %v2628_v11  ;;  %v2644_v41 = vsel %vm1441_vm7, %v2628_v11, %v2612_v27  ;;  %v7437_v27 = vmov 0.0  }
 0x506   : > { %v2668_v40 = vmul.f32 %v2636_v55, %v7431_v59  ;;  %v2669_v1 = vmul.f32 %v2644_v41, %v7432_v38  ;;  %v2738_v20 = vadd.f32 %v2722_v0, %v6804_v5  ;;  %v2739_v28 = vadd.f32 %v2723_v10, %v6807_v2 }
 0x508   : > { %v2755_v37 = vpop.permute.xlu1 %2754  ;;  %v2724_v45 = vmul.f32 %v6823_v23, %v2668_v40  ;;  %v2725_v59 = vmul.f32 %v6823_v23, %v2669_v1  ;;  %v3426_v1 = vld [vmem:[%s6954_s12 + $0x8] sm:$0xff] }
 0x50a   : > { %v2740_v49 = vadd.f32 %v2724_v45, %v6779_v56  ;;  %v2741_v8 = vadd.f32 %v2725_v59, %v6781_v25 }
 0x50c   : > { %v2757_v24 = vpop.permute.xlu1 %2756 }
 0x510   : > { %v2771_v26 = vpop.permute.xlu1 %2770 }
 0x511   : > { %v2780_v29 = vsel %vm1528_vm8, %v2755_v37, %v2771_v26  ;;  %v2788_v31 = vsel %vm1528_vm8, %v2771_v26, %v2755_v37  ;;  %v3427_v26 = vld [vmem:[%s6954_s12 + $0x10] sm:$0xff] }
 0x512   : > { %v2811_v51 = vmul.f32 %v2780_v29, %v7435_v42  ;;  %v2812_v6 = vmul.f32 %v2788_v31, %v7436_v13  ;;  %v3428_v29 = vld [vmem:[%s6954_s12 + $0x18] sm:$0xff] }
 0x514   : > { %v2867_v38 = vmul.f32 %v2848_v57, %v2811_v51  ;;  %v2868_v12 = vmul.f32 %v2848_v57, %v2812_v6  ;;  %v2773_v48 = vpop.permute.xlu1 %2772 }
 0x515   : > { %v2781_v21 = vsel %vm1528_vm8, %v2757_v24, %v2773_v48  ;;  %v2789_v17 = vsel %vm1528_vm8, %v2773_v48, %v2757_v24 }
 0x516   : > { %v2813_v5 = vmul.f32 %v2781_v21, %v7435_v42  ;;  %v2814_v2 = vmul.f32 %v2789_v17, %v7436_v13  ;;  %v2883_v61 = vadd.f32 %v2867_v38, %v2738_v20  ;;  %v2884_v9 = vadd.f32 %v2868_v12, %v2739_v28  ;;  %v3430_v42 = vld [vmem:[%s6955_s13 + $0x8] sm:$0xff]  ;;  %v3431_v13 = vld [vmem:[%s6955_s13 + $0x10] sm:$0xff] }
 0x517   : > { %2927 = vperm.xlu0 %3855, %v2893_v35  }
 0x518   : > { %v2869_v23 = vmul.f32 %v2853_v34, %v2813_v5  ;;  %v2870_v57 = vmul.f32 %v2853_v34, %v2814_v2  ;;  %v3432_v34 = vld [vmem:[%s6955_s13 + $0x18] sm:$0xff] }
 0x51a   : > { %v2885_v19 = vadd.f32 %v2869_v23, %v2740_v49  ;;  %v2886_v14 = vadd.f32 %v2870_v57, %v2741_v8 }
 0x51b   : > { %3435 = vperm.xlu0 %3855, %v3429_v32  }
 0x51f   : > { %3440 = vperm.xlu0 %3855, %v3430_v42  }
 0x523   : > { %3445 = vperm.xlu0 %3855, %v3431_v13  }
 0x527   : > { %3450 = vperm.xlu0 %3855, %v3432_v34  }
 0x54e   : > { %v3309_v25 = vpop.xlane.xlu1 %3308 }
 0x552   : > { %v2933_v15 = vpop.permute.xlu1 %2932 }
 0x553   : > { %v2949_v43 = vadd.f32 %v2933_v15, %v2885_v19  ;;  %v2950_v62 = vadd.f32 %v2933_v15, %v2886_v14 }
 0x559   : > { %v3306_v56 = vpop.xlane.xlu0 %3305 }
 0x55a   : > { %3881 = vrcp.f32 %v3306_v56 }
 0x55b   : > { %3883 = vrcp.f32 %v3309_v25 }
 0x564   : > { %v3882_v46 = vpop.eup %3881 }
 0x565   : > { %v3320_v52 = vmul.f32 %v3882_v46, %v6831_v33  ;;  %v3884_v36 = vpop.eup %3883 }
 0x566   : > { %v3321_v3 = vmul.f32 %v3884_v36, %v6827_v7 }
 0x583   : > { %v3315_v47 = vpop.xlane.xlu1 %3314 }
 0x58e   : > { %v3312_v22 = vpop.xlane.xlu0 %3311 }
 0x58f   : > { %3885 = vrcp.f32 %v3312_v22 }
 0x590   : > { %3887 = vrcp.f32 %v3315_v47 }
 0x596   : > { %v2928_v50 = vpop.permute.xlu0 %2927 }
 0x597   : > { %v2947_v58 = vadd.f32 %v2928_v50, %v2883_v61  ;;  %v2948_v63 = vadd.f32 %v2928_v50, %v2884_v9 }
 0x599   : > { %v3814_v54 = vpack.c.bf16 %v2950_v62, %v2948_v63  ;;  %v3816_v53 = vpack.c.bf16 %v2949_v43, %v2947_v58  ;;  %v3886_v60 = vpop.eup %3885 }
 0x59a   : > { %v3322_v11 = vmul.f32 %v3886_v60, %v6854_v18  ;;  %v3888_v30 = vpop.eup %3887  ;;  %v3436_v31 = vpop.permute.xlu0 %3435 }
 0x59b   : > { %3815 = vmatprep.subr.bf16.mxu0 %v3814_v54  ;;  %v3323_v33 = vmul.f32 %v3888_v30, %v6848_v39  ;;  %v3425_v39 = vld [vmem:[%s6954_s12] sm:$0xff] }
 0x59c   : > { %3817 = vmatpush1.bf16.msra.mxu0 %v3816_v53 }
 0x59e   : > { %v3441_v51 = vpop.permute.xlu0 %3440 }
 0x59f   : > { %3773 = vmatmul.mubr.msk.f32.vlgmr.msra.gmra.mrb[16].mxu0 %vm546_vm0, %v3320_v52 }
 0x5a0   : > { %3406 = vmatprep.mubr.f32.mxu0 %v7437_v27 }
 0x5a2   : > { %v3446_v48 = vpop.permute.xlu0 %3445 }
 0x5a3   : > { %3774 = vmatmul.mubr.msk.f32.gmra.mrb[18].mxu0 %vm546_vm0, %v3321_v3 }
 0x5a4   : > { %3412 = vmatprep.mubr.f32.mxu0 %v7437_v27 }
 0x5a6   : > { %v3451_v61 = vpop.permute.xlu0 %3450 }
 0x5a7   : > { %3775 = vmatmul.mubr.msk.f32.gmra.mrb[20].mxu0 %vm546_vm0, %v3322_v11 }
 0x5a8   : > { %3418 = vmatprep.mubr.f32.mxu0 %v7437_v27 }
 0x5ab   : > { %3776 = vmatmul.mubr.msk.f32.gmra.mrb[22].mxu0 %vm546_vm0, %v3323_v33 }
 0x672   : > { %v3402_v44 = vpop.f32.mrb[16].mxu0 }
 0x673   : > { %v3404_v37 = vpop.f32.mrb[17].mxu0 }
 0x676   : > { %v3408_v16 = vpop.f32.mrb[18].mxu0 }
 0x677   : > { %v3820_v7 = vpack.c.bf16 %v3408_v16, %v3402_v44  ;;  %v3410_v4 = vpop.f32.mrb[19].mxu0 }
 0x678   : > { %v3818_v24 = vpack.c.bf16 %v3410_v4, %v3404_v37 }
 0x67a   : > { %v3414_v55 = vpop.f32.mrb[20].mxu0  ;;  %3819 = vmatprep.subr.bf16.mxu1 %v3818_v24 }
 0x67b   : > { %v3416_v41 = vpop.f32.mrb[21].mxu0  ;;  %3821 = vmatpush1.bf16.msra.mxu1 %v3820_v7 }
 0x67e   : > { %v3420_v18 = vpop.f32.mrb[22].mxu0 }
 0x67f   : > { %v3824_v0 = vpack.c.bf16 %v3420_v18, %v3414_v55  ;;  %v3422_v10 = vpop.f32.mrb[23].mxu0 }
 0x680   : > { %v3822_v40 = vpack.c.bf16 %v3422_v10, %v3416_v41 }
 0x682   : > { %3823 = vmatprep.subr.bf16.mxu1 %v3822_v40 }
 0x683   : > { %3825 = vmatpush1.bf16.msra.mxu1 %v3824_v0 }
 0x686   : > { %3777 = vmatmul.mubr.msk.f32.vlgmr.msra.gmra.mrb[16].mxu1 %vm546_vm0, %v3425_v39 }
 0x687   : > { %3535 = vmatprep.mubr.f32.mxu1 %v7437_v27 }
 0x68a   : > { %3778 = vmatmul.mubr.msk.f32.gmra.mrb[18].mxu1 %vm546_vm0, %v3426_v1 }
 0x68b   : > { %3541 = vmatprep.mubr.f32.mxu1 %v7437_v27 }
 0x68e   : > { %3779 = vmatmul.mubr.msk.f32.gmra.mrb[20].mxu1 %vm546_vm0, %v3427_v26 }
 0x68f   : > { %3547 = vmatprep.mubr.f32.mxu1 %v7437_v27 }
 0x692   : > { %3780 = vmatmul.mubr.msk.f32.gmra.mrb[22].mxu1 %vm546_vm0, %v3428_v29 }
 0x759   : > { %v3531_v6 = vpop.f32.mrb[16].mxu1 }
 0x75a   : > { %v3532_v20 = vadd.f32 %v3531_v6, %v3436_v31  ;;  %v3533_v28 = vpop.f32.mrb[17].mxu1 }
 0x75b   : > { %v3534_v45 = vadd.f32 %v3533_v28, %v3436_v31 }
 0x75c   : > { %3554 = vst [vmem:[%s501_s21] sm:$0xff] %v3532_v20 }
 0x75d   : > { %3555 = vst [vmem:[%s501_s21 + $0x8] sm:$0xff] %v3534_v45  ;;  %v3537_v59 = vpop.f32.mrb[18].mxu1 }
 0x75e   : > { %v3538_v38 = vadd.f32 %v3537_v59, %v3441_v51  ;;  %v3539_v12 = vpop.f32.mrb[19].mxu1 }
 0x75f   : > { %v3540_v35 = vadd.f32 %v3539_v12, %v3441_v51 }
 0x760   : > { %3556 = vst [vmem:[%s501_s21 + $0x10] sm:$0xff] %v3538_v38 }
 0x761   : > { %3557 = vst [vmem:[%s501_s21 + $0x18] sm:$0xff] %v3540_v35  ;;  %v3543_v21 = vpop.f32.mrb[20].mxu1 }
 0x762   : > { %v3544_v17 = vadd.f32 %v3543_v21, %v3446_v48  ;;  %v3545_v5 = vpop.f32.mrb[21].mxu1 }
 0x763   : > { %v3546_v2 = vadd.f32 %v3545_v5, %v3446_v48 }
 0x764   : > { %3558 = vst [vmem:[%s501_s21 + $0x20] sm:$0xff] %v3544_v17 }
 0x765   : > { %3559 = vst [vmem:[%s501_s21 + $0x28] sm:$0xff] %v3546_v2  ;;  %v3549_v9 = vpop.f32.mrb[22].mxu1 }
 0x766   : > { %v3550_v23 = vadd.f32 %v3549_v9, %v3451_v61  ;;  %v3551_v57 = vpop.f32.mrb[23].mxu1 }
 0x767   : > { %v3552_v32 = vadd.f32 %v3551_v57, %v3451_v61 }
 0x768   : > { %3560 = vst [vmem:[%s501_s21 + $0x30] sm:$0xff] %v3550_v23 }
 0x769   : > { %3561 = vst [vmem:[%s501_s21 + $0x38] sm:$0xff] %v3552_v32 }
 0x76a PF: > { %s25_s29 = sadd.s32 1, %s3914_s29  }
 0x76b   : > { %p22_p1 = scmp.ge.s32.totalorder %s25_s29, 4  }
 0x76d   :  { %24 = sbr.rel (!%p22_p1) target bundleno = 1 (0x1), region = 138 }
 0x774   :  { %3583 = vsyncpa [#allocation3], 1 }
 0x775   :  { %3585 = vsyncpa [#allocation3 + $0x1], 1 }

</bundles_post_ra>
